<compile_context>
chip_gen: v6e
topology: v6e:2x2x1
jax: 0.10.0
libtpu: 0.0.40
codegen_flags: <defaults>
</compile_context>

<pallas_src>
import functools

import jax
import jax.numpy as jnp
from jax import lax
import numpy as np
from jax.experimental import pallas as pl
from jax.experimental.pallas import tpu as pltpu

# Geometry for 28x28 single-channel input, 5x5 valid convs, 2x2 pools.
H0 = 28            # input spatial
H1, C1 = 24, 8     # conv1 output spatial / padded channels (6 real)
P1H = 12           # pool1 output spatial
H2, C2 = 8, 16     # conv2 output spatial / channels
P2H = 4            # pool2 output spatial
FCP = 128          # fc lane padding (120 / 84 / 10 real)
KS = 5             # conv kernel size


# --------------------------------- kernel ------------------------------------

def _lenet_kernel(x_ref, w1_ref, b1_ref, s1_ref, d1_ref,
                  w2_ref, b2_ref, s2_ref, d2_ref,
                  wf1_ref, bf1_ref, wf2_ref, bf2_ref, wf3_ref, bf3_ref,
                  out_ref, *, bb, mm_dtype):
    f32 = jnp.float32

    def mm(a, w_ref):
        # MXU matmul; operands optionally bf16, accumulation always f32.
        return jnp.dot(a.astype(mm_dtype), w_ref[...], preferred_element_type=f32)

    def pool_select(s_ref, a, d_ref):
        # Exact f32 row/lane decimation via one-hot selection matrices (MXU).
        return jnp.dot(jnp.dot(s_ref[...], a, preferred_element_type=f32),
                       d_ref[...], preferred_element_type=f32)

    x = x_ref[...]                                              # (bb*28, 28)

    # ---- conv1 + ReLU: one matmul against a block-Toeplitz weight -----------
    r1 = bb * H0 - (KS - 1)
    l1 = jnp.concatenate([x[ky:ky + r1, :] for ky in range(KS)], axis=-1)
    a1 = jnp.maximum(mm(l1, w1_ref) + b1_ref[...], 0.0)         # (r1, 24*8)

    # ---- pool1 (2x2): 4-way shifted max + row/lane decimation ---------------
    wl1 = H1 * C1 - C1                                          # 184
    m1 = jnp.maximum(jnp.maximum(a1[:-1, :wl1], a1[1:, :wl1]),
                     jnp.maximum(a1[:-1, C1:], a1[1:, C1:]))    # (r1-1, 184)
    p1 = pool_select(s1_ref, m1, d1_ref)                        # (bb*12, 96)

    # ---- conv2 + ReLU --------------------------------------------------------
    r2 = bb * P1H - (KS - 1)
    l2 = jnp.concatenate([p1[ky:ky + r2, :] for ky in range(KS)], axis=-1)
    a2 = jnp.maximum(mm(l2, w2_ref) + b2_ref[...], 0.0)         # (r2, 8*16)

    # ---- pool2 ---------------------------------------------------------------
    wl2 = H2 * C2 - C2                                          # 112
    m2 = jnp.maximum(jnp.maximum(a2[:-1, :wl2], a2[1:, :wl2]),
                     jnp.maximum(a2[:-1, C2:], a2[1:, C2:]))    # (r2-1, 112)
    p2 = pool_select(s2_ref, m2, d2_ref)                        # (4*bb, 64), rows = hp*bb + b

    # ---- fc1 / fc2 / fc3 (batched, 128-lane padded) --------------------------
    lf = jnp.concatenate([p2[hp * bb:(hp + 1) * bb, :] for hp in range(P2H)],
                         axis=-1)                               # (bb, 256)
    h1 = jnp.maximum(mm(lf, wf1_ref) + bf1_ref[...], 0.0)       # (bb, 128)
    h2 = jnp.maximum(mm(h1, wf2_ref) + bf2_ref[...], 0.0)       # (bb, 128)
    out_ref[...] = (mm(h2, wf3_ref) + bf3_ref[...]).astype(out_ref.dtype)


# --------------------------- host-side preparation ---------------------------

def prepare_params(p, *, bb=8, matmul_dtype=jnp.float32):
    """One-time re-layout of PyTorch-style weights into the kernel layout."""
    assert bb % 8 == 0, "batch block must be a multiple of 8"
    w1 = np.asarray(p["w1"], np.float32)      # (6, 1, 5, 5)   OIHW
    b1 = np.asarray(p["b1"], np.float32)
    w2 = np.asarray(p["w2"], np.float32)      # (16, 6, 5, 5)
    b2 = np.asarray(p["b2"], np.float32)
    wf1 = np.asarray(p["wf1"], np.float32)    # (120, 256), in-index = c*16 + h*4 + w
    wf2 = np.asarray(p["wf2"], np.float32)    # (84, 120)
    wf3 = np.asarray(p["wf3"], np.float32)    # (10, 84)

    # conv1 block-Toeplitz: lhs lane (per ky band) = input column, out lane = j*8 + co.
    w1t = np.zeros((KS * H0, H1 * C1), np.float32)              # (140, 192)
    for ky in range(KS):
        for j in range(H1):
            for kx in range(KS):
                w1t[ky * H0 + j + kx, j * C1:j * C1 + 6] = w1[:, 0, ky, kx]
    b1p = np.zeros((1, H1 * C1), np.float32)
    for j in range(H1):
        b1p[0, j * C1:j * C1 + 6] = b1

    # conv2 block-Toeplitz over pool1's packed layout (lane = jp*8 + cin).
    w2t = np.zeros((KS * P1H * C1, H2 * C2), np.float32)        # (480, 128)
    for ky in range(KS):
        for j in range(H2):
            for kx in range(KS):
                jj = j + kx
                for c in range(6):
                    w2t[ky * P1H * C1 + jj * C1 + c, j * C2:(j + 1) * C2] = w2[:, c, ky, kx]
    b2p = np.zeros((1, H2 * C2), np.float32)
    for j in range(H2):
        b2p[0, j * C2:(j + 1) * C2] = b2

    # pool1 decimation: rows b*28 + 2p -> b*12 + p ; lanes 16*jp + c -> 8*jp + c.
    r1 = bb * H0 - (KS - 1)
    s1 = np.zeros((bb * P1H, r1 - 1), np.float32)
    for b in range(bb):
        for pp in range(P1H):
            s1[b * P1H + pp, b * H0 + 2 * pp] = 1.0
    d1 = np.zeros((H1 * C1 - C1, P1H * C1), np.float32)         # (184, 96)
    for jp in range(P1H):
        for c in range(C1):
            d1[2 * jp * C1 + c, jp * C1 + c] = 1.0

    # pool2 decimation: rows b*12 + 2hp -> hp*bb + b (hp-major, for the fc flatten).
    r2 = bb * P1H - (KS - 1)
    s2 = np.zeros((P2H * bb, r2 - 1), np.float32)
    for hp in range(P2H):
        for b in range(bb):
            s2[hp * bb + b, b * P1H + 2 * hp] = 1.0
    d2 = np.zeros((H2 * C2 - C2, P2H * C2), np.float32)         # (112, 64)
    for jp in range(P2H):
        for c in range(C2):
            d2[2 * jp * C2 + c, jp * C2 + c] = 1.0

    # fc1 with PyTorch (c, h, w) flatten order baked into the row permutation;
    # kernel lhs lane = hp*64 + jp*16 + c.
    wf1t = np.zeros((P2H * P2H * C2, FCP), np.float32)          # (256, 128)
    for hp in range(P2H):
        for jp in range(P2H):
            for c in range(C2):
                wf1t[hp * 64 + jp * 16 + c, :120] = wf1[:, c * 16 + hp * 4 + jp]
    wf2t = np.zeros((FCP, FCP), np.float32)
    wf2t[:120, :84] = wf2.T
    wf3t = np.zeros((FCP, FCP), np.float32)
    wf3t[:84, :10] = wf3.T
    bf1p = np.zeros((1, FCP), np.float32); bf1p[0, :120] = np.asarray(p["bf1"])
    bf2p = np.zeros((1, FCP), np.float32); bf2p[0, :84] = np.asarray(p["bf2"])
    bf3p = np.zeros((1, FCP), np.float32); bf3p[0, :10] = np.asarray(p["bf3"])

    mmd = matmul_dtype
    return dict(
        w1=jnp.asarray(w1t, dtype=mmd), b1=jnp.asarray(b1p),
        s1=jnp.asarray(s1), d1=jnp.asarray(d1),
        w2=jnp.asarray(w2t, dtype=mmd), b2=jnp.asarray(b2p),
        s2=jnp.asarray(s2), d2=jnp.asarray(d2),
        wf1=jnp.asarray(wf1t, dtype=mmd), bf1=jnp.asarray(bf1p),
        wf2=jnp.asarray(wf2t, dtype=mmd), bf2=jnp.asarray(bf2p),
        wf3=jnp.asarray(wf3t, dtype=mmd), bf3=jnp.asarray(bf3p),
    )


@functools.partial(jax.jit, static_argnames=("bb", "matmul_dtype"))
def lenet_forward(x, q, *, bb=8, matmul_dtype=jnp.float32):
    """x: (B, 1, 28, 28) NCHW.  q: prepare_params(..., bb=bb) output.  -> (B, 10)."""
    B = x.shape[0]
    g = pl.cdiv(B, bb)                 # keep g >= 2 on v7x when B allows (pick bb <= B//2)
    bp = g * bb
    xi = x.reshape(B, H0, H0).astype(jnp.float32)
    if bp != B:
        xi = jnp.pad(xi, ((0, bp - B), (0, 0), (0, 0)))
    x2 = xi.reshape(bp * H0, H0)       # host-side layout only: rows = b*28 + h

    def cspec(a):
        nd = a.ndim
        return pl.BlockSpec(a.shape, lambda i, _n=nd: (0,) * _n)

    consts = [q["w1"], q["b1"], q["s1"], q["d1"],
              q["w2"], q["b2"], q["s2"], q["d2"],
              q["wf1"], q["bf1"], q["wf2"], q["bf2"], q["wf3"], q["bf3"]]

    out = pl.pallas_call(
        functools.partial(_lenet_kernel, bb=bb, mm_dtype=matmul_dtype),
        out_shape=jax.ShapeDtypeStruct((bp, FCP), jnp.float32),
        grid=(g,),
        in_specs=[pl.BlockSpec((bb * H0, H0), lambda i: (i, 0))]
                 + [cspec(a) for a in consts],
        out_specs=pl.BlockSpec((bb, FCP), lambda i: (i, 0)),
        compiler_params=pltpu.CompilerParams(
            dimension_semantics=("parallel",),
            vmem_limit_bytes=32 * 1024 * 1024,
        ),
    )(x2, *consts)
    return out[:B, :10]


# ------------------------- pure-JAX reference check --------------------------

def ref_forward(x, p):
    def conv(x, w, b):
        y = lax.conv_general_dilated(
            x, w, (1, 1), "VALID",
            dimension_numbers=("NCHW", "OIHW", "NCHW"))
        return jnp.maximum(y + b[None, :, None, None], 0.0)

    def pool(x):
        return lax.reduce_window(x, -jnp.inf, lax.max,
                                 (1, 1, 2, 2), (1, 1, 2, 2), "VALID")

    y = pool(conv(x, p["w1"], p["b1"]))
    y = pool(conv(y, p["w2"], p["b2"]))
    y = y.reshape(y.shape[0], -1)
    y = jnp.maximum(y @ p["wf1"].T + p["bf1"], 0.0)
    y = jnp.maximum(y @ p["wf2"].T + p["bf2"], 0.0)
    return y @ p["wf3"].T + p["bf3"]


# ----------------------------------- main -------------------------------------

def init_params(key):
    ks = jax.random.split(key, 10)

    def n(k, shape, scale=0.1):
        return (scale * jax.random.normal(k, shape)).astype(jnp.float32)

    # Shapes match the PyTorch LeNet.__init__ (weights stored as (out, in, ...)).
    return dict(
        w1=n(ks[0], (6, 1, 5, 5)),   b1=n(ks[1], (6,)),
        w2=n(ks[2], (16, 6, 5, 5)),  b2=n(ks[3], (16,)),
        wf1=n(ks[4], (120, 256)),    bf1=n(ks[5], (120,)),
        wf2=n(ks[6], (84, 120)),     bf2=n(ks[7], (84,)),
        wf3=n(ks[8], (10, 84)),      bf3=n(ks[9], (10,)),
    )


if __name__ == "__main__":
    key = jax.random.PRNGKey(0)
    kx, kp = jax.random.split(key)
    # 28x28 single-channel input (required by the module's fc_input_size math).
    x = jax.random.normal(kx, (2, 1, 28, 28), dtype=jnp.float32)
    params = init_params(kp)
    ref = jax.block_until_ready(ref_forward(x, params))

    # Exact f32 path.
    q32 = prepare_params(params, bb=8, matmul_dtype=jnp.float32)
    out32 = jax.block_until_ready(lenet_forward(x, q32, bb=8,
                                                matmul_dtype=jnp.float32))
    assert out32.shape == (2, 10), out32.shape
    np.testing.assert_allclose(np.asarray(out32), np.asarray(ref),
                               rtol=1e-4, atol=1e-4)

    # bf16 MXU-operand path (v5e/v6e/v7x matmul throughput); f32 accumulation
    # and epilogue, so only a loosened tolerance is needed.
    qbf = prepare_params(params, bb=8, matmul_dtype=jnp.bfloat16)
    outbf = jax.block_until_ready(lenet_forward(x, qbf, bb=8,
                                                matmul_dtype=jnp.bfloat16))
    np.testing.assert_allclose(np.asarray(outbf), np.asarray(ref),
                               rtol=3e-2, atol=3e-2)

    print("KERNEL_OK")
</pallas_src>

<mosaic_0001>
module attributes {stable_mosaic.version = 11 : i64} {
  func.func @_lenet_kernel(%arg0: i32, %arg1: memref<224x28xf32, #tpu.memory_space<vmem>>, %arg2: memref<140x192xf32, #tpu.memory_space<vmem>>, %arg3: memref<1x192xf32, #tpu.memory_space<vmem>>, %arg4: memref<96x219xf32, #tpu.memory_space<vmem>>, %arg5: memref<184x96xf32, #tpu.memory_space<vmem>>, %arg6: memref<480x128xf32, #tpu.memory_space<vmem>>, %arg7: memref<1x128xf32, #tpu.memory_space<vmem>>, %arg8: memref<32x91xf32, #tpu.memory_space<vmem>>, %arg9: memref<112x64xf32, #tpu.memory_space<vmem>>, %arg10: memref<256x128xf32, #tpu.memory_space<vmem>>, %arg11: memref<1x128xf32, #tpu.memory_space<vmem>>, %arg12: memref<128x128xf32, #tpu.memory_space<vmem>>, %arg13: memref<1x128xf32, #tpu.memory_space<vmem>>, %arg14: memref<128x128xf32, #tpu.memory_space<vmem>>, %arg15: memref<1x128xf32, #tpu.memory_space<vmem>>, %arg16: memref<8x128xf32, #tpu.memory_space<vmem>>) attributes {dimension_semantics = [#tpu.dimension_semantics<parallel>], iteration_bounds = array<i64: 1>, scalar_prefetch = 0 : i64, scratch_operands = 0 : i64, tpu.core_type = #tpu.core_type<tc>, window_params = [{transform_indices = @transform_0, window_bounds = array<i64: 224, 28>}, {pipeline_mode = #tpu.pipeline_mode<synchronous>, transform_indices = @transform_1, window_bounds = array<i64: 140, 192>}, {pipeline_mode = #tpu.pipeline_mode<synchronous>, transform_indices = @transform_2, window_bounds = array<i64: 1, 192>}, {pipeline_mode = #tpu.pipeline_mode<synchronous>, transform_indices = @transform_3, window_bounds = array<i64: 96, 219>}, {pipeline_mode = #tpu.pipeline_mode<synchronous>, transform_indices = @transform_4, window_bounds = array<i64: 184, 96>}, {pipeline_mode = #tpu.pipeline_mode<synchronous>, transform_indices = @transform_5, window_bounds = array<i64: 480, 128>}, {pipeline_mode = #tpu.pipeline_mode<synchronous>, transform_indices = @transform_6, window_bounds = array<i64: 1, 128>}, {pipeline_mode = #tpu.pipeline_mode<synchronous>, transform_indices = @transform_7, window_bounds = array<i64: 32, 91>}, {pipeline_mode = #tpu.pipeline_mode<synchronous>, transform_indices = @transform_8, window_bounds = array<i64: 112, 64>}, {pipeline_mode = #tpu.pipeline_mode<synchronous>, transform_indices = @transform_9, window_bounds = array<i64: 256, 128>}, {pipeline_mode = #tpu.pipeline_mode<synchronous>, transform_indices = @transform_10, window_bounds = array<i64: 1, 128>}, {pipeline_mode = #tpu.pipeline_mode<synchronous>, transform_indices = @transform_11, window_bounds = array<i64: 128, 128>}, {pipeline_mode = #tpu.pipeline_mode<synchronous>, transform_indices = @transform_12, window_bounds = array<i64: 1, 128>}, {pipeline_mode = #tpu.pipeline_mode<synchronous>, transform_indices = @transform_13, window_bounds = array<i64: 128, 128>}, {pipeline_mode = #tpu.pipeline_mode<synchronous>, transform_indices = @transform_14, window_bounds = array<i64: 1, 128>}, {transform_indices = @transform_15, window_bounds = array<i64: 8, 128>}]} {
    %c0 = arith.constant 0 : index
    %c0_0 = arith.constant 0 : index
    %0 = vector.load %arg1[%c0, %c0_0] : memref<224x28xf32, #tpu.memory_space<vmem>>, vector<224x28xf32>
    %1 = vector.extract_strided_slice %0 {offsets = [0, 0], sizes = [220, 28], strides = [1, 1]} : vector<224x28xf32> to vector<220x28xf32>
    %2 = vector.extract_strided_slice %0 {offsets = [1, 0], sizes = [220, 28], strides = [1, 1]} : vector<224x28xf32> to vector<220x28xf32>
    %3 = vector.extract_strided_slice %0 {offsets = [2, 0], sizes = [220, 28], strides = [1, 1]} : vector<224x28xf32> to vector<220x28xf32>
    %4 = vector.extract_strided_slice %0 {offsets = [3, 0], sizes = [220, 28], strides = [1, 1]} : vector<224x28xf32> to vector<220x28xf32>
    %5 = vector.extract_strided_slice %0 {offsets = [4, 0], sizes = [220, 28], strides = [1, 1]} : vector<224x28xf32> to vector<220x28xf32>
    %6 = tpu.concatenate %1, %2, %3, %4, %5 in 1 : vector<220x28xf32>, vector<220x28xf32>, vector<220x28xf32>, vector<220x28xf32>, vector<220x28xf32> -> vector<220x140xf32>
    %c0_1 = arith.constant 0 : index
    %c0_2 = arith.constant 0 : index
    %7 = vector.load %arg2[%c0_1, %c0_2] : memref<140x192xf32, #tpu.memory_space<vmem>>, vector<140x192xf32>
    %cst = arith.constant dense<0.000000e+00> : vector<220x192xf32>
    %8 = tpu.matmul %6, %7, %cst {dimension_numbers = #tpu.dot_dimension_numbers<[1], [0], [0], [1], [0, 0, 1, 1], [], []>} : vector<220x140xf32>, vector<140x192xf32>, vector<220x192xf32> -> vector<220x192xf32>
    %c0_3 = arith.constant 0 : index
    %c0_4 = arith.constant 0 : index
    %9 = vector.load %arg3[%c0_3, %c0_4] : memref<1x192xf32, #tpu.memory_space<vmem>>, vector<1x192xf32>
    %10 = vector.broadcast %9 : vector<1x192xf32> to vector<220x192xf32>
    %11 = arith.addf %8, %10 : vector<220x192xf32>
    %cst_5 = arith.constant 0.000000e+00 : f32
    %12 = vector.broadcast %cst_5 : f32 to vector<220x192xf32>
    %13 = arith.maximumf %11, %12 : vector<220x192xf32>
    %14 = vector.extract_strided_slice %13 {offsets = [0, 0], sizes = [219, 184], strides = [1, 1]} : vector<220x192xf32> to vector<219x184xf32>
    %15 = vector.extract_strided_slice %13 {offsets = [1, 0], sizes = [219, 184], strides = [1, 1]} : vector<220x192xf32> to vector<219x184xf32>
    %16 = arith.maximumf %14, %15 : vector<219x184xf32>
    %17 = vector.extract_strided_slice %13 {offsets = [0, 8], sizes = [219, 184], strides = [1, 1]} : vector<220x192xf32> to vector<219x184xf32>
    %18 = vector.extract_strided_slice %13 {offsets = [1, 8], sizes = [219, 184], strides = [1, 1]} : vector<220x192xf32> to vector<219x184xf32>
    %19 = arith.maximumf %17, %18 : vector<219x184xf32>
    %20 = arith.maximumf %16, %19 : vector<219x184xf32>
    %c0_6 = arith.constant 0 : index
    %c0_7 = arith.constant 0 : index
    %21 = vector.load %arg4[%c0_6, %c0_7] : memref<96x219xf32, #tpu.memory_space<vmem>>, vector<96x219xf32>
    %cst_8 = arith.constant dense<0.000000e+00> : vector<96x184xf32>
    %22 = tpu.matmul %21, %20, %cst_8 {dimension_numbers = #tpu.dot_dimension_numbers<[1], [0], [0], [1], [0, 0, 1, 1], [], []>} : vector<96x219xf32>, vector<219x184xf32>, vector<96x184xf32> -> vector<96x184xf32>
    %c0_9 = arith.constant 0 : index
    %c0_10 = arith.constant 0 : index
    %23 = vector.load %arg5[%c0_9, %c0_10] : memref<184x96xf32, #tpu.memory_space<vmem>>, vector<184x96xf32>
    %cst_11 = arith.constant dense<0.000000e+00> : vector<96x96xf32>
    %24 = tpu.matmul %22, %23, %cst_11 {dimension_numbers = #tpu.dot_dimension_numbers<[1], [0], [0], [1], [0, 0, 1, 1], [], []>} : vector<96x184xf32>, vector<184x96xf32>, vector<96x96xf32> -> vector<96x96xf32>
    %25 = vector.extract_strided_slice %24 {offsets = [0, 0], sizes = [92, 96], strides = [1, 1]} : vector<96x96xf32> to vector<92x96xf32>
    %26 = vector.extract_strided_slice %24 {offsets = [1, 0], sizes = [92, 96], strides = [1, 1]} : vector<96x96xf32> to vector<92x96xf32>
    %27 = vector.extract_strided_slice %24 {offsets = [2, 0], sizes = [92, 96], strides = [1, 1]} : vector<96x96xf32> to vector<92x96xf32>
    %28 = vector.extract_strided_slice %24 {offsets = [3, 0], sizes = [92, 96], strides = [1, 1]} : vector<96x96xf32> to vector<92x96xf32>
    %29 = vector.extract_strided_slice %24 {offsets = [4, 0], sizes = [92, 96], strides = [1, 1]} : vector<96x96xf32> to vector<92x96xf32>
    %30 = tpu.concatenate %25, %26, %27, %28, %29 in 1 : vector<92x96xf32>, vector<92x96xf32>, vector<92x96xf32>, vector<92x96xf32>, vector<92x96xf32> -> vector<92x480xf32>
    %c0_12 = arith.constant 0 : index
    %c0_13 = arith.constant 0 : index
    %31 = vector.load %arg6[%c0_12, %c0_13] : memref<480x128xf32, #tpu.memory_space<vmem>>, vector<480x128xf32>
    %cst_14 = arith.constant dense<0.000000e+00> : vector<92x128xf32>
    %32 = tpu.matmul %30, %31, %cst_14 {dimension_numbers = #tpu.dot_dimension_numbers<[1], [0], [0], [1], [0, 0, 1, 1], [], []>} : vector<92x480xf32>, vector<480x128xf32>, vector<92x128xf32> -> vector<92x128xf32>
    %c0_15 = arith.constant 0 : index
    %c0_16 = arith.constant 0 : index
    %33 = vector.load %arg7[%c0_15, %c0_16] : memref<1x128xf32, #tpu.memory_space<vmem>>, vector<1x128xf32>
    %34 = vector.broadcast %33 : vector<1x128xf32> to vector<92x128xf32>
    %35 = arith.addf %32, %34 : vector<92x128xf32>
    %cst_17 = arith.constant 0.000000e+00 : f32
    %36 = vector.broadcast %cst_17 : f32 to vector<92x128xf32>
    %37 = arith.maximumf %35, %36 : vector<92x128xf32>
    %38 = vector.extract_strided_slice %37 {offsets = [0, 0], sizes = [91, 112], strides = [1, 1]} : vector<92x128xf32> to vector<91x112xf32>
    %39 = vector.extract_strided_slice %37 {offsets = [1, 0], sizes = [91, 112], strides = [1, 1]} : vector<92x128xf32> to vector<91x112xf32>
    %40 = arith.maximumf %38, %39 : vector<91x112xf32>
    %41 = vector.extract_strided_slice %37 {offsets = [0, 16], sizes = [91, 112], strides = [1, 1]} : vector<92x128xf32> to vector<91x112xf32>
    %42 = vector.extract_strided_slice %37 {offsets = [1, 16], sizes = [91, 112], strides = [1, 1]} : vector<92x128xf32> to vector<91x112xf32>
    %43 = arith.maximumf %41, %42 : vector<91x112xf32>
    %44 = arith.maximumf %40, %43 : vector<91x112xf32>
    %c0_18 = arith.constant 0 : index
    %c0_19 = arith.constant 0 : index
    %45 = vector.load %arg8[%c0_18, %c0_19] : memref<32x91xf32, #tpu.memory_space<vmem>>, vector<32x91xf32>
    %cst_20 = arith.constant dense<0.000000e+00> : vector<32x112xf32>
    %46 = tpu.matmul %45, %44, %cst_20 {dimension_numbers = #tpu.dot_dimension_numbers<[1], [0], [0], [1], [0, 0, 1, 1], [], []>} : vector<32x91xf32>, vector<91x112xf32>, vector<32x112xf32> -> vector<32x112xf32>
    %c0_21 = arith.constant 0 : index
    %c0_22 = arith.constant 0 : index
    %47 = vector.load %arg9[%c0_21, %c0_22] : memref<112x64xf32, #tpu.memory_space<vmem>>, vector<112x64xf32>
    %cst_23 = arith.constant dense<0.000000e+00> : vector<32x64xf32>
    %48 = tpu.matmul %46, %47, %cst_23 {dimension_numbers = #tpu.dot_dimension_numbers<[1], [0], [0], [1], [0, 0, 1, 1], [], []>} : vector<32x112xf32>, vector<112x64xf32>, vector<32x64xf32> -> vector<32x64xf32>
    %49 = vector.extract_strided_slice %48 {offsets = [0, 0], sizes = [8, 64], strides = [1, 1]} : vector<32x64xf32> to vector<8x64xf32>
    %50 = vector.extract_strided_slice %48 {offsets = [8, 0], sizes = [8, 64], strides = [1, 1]} : vector<32x64xf32> to vector<8x64xf32>
    %51 = vector.extract_strided_slice %48 {offsets = [16, 0], sizes = [8, 64], strides = [1, 1]} : vector<32x64xf32> to vector<8x64xf32>
    %52 = vector.extract_strided_slice %48 {offsets = [24, 0], sizes = [8, 64], strides = [1, 1]} : vector<32x64xf32> to vector<8x64xf32>
    %53 = tpu.concatenate %49, %50, %51, %52 in 1 : vector<8x64xf32>, vector<8x64xf32>, vector<8x64xf32>, vector<8x64xf32> -> vector<8x256xf32>
    %c0_24 = arith.constant 0 : index
    %c0_25 = arith.constant 0 : index
    %54 = vector.load %arg10[%c0_24, %c0_25] : memref<256x128xf32, #tpu.memory_space<vmem>>, vector<256x128xf32>
    %cst_26 = arith.constant dense<0.000000e+00> : vector<8x128xf32>
    %55 = tpu.matmul %53, %54, %cst_26 {dimension_numbers = #tpu.dot_dimension_numbers<[1], [0], [0], [1], [0, 0, 1, 1], [], []>} : vector<8x256xf32>, vector<256x128xf32>, vector<8x128xf32> -> vector<8x128xf32>
    %c0_27 = arith.constant 0 : index
    %c0_28 = arith.constant 0 : index
    %56 = vector.load %arg11[%c0_27, %c0_28] : memref<1x128xf32, #tpu.memory_space<vmem>>, vector<1x128xf32>
    %57 = vector.broadcast %56 : vector<1x128xf32> to vector<8x128xf32>
    %58 = arith.addf %55, %57 : vector<8x128xf32>
    %cst_29 = arith.constant 0.000000e+00 : f32
    %59 = vector.broadcast %cst_29 : f32 to vector<8x128xf32>
    %60 = arith.maximumf %58, %59 : vector<8x128xf32>
    %c0_30 = arith.constant 0 : index
    %c0_31 = arith.constant 0 : index
    %61 = vector.load %arg12[%c0_30, %c0_31] : memref<128x128xf32, #tpu.memory_space<vmem>>, vector<128x128xf32>
    %cst_32 = arith.constant dense<0.000000e+00> : vector<8x128xf32>
    %62 = tpu.matmul %60, %61, %cst_32 {dimension_numbers = #tpu.dot_dimension_numbers<[1], [0], [0], [1], [0, 0, 1, 1], [], []>} : vector<8x128xf32>, vector<128x128xf32>, vector<8x128xf32> -> vector<8x128xf32>
    %c0_33 = arith.constant 0 : index
    %c0_34 = arith.constant 0 : index
    %63 = vector.load %arg13[%c0_33, %c0_34] : memref<1x128xf32, #tpu.memory_space<vmem>>, vector<1x128xf32>
    %64 = vector.broadcast %63 : vector<1x128xf32> to vector<8x128xf32>
    %65 = arith.addf %62, %64 : vector<8x128xf32>
    %cst_35 = arith.constant 0.000000e+00 : f32
    %66 = vector.broadcast %cst_35 : f32 to vector<8x128xf32>
    %67 = arith.maximumf %65, %66 : vector<8x128xf32>
    %c0_36 = arith.constant 0 : index
    %c0_37 = arith.constant 0 : index
    %68 = vector.load %arg14[%c0_36, %c0_37] : memref<128x128xf32, #tpu.memory_space<vmem>>, vector<128x128xf32>
    %cst_38 = arith.constant dense<0.000000e+00> : vector<8x128xf32>
    %69 = tpu.matmul %67, %68, %cst_38 {dimension_numbers = #tpu.dot_dimension_numbers<[1], [0], [0], [1], [0, 0, 1, 1], [], []>} : vector<8x128xf32>, vector<128x128xf32>, vector<8x128xf32> -> vector<8x128xf32>
    %c0_39 = arith.constant 0 : index
    %c0_40 = arith.constant 0 : index
    %70 = vector.load %arg15[%c0_39, %c0_40] : memref<1x128xf32, #tpu.memory_space<vmem>>, vector<1x128xf32>
    %71 = vector.broadcast %70 : vector<1x128xf32> to vector<8x128xf32>
    %72 = arith.addf %69, %71 : vector<8x128xf32>
    %c0_41 = arith.constant 0 : index
    %c0_42 = arith.constant 0 : index
    %73 = vector.load %arg16[%c0_41, %c0_42] : memref<8x128xf32, #tpu.memory_space<vmem>>, vector<8x128xf32>
    tpu.vector_store %arg16[%c0_41, %c0_42], %72 {strides = array<i32>} : memref<8x128xf32, #tpu.memory_space<vmem>>, vector<8x128xf32>,
    return
  }
  func.func @transform_0(%arg0: i32) -> (i32, i32) {
    %c0_i32 = arith.constant 0 : i32
    %c0_i32_0 = arith.constant 0 : i32
    return %arg0, %c0_i32 : i32, i32
  }
  func.func @transform_1(%arg0: i32) -> (i32, i32) {
    %c0_i32 = arith.constant 0 : i32
    %c0_i32_0 = arith.constant 0 : i32
    %c0_i32_1 = arith.constant 0 : i32
    return %c0_i32, %c0_i32_0 : i32, i32
  }
  func.func @transform_2(%arg0: i32) -> (i32, i32) {
    %c0_i32 = arith.constant 0 : i32
    %c0_i32_0 = arith.constant 0 : i32
    %c0_i32_1 = arith.constant 0 : i32
    return %c0_i32, %c0_i32_0 : i32, i32
  }
  func.func @transform_3(%arg0: i32) -> (i32, i32) {
    %c0_i32 = arith.constant 0 : i32
    %c0_i32_0 = arith.constant 0 : i32
    %c0_i32_1 = arith.constant 0 : i32
    return %c0_i32, %c0_i32_0 : i32, i32
  }
  func.func @transform_4(%arg0: i32) -> (i32, i32) {
    %c0_i32 = arith.constant 0 : i32
    %c0_i32_0 = arith.constant 0 : i32
    %c0_i32_1 = arith.constant 0 : i32
    return %c0_i32, %c0_i32_0 : i32, i32
  }
  func.func @transform_5(%arg0: i32) -> (i32, i32) {
    %c0_i32 = arith.constant 0 : i32
    %c0_i32_0 = arith.constant 0 : i32
    %c0_i32_1 = arith.constant 0 : i32
    return %c0_i32, %c0_i32_0 : i32, i32
  }
  func.func @transform_6(%arg0: i32) -> (i32, i32) {
    %c0_i32 = arith.constant 0 : i32
    %c0_i32_0 = arith.constant 0 : i32
    %c0_i32_1 = arith.constant 0 : i32
    return %c0_i32, %c0_i32_0 : i32, i32
  }
  func.func @transform_7(%arg0: i32) -> (i32, i32) {
    %c0_i32 = arith.constant 0 : i32
    %c0_i32_0 = arith.constant 0 : i32
    %c0_i32_1 = arith.constant 0 : i32
    return %c0_i32, %c0_i32_0 : i32, i32
  }
  func.func @transform_8(%arg0: i32) -> (i32, i32) {
    %c0_i32 = arith.constant 0 : i32
    %c0_i32_0 = arith.constant 0 : i32
    %c0_i32_1 = arith.constant 0 : i32
    return %c0_i32, %c0_i32_0 : i32, i32
  }
  func.func @transform_9(%arg0: i32) -> (i32, i32) {
    %c0_i32 = arith.constant 0 : i32
    %c0_i32_0 = arith.constant 0 : i32
    %c0_i32_1 = arith.constant 0 : i32
    return %c0_i32, %c0_i32_0 : i32, i32
  }
  func.func @transform_10(%arg0: i32) -> (i32, i32) {
    %c0_i32 = arith.constant 0 : i32
    %c0_i32_0 = arith.constant 0 : i32
    %c0_i32_1 = arith.constant 0 : i32
    return %c0_i32, %c0_i32_0 : i32, i32
  }
  func.func @transform_11(%arg0: i32) -> (i32, i32) {
    %c0_i32 = arith.constant 0 : i32
    %c0_i32_0 = arith.constant 0 : i32
    %c0_i32_1 = arith.constant 0 : i32
    return %c0_i32, %c0_i32_0 : i32, i32
  }
  func.func @transform_12(%arg0: i32) -> (i32, i32) {
    %c0_i32 = arith.constant 0 : i32
    %c0_i32_0 = arith.constant 0 : i32
    %c0_i32_1 = arith.constant 0 : i32
    return %c0_i32, %c0_i32_0 : i32, i32
  }
  func.func @transform_13(%arg0: i32) -> (i32, i32) {
    %c0_i32 = arith.constant 0 : i32
    %c0_i32_0 = arith.constant 0 : i32
    %c0_i32_1 = arith.constant 0 : i32
    return %c0_i32, %c0_i32_0 : i32, i32
  }
  func.func @transform_14(%arg0: i32) -> (i32, i32) {
    %c0_i32 = arith.constant 0 : i32
    %c0_i32_0 = arith.constant 0 : i32
    %c0_i32_1 = arith.constant 0 : i32
    return %c0_i32, %c0_i32_0 : i32, i32
  }
  func.func @transform_15(%arg0: i32) -> (i32, i32) {
    %c0_i32 = arith.constant 0 : i32
    %c0_i32_0 = arith.constant 0 : i32
    return %arg0, %c0_i32 : i32, i32
  }
}

</mosaic_0001>

<bundles_post_ra>
// kernel: lenet_forward.1
= control target key start
LH: loop header
LB: loop body
LE: loop exit
PB: predicated region body
PF: predicated region fallthrough
CT: control target
= control target key end

     0   :  { %20 = vsyncpa [#allocation3], 0  ;;  %s6449_s0 = inlined_call_operand.vmem [shape: f32[224,28], index: 0, kind: input, shape index: {}]   ;;  %s6450_s1 = inlined_call_operand.vmem [shape: f32[140,192], index: 1, kind: input, shape index: {}]   ;;  %s6451_s2 = inlined_call_operand.vmem [shape: f32[1,192], index: 2, kind: input, shape index: {}]   ;;  %s6452_s3 = inlined_call_operand.hbm [shape: f32[96,219], index: 3, kind: input, shape index: {}]   ;;  %s6453_s4 = inlined_call_operand.vmem [shape: f32[184,96], index: 4, kind: input, shape index: {}]   ;;  %s6454_s5 = inlined_call_operand.vmem [shape: f32[480,128], index: 5, kind: input, shape index: {}]   ;;  %s6455_s6 = inlined_call_operand.vmem [shape: f32[1,128], index: 6, kind: input, shape index: {}]   ;;  %s6456_s7 = inlined_call_operand.hbm [shape: f32[32,91], index: 7, kind: input, shape index: {}]   ;;  %s6457_s8 = inlined_call_operand.vmem [shape: f32[112,64], index: 8, kind: input, shape index: {}]   ;;  %s6458_s9 = inlined_call_operand.vmem [shape: f32[256,128], index: 9, kind: input, shape index: {}]   ;;  %s6459_s10 = inlined_call_operand.vmem [shape: f32[1,128], index: 10, kind: input, shape index: {}]   ;;  %s6460_s11 = inlined_call_operand.hbm [shape: f32[128,128], index: 11, kind: input, shape index: {}]   ;;  %s6461_s12 = inlined_call_operand.vmem [shape: f32[1,128], index: 12, kind: input, shape index: {}]   ;;  %s6462_s13 = inlined_call_operand.hbm [shape: f32[128,128], index: 13, kind: input, shape index: {}]   ;;  %s6463_s14 = inlined_call_operand.vmem [shape: f32[1,128], index: 14, kind: input, shape index: {}]   ;;  %s6464_s15 = inlined_call_operand.vmem [shape: f32[8,128], index: 15, kind: output, shape index: {}]  }
   0x1   :  { %21 = vsyncpa [#allocation5], 0 }
   0x2   :  { %22 = vsyncpa [#allocation8], 0  ;;  %s4236_s18 = smov [#allocation4]  }
   0x3   :  { %s52_s19 = sshll.u32 %s4236_s18, 4  ;;  %s53_s19 = int_to_ptr.vmem [resolvable:$true] %s52_s19 }
   0x4   :  { %s4158_s20 = scalar_lea.vmem %s53_s19, 512  ;;  %p4163_p1 = scmp.lt.s32.totalorder %s53_s19, %s53_s19 }
   0x5   :  { %p4159_p0 = scmp.ne.s32.totalorder %s53_s19, %s4158_s20  ;;  %p4164_p2 = scmp.lt.s32.totalorder %s4158_s20, %s4158_s20 }
   0x7   :  { %p4165_p3 = por %p4164_p2, %p4163_p1 }
   0x9   :  { %p4166_p4 = pnand %p4165_p3, %p4159_p0 }
   0xb   :  { %4169 = shalt.err (!%p4166_p4)
}
   0xc   :  { %s4237_s21 = smov 128   ;;  %s4238_s22 = smov 8  }
   0xd   :  { %58 = dma.hbm_to_vmem [thread:$0]  %s6456_s7, 512, %s53_s19, [#allocation5], %s4237_s21, %s4237_s21, %s4238_s22  }
   0xe   :  { %s4239_s25 = smov [#allocation2]  }
   0xf   :  { %s34_s26 = sshll.u32 %s4239_s25, 4  ;;  %s35_s26 = int_to_ptr.vmem [resolvable:$true] %s34_s26 }
  0x10   :  { %s4178_s27 = scalar_lea.vmem %s35_s26, 3072  ;;  %p4183_p6 = scmp.lt.s32.totalorder %s35_s26, %s35_s26 }
  0x11   :  { %p4179_p5 = scmp.ne.s32.totalorder %s35_s26, %s4178_s27  ;;  %p4184_p7 = scmp.lt.s32.totalorder %s4178_s27, %s4178_s27 }
  0x13   :  { %p4185_p8 = por %p4184_p7, %p4183_p6 }
  0x15   :  { %p4186_p9 = pnand %p4185_p8, %p4179_p5 }
  0x17   :  { %4189 = shalt.err (!%p4186_p9)
}
  0x18   :  { %s4240_s28 = smov 256   ;;  %s4241_s29 = smov 16  }
  0x19   :  { %40 = dma.hbm_to_vmem [thread:$0]  %s6452_s3, 3072, %s35_s26, [#allocation3], %s4240_s28, %s4240_s28, %s4241_s29  }
  0x1a   :  { %s4242_s17 = smov [#allocation6]   ;;  %s4243_s20 = smov [#allocation7]  }
  0x1b   :  { %s70_s18 = sshll.u32 %s4242_s17, 4  ;;  %s84_s7 = sshll.u32 %s4243_s20, 4  ;;  %s71_s18 = int_to_ptr.vmem [resolvable:$true] %s70_s18  ;;  %s85_s7 = int_to_ptr.vmem [resolvable:$true] %s84_s7 }
  0x1c   :  { %s4198_s19 = scalar_lea.vmem %s71_s18, 2048  ;;  %p4203_p11 = scmp.lt.s32.totalorder %s71_s18, %s71_s18 }
  0x1d   :  { %p4199_p10 = scmp.ne.s32.totalorder %s71_s18, %s4198_s19  ;;  %p4204_p12 = scmp.lt.s32.totalorder %s4198_s19, %s4198_s19 }
  0x1f   :  { %p4205_p13 = por %p4204_p12, %p4203_p11 }
  0x21   :  { %p4206_p0 = pnand %p4205_p13, %p4199_p10 }
  0x23   :  { %4209 = shalt.err (!%p4206_p0)
}
  0x24   :  { %76 = dma.hbm_to_vmem [thread:$0]  %s6460_s11, 2048, %s71_s18, [#allocation5], %s4237_s21, %s4237_s21, %s4238_s22  }
  0x25   :  { %s4218_s3 = scalar_lea.vmem %s85_s7, 2048  ;;  %p4223_p2 = scmp.lt.s32.totalorder %s85_s7, %s85_s7 }
  0x26   :  { %p4219_p1 = scmp.ne.s32.totalorder %s85_s7, %s4218_s3  ;;  %p4224_p3 = scmp.lt.s32.totalorder %s4218_s3, %s4218_s3 }
  0x28   :  { %p4225_p4 = por %p4224_p3, %p4223_p2 }
  0x2a   :  { %p4226_p5 = pnand %p4225_p4, %p4219_p1 }
  0x2c   :  { %4229 = shalt.err (!%p4226_p5)
}
  0x2d   :  { %90 = dma.hbm_to_vmem [thread:$0]  %s6462_s13, 2048, %s85_s7, [#allocation8], %s4237_s21, %s4237_s21, %s4238_s22  }
  0x2e   :  { %4230 = dma.done.wait [#allocation3], 3072  }
  0x2f   :  { %4231 = vsyncadd [#allocation3], 4294964224 }
  0x30   :  { %4232 = dma.done.wait [#allocation5], 2560  }
  0x31   :  { %4233 = vsyncadd [#allocation5], 4294964736 }
  0x32   :  { %4234 = dma.done.wait [#allocation8], 2048  }
  0x33   :  { %4235 = vsyncadd [#allocation8], 4294965248  ;;  %vm441_vm0 = vcmask 1044480   ;;  %v4358_v0 = vld [vmem:[%s6449_s0] sm:$0xff]  ;;  %v4363_v1 = vld [vmem:[%s6449_s0 + $0x8] sm:$0xff]  ;;  %vm161_vm1 = vcmask 1046528  }
  0x34   :  { %v4368_v2 = vld [vmem:[%s6449_s0 + $0x10] sm:$0xff]  ;;  %vm581_vm2 = vcmask 1043456   ;;  %vm301_vm3 = vcmask 1045504   ;;  %v442_v3 = vrot.slane %v4358_v0, 3  ;;  %v443_v4 = vrot.slane %v4363_v1, 3  ;;  %v4381_v11 = vld [vmem:[%s6449_s0 + $0x18] sm:$0xff] }
  0x35   :  { %v445_v5 = vrot.slane %v4368_v2, 3  ;;  %v162_v6 = vrot.slane %v4358_v0, 1  ;;  %v163_v7 = vrot.slane %v4363_v1, 1  ;;  %v165_v8 = vrot.slane %v4368_v2, 1  ;;  %v4390_v16 = vld [vmem:[%s6449_s0 + $0x20] sm:$0xff]  ;;  %s4244_s18 = smov 84  }
  0x36   :  { %v582_v9 = vrot.slane %v4358_v0, 4  ;;  %v583_v10 = vrot.slane %v4363_v1, 4  ;;  %v444_v12 = vsel %vm441_vm0, %v442_v3, %v443_v4  ;;  %v302_v14 = vrot.slane %v4358_v0, 2  ;;  %s4245_s20 = smov 28   ;;  %v868_v31 = vld [vmem:[%s6450_s1 + $0xf8] sm:$0xff]  ;;  %v867_v36 = vld [vmem:[%s6450_s1 + $0xf0] sm:$0xff] }
  0x37   :  { %v446_v13 = vsel %vm441_vm0, %v443_v4, %v445_v5  ;;  %v303_v15 = vrot.slane %v4363_v1, 2  ;;  %v164_v18 = vsel %vm161_vm1, %v162_v6, %v163_v7  ;;  %v166_v19 = vsel %vm161_vm1, %v163_v7, %v165_v8  ;;  %948 = vmatprep.subr.mxu0 %v868_v31  ;;  %v866_v37 = vld [vmem:[%s6450_s1 + $0xe8] sm:$0xff]  ;;  %v865_v38 = vld [vmem:[%s6450_s1 + $0xe0] sm:$0xff]  ;;  %v864_v39 = vld [vmem:[%s6450_s1 + $0xd8] sm:$0xff]  ;;  %s4246_s29 = smov 112   ;;  %s4247_s13 = smov 56  }
  0x38   :  { %v3880_v17 = vpack.i.bf16 %v446_v13, %v444_v12  ;;  %v3870_v20 = vpack.i.bf16 %v166_v19, %v164_v18  ;;  %v305_v22 = vrot.slane %v4368_v2, 2  ;;  %v167_v23 = vrot.slane %v4381_v11, 1  ;;  %949 = vmatpush1.msra.mxu0 %v867_v36  ;;  %v863_v41 = vld [vmem:[%s6450_s1 + $0xd0] sm:$0xff]  ;;  %v4441_v47 = vld [vmem:[%s6449_s0 + $0x28] sm:$0xff]  ;;  %v861_v50 = vld [vmem:[%s6450_s1 + $0xc0] sm:$0xff]  ;;  %s4251_s26 = smov 96  }
  0x39   :  { %v304_v21 = vsel %vm301_vm3, %v302_v14, %v303_v15  ;;  %v584_v24 = vsel %vm581_vm2, %v582_v9, %v583_v10  ;;  %v169_v25 = vrot.slane %v4390_v16, 1  ;;  %v585_v26 = vrot.slane %v4368_v2, 4  ;;  %950 = vmatprep.subr.mxu0 %v866_v37  ;;  %v4446_v48 = vld [vmem:[%s6449_s0 + $0x30] sm:$0xff]  ;;  %v862_v49 = vld [vmem:[%s6450_s1 + $0xc8] sm:$0xff]  ;;  %v860_v54 = vld [vmem:[%s6450_s1 + $0xb8] sm:$0xff]  ;;  %s4252_s11 = smov 32  }
  0x3a   :  { %3881 = vrot.lane.b32.xlu1 %v3880_v17, %s4244_s18  ;;  %3871 = vrot.lane.b32.xlu0 %v3870_v20, %s4245_s20  ;;  %v306_v27 = vsel %vm301_vm3, %v303_v15, %v305_v22  ;;  %v168_v28 = vsel %vm161_vm1, %v165_v8, %v167_v23  ;;  %v447_v29 = vrot.slane %v4381_v11, 3  ;;  %v449_v30 = vrot.slane %v4390_v16, 3  ;;  %v859_v60 = vld [vmem:[%s6450_s1 + $0xb0] sm:$0xff]  ;;  %v858_v61 = vld [vmem:[%s6450_s1 + $0xa8] sm:$0xff] }
  0x3b   :  { %v3875_v32 = vpack.i.bf16 %v306_v27, %v304_v21  ;;  %v170_v33 = vsel %vm161_vm1, %v167_v23, %v169_v25  ;;  %v307_v34 = vrot.slane %v4381_v11, 2  ;;  %v309_v35 = vrot.slane %v4390_v16, 2  ;;  %951 = vmatpush1.msra.mxu0 %v865_v38  ;;  %v857_v63 = vld [vmem:[%s6450_s1 + $0xa0] sm:$0xff]  ;;  %v856_v6 = vld [vmem:[%s6450_s1 + $0x98] sm:$0xff]  ;;  %v855_v14 = vld [vmem:[%s6450_s1 + $0x90] sm:$0xff] }
  0x3c   :  { %v3885_v40 = vpack.i.bf16 %v170_v33, %v168_v28  ;;  %v448_v42 = vsel %vm441_vm0, %v445_v5, %v447_v29  ;;  %v450_v43 = vsel %vm441_vm0, %v447_v29, %v449_v30  ;;  %v586_v44 = vsel %vm581_vm2, %v583_v10, %v585_v26  ;;  %952 = vmatprep.subr.mxu0 %v864_v39  ;;  %v4494_v12 = vld [vmem:[%s6449_s0 + $0x38] sm:$0xff]  ;;  %v4499_v13 = vld [vmem:[%s6449_s0 + $0x40] sm:$0xff]  ;;  %v854_v18 = vld [vmem:[%s6450_s1 + $0x88] sm:$0xff] }
  0x3d   :  { %v308_v45 = vsel %vm301_vm3, %v305_v22, %v307_v34  ;;  %v310_v46 = vsel %vm301_vm3, %v307_v34, %v309_v35  ;;  %953 = vmatpush1.msra.mxu0 %v863_v41  ;;  %v3895_v51 = vpack.i.bf16 %v450_v43, %v448_v42  ;;  %v587_v52 = vrot.slane %v4381_v11, 4  ;;  %v853_v22 = vld [vmem:[%s6450_s1 + $0x80] sm:$0xff]  ;;  %v851_v28 = vld [vmem:[%s6450_s1 + $0x70] sm:$0xff]  ;;  %v850_v33 = vld [vmem:[%s6450_s1 + $0x68] sm:$0xff] }
  0x3e   :  { %637 = vrot.lane.b32.xlu1 %v584_v24, %s4246_s29  ;;  %3876 = vrot.lane.b32.xlu0 %v3875_v32, %s4247_s13  ;;  %v589_v53 = vrot.slane %v4390_v16, 4  ;;  %v3890_v55 = vpack.i.bf16 %v310_v46, %v308_v45  ;;  %v311_v56 = vrot.slane %v4441_v47, 2  ;;  %v313_v57 = vrot.slane %v4446_v48, 2  ;;  %v849_v37 = vld [vmem:[%s6450_s1 + $0x60] sm:$0xff]  ;;  %v848_v38 = vld [vmem:[%s6450_s1 + $0x58] sm:$0xff] }
  0x3f   :  { %954 = vmatprep.subr.mxu0 %v862_v49  ;;  %v171_v58 = vrot.slane %v4441_v47, 1  ;;  %v173_v59 = vrot.slane %v4446_v48, 1  ;;  %v588_v3 = vsel %vm581_vm2, %v585_v26, %v587_v52  ;;  %v451_v9 = vrot.slane %v4441_v47, 3  ;;  %v846_v43 = vld [vmem:[%s6450_s1 + $0x48] sm:$0xff] }
  0x40   :  { %955 = vmatpush1.msra.mxu0 %v861_v50  ;;  %v590_v62 = vsel %vm581_vm2, %v587_v52, %v589_v53  ;;  %v312_v4 = vsel %vm301_vm3, %v309_v35, %v311_v56  ;;  %v314_v5 = vsel %vm301_vm3, %v311_v56, %v313_v57  ;;  %v453_v10 = vrot.slane %v4446_v48, 3  ;;  %v4566_v49 = vld [vmem:[%s6449_s0 + $0x48] sm:$0xff]  ;;  %v4571_v50 = vld [vmem:[%s6449_s0 + $0x50] sm:$0xff]  ;;  %v844_v52 = vld [vmem:[%s6450_s1 + $0x38] sm:$0xff] }
  0x41   :  { %956 = vmatprep.subr.mxu0 %v860_v54  ;;  %v172_v7 = vsel %vm161_vm1, %v169_v25, %v171_v58  ;;  %v174_v8 = vsel %vm161_vm1, %v171_v58, %v173_v59  ;;  %v3905_v15 = vpack.i.bf16 %v314_v5, %v312_v4  ;;  %v591_v17 = vrot.slane %v4441_v47, 4  ;;  %v852_v25 = vld [vmem:[%s6450_s1 + $0x78] sm:$0xff]  ;;  %v839_v5 = vld [vmem:[%s6450_s1 + $0x10] sm:$0xff] }
  0x42   :  { %3886 = vrot.lane.b32.xlu1 %v3885_v40, %s4245_s20  ;;  %639 = vrot.lane.b32.xlu0 %v586_v44, %s4246_s29  ;;  %v3900_v19 = vpack.i.bf16 %v174_v8, %v172_v7  ;;  %v175_v20 = vrot.slane %v4494_v12, 1  ;;  %v177_v21 = vrot.slane %v4499_v13, 1  ;;  %v452_v23 = vsel %vm441_vm0, %v449_v30, %v451_v9  ;;  %v847_v40 = vld [vmem:[%s6450_s1 + $0x50] sm:$0xff] }
  0x43   :  { %957 = vmatpush1.msra.mxu0 %v859_v60  ;;  %v454_v24 = vsel %vm441_vm0, %v451_v9, %v453_v10  ;;  %v592_v26 = vsel %vm581_vm2, %v589_v53, %v591_v17  ;;  %v455_v27 = vrot.slane %v4494_v12, 3  ;;  %v457_v32 = vrot.slane %v4499_v13, 3  ;;  %v842_v60 = vld [vmem:[%s6450_s1 + $0x28] sm:$0xff]  ;;  %v4613_v9 = vld [vmem:[%s6449_s0 + $0x58] sm:$0xff] }
  0x44   :  { %958 = vmatprep.subr.mxu0 %v858_v61  ;;  %v3910_v29 = vpack.i.bf16 %v454_v24, %v452_v23  ;;  %v176_v30 = vsel %vm161_vm1, %v173_v59, %v175_v20  ;;  %v178_v31 = vsel %vm161_vm1, %v175_v20, %v177_v21  ;;  %v593_v34 = vrot.slane %v4446_v48, 4  ;;  %v837_v20 = vld [vmem:[%s6450_s1] sm:$0xff]  ;;  %v872_v24 = vld [vmem:[%s6450_s1 + $0x118] sm:$0xf] }
  0x45   :  { %959 = vmatpush1.msra.mxu0 %v857_v63  ;;  %v315_v35 = vrot.slane %v4494_v12, 2  ;;  %v317_v36 = vrot.slane %v4499_v13, 2  ;;  %v3915_v39 = vpack.i.bf16 %v178_v31, %v176_v30  ;;  %v456_v41 = vsel %vm441_vm0, %v453_v10, %v455_v27  ;;  %v841_v63 = vld [vmem:[%s6450_s1 + $0x20] sm:$0xff] }
  0x46   :  { %3896 = vrot.lane.b32.xlu1 %v3895_v51, %s4244_s18  ;;  %3891 = vrot.lane.b32.xlu0 %v3890_v55, %s4247_s13  ;;  %v458_v42 = vsel %vm441_vm0, %v455_v27, %v457_v32  ;;  %v594_v44 = vsel %vm581_vm2, %v591_v17, %v593_v34  ;;  %v845_v51 = vld [vmem:[%s6450_s1 + $0x40] sm:$0xff]  ;;  %v595_v54 = vrot.slane %v4494_v12, 4  ;;  %v843_v55 = vld [vmem:[%s6450_s1 + $0x30] sm:$0xff]  ;;  %v319_v58 = vrot.slane %v4566_v49, 2 }
  0x47   :  { %960 = vmatprep.subr.mxu0 %v856_v6  ;;  %v316_v45 = vsel %vm301_vm3, %v313_v57, %v315_v35  ;;  %v318_v46 = vsel %vm301_vm3, %v315_v35, %v317_v36  ;;  %v3925_v53 = vpack.i.bf16 %v458_v42, %v456_v41  ;;  %v597_v57 = vrot.slane %v4499_v13, 4 }
  0x48   :  { %961 = vmatpush1.msra.mxu0 %v855_v14  ;;  %v3920_v56 = vpack.i.bf16 %v318_v46, %v316_v45  ;;  %v321_v59 = vrot.slane %v4571_v50, 2  ;;  %v179_v61 = vrot.slane %v4566_v49, 1  ;;  %v596_v4 = vsel %vm581_vm2, %v593_v34, %v595_v54 }
  0x49   :  { %962 = vmatprep.subr.mxu0 %v854_v18  ;;  %v598_v6 = vsel %vm581_vm2, %v595_v54, %v597_v57  ;;  %v320_v7 = vsel %vm301_vm3, %v317_v36, %v319_v58  ;;  %v461_v17 = vrot.slane %v4571_v50, 3  ;;  %v4624_v18 = vld [vmem:[%s6449_s0 + $0x60] sm:$0xff]  ;;  %v183_v23 = vrot.slane %v4613_v9, 1 }
  0x4a   :  { %643 = vrot.lane.b32.xlu1 %v590_v62, %s4246_s29  ;;  %641 = vrot.lane.b32.xlu0 %v588_v3, %s4246_s29  ;;  %v181_v62 = vrot.slane %v4571_v50, 1  ;;  %v840_v3 = vld [vmem:[%s6450_s1 + $0x18] sm:$0xff]  ;;  %v322_v8 = vsel %vm301_vm3, %v319_v58, %v321_v59  ;;  %v180_v10 = vsel %vm161_vm1, %v177_v21, %v179_v61  ;;  %v465_v34 = vrot.slane %v4624_v18, 3 }
  0x4b   :  { %963 = vmatpush1.msra.mxu0 %v853_v22  ;;  %v3935_v21 = vpack.i.bf16 %v322_v8, %v320_v7  ;;  %v599_v22 = vrot.slane %v4566_v49, 4  ;;  %v4705_v8 = vld [vmem:[%s6449_s0 + $0x78] sm:$0xff]  ;;  %vm885_vm4 = vcmask 97280   ;;  %vm721_vm5 = vcmask 228352  }
  0x4c   :  { %964 = vmatprep.subr.mxu0 %v852_v25  ;;  %v182_v14 = vsel %vm161_vm1, %v179_v61, %v181_v62  ;;  %v184_v31 = vsel %vm161_vm1, %v181_v62, %v183_v23  ;;  %vm750_vm6 = vcmask 457728   ;;  %vm779_vm7 = vcmask 687104  }
  0x4d   :  { %965 = vmatpush1.msra.mxu0 %v851_v28  ;;  %v3930_v25 = vpack.i.bf16 %v182_v14, %v180_v10  ;;  %v600_v30 = vsel %vm581_vm2, %v597_v57, %v599_v22  ;;  %v4710_v10 = vld [vmem:[%s6449_s0 + $0x80] sm:$0xff]  ;;  %vm808_vm8 = vcmask 916480   ;;  %vm1683_vm9 = vcmask 982016  }
  0x4e   :  { %3906 = vrot.lane.b32.xlu1 %v3905_v15, %s4247_s13  ;;  %3901 = vrot.lane.b32.xlu0 %v3900_v19, %s4245_s20  ;;  %v459_v15 = vrot.slane %v4566_v49, 3  ;;  %v838_v19 = vld [vmem:[%s6450_s1 + $0x8] sm:$0xff]  ;;  %vm1848_vm10 = vcmask 744448   ;;  %vm1885_vm11 = vcmask 1042432   ;;  %vm2425_vm12 = vcmask 785408  }
  0x4f   :  { %966 = vmatprep.subr.mxu0 %v850_v33  ;;  %v463_v33 = vrot.slane %v4613_v9, 3  ;;  %vm2438_vm13 = vcmask 523264   ;;  %vm2451_vm14 = vcmask 261120   ;;  %vm4253_vm15 = vmmov 0  }
  0x50   :  { %967 = vmatpush1.msra.mxu0 %v849_v37  ;;  %v460_v27 = vsel %vm441_vm0, %v457_v32, %v459_v15  ;;  %v462_v28 = vsel %vm441_vm0, %v459_v15, %v461_v17  ;;  %v870_v32 = vld [vmem:[%s6450_s1 + $0x108] sm:$0xff]  ;;  %v323_v37 = vrot.slane %v4613_v9, 2 }
  0x51   :  { %968 = vmatprep.subr.mxu0 %v848_v38  ;;  %v3940_v35 = vpack.i.bf16 %v462_v28, %v460_v27  ;;  %v325_v38 = vrot.slane %v4624_v18, 2  ;;  %v464_v42 = vsel %vm441_vm0, %v461_v17, %v463_v33  ;;  %v473_v28 = vrot.slane %v4710_v10, 3 }
  0x52   :  { %645 = vrot.lane.b32.xlu1 %v592_v26, %s4246_s29  ;;  %3911 = vrot.lane.b32.xlu0 %v3910_v29, %s4244_s18  ;;  %v185_v26 = vrot.slane %v4624_v18, 1  ;;  %v871_v29 = vld [vmem:[%s6450_s1 + $0x110] sm:$0xf] }
  0x53   :  { %969 = vmatpush1.msra.mxu0 %v847_v40  ;;  %v601_v40 = vrot.slane %v4571_v50, 4  ;;  %v326_v45 = vsel %vm301_vm3, %v323_v37, %v325_v38 }
  0x54   :  { %970 = vmatprep.subr.mxu0 %v846_v43  ;;  %v186_v36 = vsel %vm161_vm1, %v183_v23, %v185_v26  ;;  %v466_v43 = vsel %vm441_vm0, %v463_v33, %v465_v34 }
  0x55   :  { %971 = vmatpush1.msra.mxu0 %v845_v51  ;;  %v3945_v41 = vpack.i.bf16 %v186_v36, %v184_v31  ;;  %v602_v46 = vsel %vm581_vm2, %v599_v22, %v601_v40  ;;  %v4677_v51 = vld [vmem:[%s6449_s0 + $0x68] sm:$0xff]  ;;  %v333_v31 = vrot.slane %v4710_v10, 2 }
  0x56   :  { %3916 = vrot.lane.b32.xlu1 %v3915_v39, %s4245_s20  ;;  %647 = vrot.lane.b32.xlu0 %v594_v44, %s4246_s29  ;;  %v869_v39 = vld [vmem:[%s6450_s1 + $0x100] sm:$0xff]  ;;  %v324_v44 = vsel %vm301_vm3, %v321_v59, %v323_v37  ;;  %v327_v57 = vrot.slane %v4677_v51, 2  ;;  %v187_v59 = vrot.slane %v4677_v51, 1  ;;  %v607_v15 = vrot.slane %v4677_v51, 4 }
  0x57   :  { %972 = vmatprep.subr.mxu0 %v844_v52  ;;  %v4682_v52 = vld [vmem:[%s6449_s0 + $0x70] sm:$0xff]  ;;  %v3950_v54 = vpack.i.bf16 %v326_v45, %v324_v44 }
  0x58   :  { %973 = vmatpush1.msra.mxu0 %v843_v55  ;;  %v603_v55 = vrot.slane %v4613_v9, 4  ;;  %v329_v58 = vrot.slane %v4682_v52, 2  ;;  %v469_v7 = vrot.slane %v4682_v52, 3 }
  0x59   :  { %974 = vmatprep.subr.mxu0 %v842_v60  ;;  %v189_v60 = vrot.slane %v4682_v52, 1 }
  0x5a   :  { %3926 = vrot.lane.b32.xlu1 %v3925_v53, %s4244_s18  ;;  %3921 = vrot.lane.b32.xlu0 %v3920_v56, %s4247_s13  ;;  %v3955_v53 = vpack.i.bf16 %v466_v43, %v464_v42  ;;  %v605_v56 = vrot.slane %v4624_v18, 4  ;;  %v604_v62 = vsel %vm581_vm2, %v601_v40, %v603_v55  ;;  %v613_v43 = vrot.slane %v4710_v10, 4 }
  0x5b   :  { %975 = vmatpush1.msra.mxu0 %v841_v63  ;;  %v328_v63 = vsel %vm301_vm3, %v325_v38, %v327_v57  ;;  %v4739_v38 = vld [vmem:[%s6449_s0 + $0x88] sm:$0xff] }
  0x5c   :  { %976 = vmatprep.subr.mxu0 %v840_v3  ;;  %v606_v61 = vsel %vm581_vm2, %v603_v55, %v605_v56  ;;  %v330_v3 = vsel %vm301_vm3, %v327_v57, %v329_v58  ;;  %v608_v23 = vsel %vm581_vm2, %v605_v56, %v607_v15  ;;  %v335_v44 = vrot.slane %v4739_v38, 2 }
  0x5d   :  { %977 = vmatpush1.msra.mxu0 %v839_v5  ;;  %v190_v5 = vsel %vm161_vm1, %v187_v59, %v189_v60  ;;  %v3965_v14 = vpack.i.bf16 %v330_v3, %v328_v63  ;;  %v4772_v63 = vld [vmem:[%s6449_s0 + $0xa0] sm:$0xff] }
  0x5e   :  { %651 = vrot.lane.b32.xlu1 %v598_v6, %s4246_s29  ;;  %649 = vrot.lane.b32.xlu0 %v596_v4, %s4246_s29  ;;  %v188_v4 = vsel %vm161_vm1, %v185_v26, %v187_v59  ;;  %v467_v6 = vrot.slane %v4677_v51, 3  ;;  %v336_v56 = vsel %vm301_vm3, %v333_v31, %v335_v44 }
  0x5f   :  { %978 = vmatprep.subr.mxu0 %v838_v19  ;;  %v3960_v17 = vpack.i.bf16 %v190_v5, %v188_v4  ;;  %v191_v19 = vrot.slane %v4705_v8, 1  ;;  %v615_v4 = vrot.slane %v4739_v38, 4 }
  0x60   :  { %979 = vmatpush1.msra.mxu0 %v837_v20  ;;  %v193_v20 = vrot.slane %v4710_v10, 1  ;;  %v470_v22 = vsel %vm441_vm0, %v467_v6, %v469_v7 }
  0x61   :  { %3466 = vmatprep.subr.msk.mxu0 %vm581_vm2, %v872_v24  ;;  %v471_v24 = vrot.slane %v4705_v8, 3  ;;  %v192_v26 = vsel %vm161_vm1, %v189_v60, %v191_v19 }
  0x62   :  { %3936 = vrot.lane.b32.xlu1 %v3935_v21, %s4247_s13  ;;  %3931 = vrot.lane.b32.xlu0 %v3930_v25, %s4245_s20  ;;  %v468_v21 = vsel %vm441_vm0, %v465_v34, %v467_v6  ;;  %v194_v27 = vsel %vm161_vm1, %v191_v19, %v193_v20 }
  0x63   :  { %3467 = vmatpush2.msk.msra.mxu0 %vm581_vm2, %v871_v29  ;;  %v3970_v25 = vpack.i.bf16 %v470_v22, %v468_v21  ;;  %v609_v29 = vrot.slane %v4682_v52, 4  ;;  %v3975_v33 = vpack.i.bf16 %v194_v27, %v192_v26  ;;  %v472_v34 = vsel %vm441_vm0, %v469_v7, %v471_v24 }
  0x64   :  { %1010 = vmatprep.subr.mxu0 %v870_v32  ;;  %v474_v32 = vsel %vm441_vm0, %v471_v24, %v473_v28  ;;  %v201_v7 = vrot.slane %v4772_v63, 1  ;;  %v481_v21 = vrot.slane %v4772_v63, 3 }
  0x65   :  { %1011 = vmatpush2.msra.mxu0 %v869_v39  ;;  %v4744_v39 = vld [vmem:[%s6449_s0 + $0x90] sm:$0xff]  ;;  %v3985_v40 = vpack.i.bf16 %v474_v32, %v472_v34  ;;  %v4801_v34 = vld [vmem:[%s6449_s0 + $0xa8] sm:$0xff] }
  0x66   :  { %653 = vrot.lane.b32.xlu1 %v600_v30, %s4246_s29  ;;  %3941 = vrot.lane.b32.xlu0 %v3940_v35, %s4244_s18  ;;  %v331_v30 = vrot.slane %v4705_v8, 2  ;;  %v610_v35 = vsel %vm581_vm2, %v607_v15, %v609_v29  ;;  %v337_v45 = vrot.slane %v4744_v39, 2  ;;  %v617_v26 = vrot.slane %v4744_v39, 4  ;;  %v4806_v32 = vld [vmem:[%s6449_s0 + $0xb0] sm:$0xff] }
  0x68   :  { %v332_v36 = vsel %vm301_vm3, %v329_v58, %v331_v30  ;;  %v334_v37 = vsel %vm301_vm3, %v331_v30, %v333_v31  ;;  %v338_v57 = vsel %vm301_vm3, %v335_v44, %v337_v45  ;;  %v4763_v58 = vld [vmem:[%s6449_s0 + $0x98] sm:$0xff]  ;;  %v205_v44 = vrot.slane %v4806_v32, 1 }
  0x69   :  { %v3980_v42 = vpack.i.bf16 %v334_v37, %v332_v36  ;;  %v3995_v3 = vpack.i.bf16 %v338_v57, %v336_v56  ;;  %v199_v5 = vrot.slane %v4763_v58, 1  ;;  %v339_v24 = vrot.slane %v4763_v58, 2 }
  0x6a   :  { %3946 = vrot.lane.b32.xlu1 %v3945_v41, %s4245_s20  ;;  %655 = vrot.lane.b32.xlu0 %v602_v46, %s4246_s29  ;;  %v611_v41 = vrot.slane %v4705_v8, 4  ;;  %v195_v46 = vrot.slane %v4739_v38, 1  ;;  %v619_v37 = vrot.slane %v4763_v58, 4  ;;  %v483_v57 = vrot.slane %v4801_v34, 3 }
  0x6b   :  { %v340_v30 = vsel %vm301_vm3, %v337_v45, %v339_v24 }
  0x6c   :  { %v612_v55 = vsel %vm581_vm2, %v609_v29, %v611_v41  ;;  %v196_v59 = vsel %vm161_vm1, %v193_v20, %v195_v46  ;;  %v479_v20 = vrot.slane %v4763_v58, 3 }
  0x6e   :  { %3956 = vrot.lane.b32.xlu1 %v3955_v53, %s4244_s18  ;;  %3951 = vrot.lane.b32.xlu0 %v3950_v54, %s4247_s13  ;;  %v197_v53 = vrot.slane %v4744_v39, 1  ;;  %v614_v54 = vsel %vm581_vm2, %v611_v41, %v613_v43  ;;  %v482_v29 = vsel %vm441_vm0, %v479_v20, %v481_v21  ;;  %v343_v41 = vrot.slane %v4801_v34, 2 }
  0x70   :  { %v198_v60 = vsel %vm161_vm1, %v195_v46, %v197_v53  ;;  %v200_v19 = vsel %vm161_vm1, %v197_v53, %v199_v5  ;;  %v620_v46 = vsel %vm581_vm2, %v617_v26, %v619_v37 }
  0x71   :  { %v3990_v6 = vpack.i.bf16 %v198_v60, %v196_v59  ;;  %v485_v59 = vrot.slane %v4806_v32, 3  ;;  %v4829_v60 = vld [vmem:[%s6449_s0 + $0xb8] sm:$0xff] }
  0x72   :  { %659 = vrot.lane.b32.xlu1 %v606_v61, %s4246_s29  ;;  %657 = vrot.lane.b32.xlu0 %v604_v62, %s4246_s29  ;;  %v475_v61 = vrot.slane %v4739_v38, 3  ;;  %v477_v62 = vrot.slane %v4744_v39, 3 }
  0x74   :  { %v478_v15 = vsel %vm441_vm0, %v475_v61, %v477_v62 }
  0x76   :  { %3966 = vrot.lane.b32.xlu1 %v3965_v14, %s4247_s13  ;;  %3961 = vrot.lane.b32.xlu0 %v3960_v17, %s4245_s20  ;;  %v476_v14 = vsel %vm441_vm0, %v473_v28, %v475_v61  ;;  %v616_v17 = vsel %vm581_vm2, %v613_v43, %v615_v4  ;;  %v480_v28 = vsel %vm441_vm0, %v477_v62, %v479_v20  ;;  %v203_v43 = vrot.slane %v4801_v34, 1  ;;  %v4834_v61 = vld [vmem:[%s6449_s0 + $0xc0] sm:$0xff] }
  0x77   :  { %v4000_v22 = vpack.i.bf16 %v478_v15, %v476_v14  ;;  %v486_v14 = vsel %vm441_vm0, %v483_v57, %v485_v59 }
  0x78   :  { %v206_v56 = vsel %vm161_vm1, %v203_v43, %v205_v44 }
  0x7a   :  { %661 = vrot.lane.b32.xlu1 %v608_v23, %s4246_s29  ;;  %3971 = vrot.lane.b32.xlu0 %v3970_v25, %s4244_s18  ;;  %v202_v23 = vsel %vm161_vm1, %v199_v5, %v201_v7  ;;  %v341_v25 = vrot.slane %v4772_v63, 2  ;;  %v207_v5 = vrot.slane %v4829_v60, 1 }
  0x7b   :  { %v4005_v27 = vpack.i.bf16 %v202_v23, %v200_v19  ;;  %v489_v23 = vrot.slane %v4834_v61, 3 }
  0x7c   :  { %v342_v31 = vsel %vm301_vm3, %v339_v24, %v341_v25  ;;  %v344_v53 = vsel %vm301_vm3, %v341_v25, %v343_v41  ;;  %v208_v20 = vsel %vm161_vm1, %v205_v44, %v207_v5  ;;  %v625_v24 = vrot.slane %v4806_v32, 4 }
  0x7d   :  { %v4010_v36 = vpack.i.bf16 %v342_v31, %v340_v30  ;;  %v349_v25 = vrot.slane %v4834_v61, 2 }
  0x7e   :  { %3976 = vrot.lane.b32.xlu1 %v3975_v33, %s4245_s20  ;;  %663 = vrot.lane.b32.xlu0 %v610_v35, %s4246_s29  ;;  %v618_v33 = vsel %vm581_vm2, %v615_v4, %v617_v26  ;;  %v4015_v35 = vpack.i.bf16 %v482_v29, %v480_v28  ;;  %v4860_v29 = vld [vmem:[%s6449_s0 + $0xc8] sm:$0xff] }
  0x7f   :  { %v211_v44 = vrot.slane %v4860_v29, 1 }
  0x82   :  { %3986 = vrot.lane.b32.xlu1 %v3985_v40, %s4244_s18  ;;  %3981 = vrot.lane.b32.xlu0 %v3980_v42, %s4247_s13  ;;  %v621_v40 = vrot.slane %v4772_v63, 4  ;;  %v345_v42 = vrot.slane %v4806_v32, 2 }
  0x84   :  { %v622_v45 = vsel %vm581_vm2, %v619_v37, %v621_v40  ;;  %v627_v37 = vrot.slane %v4829_v60, 4 }
  0x86   :  { %667 = vrot.lane.b32.xlu1 %v614_v54, %s4246_s29  ;;  %665 = vrot.lane.b32.xlu0 %v612_v55, %s4246_s29  ;;  %v346_v54 = vsel %vm301_vm3, %v343_v41, %v345_v42  ;;  %v204_v55 = vsel %vm161_vm1, %v201_v7, %v203_v43  ;;  %v484_v7 = vsel %vm441_vm0, %v481_v21, %v483_v57  ;;  %v347_v21 = vrot.slane %v4829_v60, 2 }
  0x87   :  { %v4025_v62 = vpack.i.bf16 %v346_v54, %v344_v53  ;;  %v4020_v4 = vpack.i.bf16 %v206_v56, %v204_v55  ;;  %v4030_v19 = vpack.i.bf16 %v486_v14, %v484_v7  ;;  %v351_v41 = vrot.slane %v4860_v29, 2 }
  0x88   :  { %v348_v31 = vsel %vm301_vm3, %v345_v42, %v347_v21  ;;  %v491_v54 = vrot.slane %v4860_v29, 3  ;;  %v631_v7 = vrot.slane %v4860_v29, 4 }
  0x89   :  { %v352_v53 = vsel %vm301_vm3, %v349_v25, %v351_v41 }
  0x8a   :  { %3996 = vrot.lane.b32.xlu1 %v3995_v3, %s4247_s13  ;;  %3991 = vrot.lane.b32.xlu0 %v3990_v6, %s4245_s20  ;;  %v623_v3 = vrot.slane %v4801_v34, 4  ;;  %v209_v6 = vrot.slane %v4834_v61, 1 }
  0x8c   :  { %v624_v15 = vsel %vm581_vm2, %v621_v40, %v623_v3  ;;  %v626_v30 = vsel %vm581_vm2, %v623_v3, %v625_v24  ;;  %v629_v40 = vrot.slane %v4834_v61, 4  ;;  %v212_v56 = vsel %vm161_vm1, %v209_v6, %v211_v44 }
  0x8d   :  { %v628_v3 = vsel %vm581_vm2, %v625_v24, %v627_v37 }
  0x8e   :  { %669 = vrot.lane.b32.xlu1 %v616_v17, %s4246_s29  ;;  %4001 = vrot.lane.b32.xlu0 %v4000_v22, %s4244_s18  ;;  %v487_v17 = vrot.slane %v4829_v60, 3  ;;  %v210_v22 = vsel %vm161_vm1, %v207_v5, %v209_v6 }
  0x8f   :  { %v4035_v26 = vpack.i.bf16 %v210_v22, %v208_v20 }
  0x90   :  { %v490_v28 = vsel %vm441_vm0, %v487_v17, %v489_v23 }
  0x92   :  { %4006 = vrot.lane.b32.xlu1 %v4005_v27, %s4245_s20  ;;  %671 = vrot.lane.b32.xlu0 %v618_v33, %s4246_s29  ;;  %v488_v27 = vsel %vm441_vm0, %v485_v59, %v487_v17  ;;  %v350_v33 = vsel %vm301_vm3, %v347_v21, %v349_v25  ;;  %v632_v25 = vsel %vm581_vm2, %v629_v40, %v631_v7 }
  0x93   :  { %v4040_v43 = vpack.i.bf16 %v350_v33, %v348_v31 }
  0x96   :  { %4016 = vrot.lane.b32.xlu1 %v4015_v35, %s4244_s18  ;;  %4011 = vrot.lane.b32.xlu0 %v4010_v36, %s4247_s13  ;;  %v4868_v35 = vld [vmem:[%s6449_s0 + $0xd0] sm:$0xff]  ;;  %v4045_v36 = vpack.i.bf16 %v490_v28, %v488_v27 }
  0x97   :  { %v353_v42 = vrot.slane %v4868_v35, 2  ;;  %v493_v59 = vrot.slane %v4868_v35, 3 }
  0x99   :  { %v354_v55 = vsel %vm301_vm3, %v351_v41, %v353_v42  ;;  %v494_v20 = vsel %vm441_vm0, %v491_v54, %v493_v59 }
  0x9a   :  { %675 = vrot.lane.b32.xlu1 %v622_v45, %s4246_s29  ;;  %673 = vrot.lane.b32.xlu0 %v620_v46, %s4246_s29  ;;  %v213_v45 = vrot.slane %v4868_v35, 1  ;;  %v630_v46 = vsel %vm581_vm2, %v627_v37, %v629_v40  ;;  %v4055_v14 = vpack.i.bf16 %v354_v55, %v352_v53  ;;  %v633_v40 = vrot.slane %v4868_v35, 4 }
  0x9c   :  { %v214_v57 = vsel %vm161_vm1, %v211_v44, %v213_v45 }
  0x9d   :  { %v4050_v6 = vpack.i.bf16 %v214_v57, %v212_v56  ;;  %v634_v57 = vsel %vm581_vm2, %v631_v7, %v633_v40 }
  0x9e   :  { %4026 = vrot.lane.b32.xlu1 %v4025_v62, %s4247_s13  ;;  %4021 = vrot.lane.b32.xlu0 %v4020_v4, %s4245_s20  ;;  %v4893_v4 = vld [vmem:[%s6449_s0 + $0xd8] sm:$0xff] }
  0x9f   :  { %v215_v22 = vrot.slane %v4893_v4, 1  ;;  %v495_v55 = vrot.slane %v4893_v4, 3 }
  0xa1   :  { %v216_v33 = vsel %vm161_vm1, %v213_v45, %v215_v22  ;;  %v496_v7 = vsel %vm441_vm0, %v493_v59, %v495_v55 }
  0xa2   :  { %677 = vrot.lane.b32.xlu1 %v624_v15, %s4246_s29  ;;  %4031 = vrot.lane.b32.xlu0 %v4030_v19, %s4244_s18  ;;  %v492_v15 = vsel %vm441_vm0, %v489_v23, %v491_v54 }
  0xa3   :  { %v4060_v27 = vpack.i.bf16 %v494_v20, %v492_v15 }
  0xa6   :  { %4036 = vrot.lane.b32.xlu1 %v4035_v26, %s4245_s20  ;;  %679 = vrot.lane.b32.xlu0 %v626_v30, %s4246_s29 }
  0xaa   :  { %4046 = vrot.lane.b32.xlu1 %v4045_v36, %s4244_s18  ;;  %4041 = vrot.lane.b32.xlu0 %v4040_v43, %s4247_s13 }
  0xac   :  { %v3882_v62 = vpop.permute.xlu1 %3881  ;;  %v3872_v5 = vpop.permute.xlu0 %3871 }
  0xad   :  { %v3874_v17 = vunpack.i.h.bf16 %v3872_v5  ;;  %v3873_v19 = vunpack.i.l.bf16 %v3872_v5  ;;  %v3883_v28 = vunpack.i.l.bf16 %v3882_v62  ;;  %v3884_v43 = vunpack.i.h.bf16 %v3882_v62 }
  0xae   :  { %683 = vrot.lane.b32.xlu1 %v630_v46, %s4246_s29  ;;  %681 = vrot.lane.b32.xlu0 %v628_v3, %s4246_s29  ;;  %v355_v62 = vrot.slane %v4893_v4, 2 }
  0xaf   :  { %v723_v30 = vsel %vm721_vm5, %v4363_v1, %v3874_v17  ;;  %v722_v31 = vsel %vm721_vm5, %v4358_v0, %v3873_v19  ;;  %v4065_v0 = vpack.i.bf16 %v215_v22, %v216_v33 }
  0xb0   :  { %v638_v24 = vpop.permute.xlu1 %637  ;;  %v3877_v21 = vpop.permute.xlu0 %3876 }
  0xb1   :  { %3468 = vmatprep.mubr.msk.f32.mxu0 %vm885_vm4, %v638_v24  ;;  %v3879_v23 = vunpack.i.h.bf16 %v3877_v21  ;;  %v3878_v26 = vunpack.i.l.bf16 %v3877_v21 }
  0xb2   :  { %4056 = vrot.lane.b32.xlu1 %v4055_v14, %s4247_s13  ;;  %4051 = vrot.lane.b32.xlu0 %v4050_v6, %s4245_s20 }
  0xb3   :  { %v751_v37 = vsel %vm750_vm6, %v722_v31, %v3878_v26  ;;  %v752_v41 = vsel %vm750_vm6, %v723_v30, %v3879_v23 }
  0xb4   :  { %v3887_v36 = vpop.permute.xlu1 %3886  ;;  %v640_v44 = vpop.permute.xlu0 %639  ;;  %v780_v46 = vsel %vm779_vm7, %v751_v37, %v3883_v28  ;;  %v781_v45 = vsel %vm779_vm7, %v752_v41, %v3884_v43 }
  0xb5   :  { %v809_v1 = vsel %vm808_vm8, %v780_v46, %v638_v24  ;;  %v3889_v53 = vunpack.i.h.bf16 %v3887_v36  ;;  %v3888_v54 = vunpack.i.l.bf16 %v3887_v36  ;;  %v810_v15 = vsel %vm808_vm8, %v781_v45, %v640_v44 }
  0xb6   :  { %685 = vrot.lane.b32.xlu1 %v632_v25, %s4246_s29  ;;  %4061 = vrot.lane.b32.xlu0 %v4060_v27, %s4244_s18  ;;  %v356_v24 = vsel %vm301_vm3, %v353_v42, %v355_v62 }
  0xb7   :  { %1013 = vmatmul.mubr.f32.vlgmr.msra.gmra.mxu0 %v809_v1  ;;  %v725_v17 = vsel %vm721_vm5, %v4381_v11, %v3889_v53  ;;  %v724_v19 = vsel %vm721_vm5, %v4368_v2, %v3888_v54  ;;  %v635_v11 = vrot.slane %v4893_v4, 4 }
  0xb8   :  { %3469 = vmatprep.mubr.msk.f32.mxu0 %vm885_vm4, %v640_v44  ;;  %v3897_v56 = vpop.permute.xlu1 %3896  ;;  %v3892_v5 = vpop.permute.xlu0 %3891 }
  0xb9   :  { %v3898_v3 = vunpack.i.l.bf16 %v3897_v56  ;;  %v3894_v14 = vunpack.i.h.bf16 %v3892_v5  ;;  %v3893_v6 = vunpack.i.l.bf16 %v3892_v5  ;;  %v3899_v20 = vunpack.i.h.bf16 %v3897_v56 }
  0xba   :  { %4066 = vrot.lane.b32.xlu1 %v4065_v0, %s4245_s20  ;;  %687 = vrot.lane.b32.xlu0 %v634_v57, %s4246_s29  ;;  %v636_v27 = vsel %vm581_vm2, %v633_v40, %v635_v11 }
  0xbb   :  { %1019 = vmatmul.mubr.f32.gmra.mxu0 %v810_v15  ;;  %v753_v21 = vsel %vm750_vm6, %v724_v19, %v3893_v6  ;;  %v754_v25 = vsel %vm750_vm6, %v725_v17, %v3894_v14 }
  0xbc   :  { %v644_v22 = vpop.permute.xlu1 %643  ;;  %v642_v2 = vpop.permute.xlu0 %641  ;;  %v782_v23 = vsel %vm779_vm7, %v753_v21, %v3898_v3  ;;  %v783_v42 = vsel %vm779_vm7, %v754_v25, %v3899_v20 }
  0xbd   :  { %3470 = vmatprep.mubr.msk.f32.mxu0 %vm885_vm4, %v642_v2  ;;  %v811_v59 = vsel %vm808_vm8, %v782_v23, %v642_v2  ;;  %v812_v33 = vsel %vm808_vm8, %v783_v42, %v644_v22 }
  0xbe   :  { %549 = vrot.lane.b32.xlu1 %v496_v7, %s4244_s18  ;;  %409 = vrot.lane.b32.xlu0 %v356_v24, %s4247_s13 }
  0xbf   :  { %1025 = vmatmul.mubr.f32.gmra.mxu0 %v811_v59 }
  0xc0   :  { %3471 = vmatprep.mubr.msk.f32.mxu0 %vm885_vm4, %v644_v22  ;;  %v3907_v26 = vpop.permute.xlu1 %3906  ;;  %v3902_v28 = vpop.permute.xlu0 %3901 }
  0xc1   :  { %v3904_v30 = vunpack.i.h.bf16 %v3902_v28  ;;  %v3903_v31 = vunpack.i.l.bf16 %v3902_v28  ;;  %v3908_v36 = vunpack.i.l.bf16 %v3907_v26  ;;  %v3909_v43 = vunpack.i.h.bf16 %v3907_v26 }
  0xc2   :  { %411 = vrot.lane.b32.xlu1 %v355_v62, %s4247_s13  ;;  %689 = vrot.lane.b32.xlu0 %v636_v27, %s4246_s29 }
  0xc3   :  { %1031 = vmatmul.mubr.f32.gmra.mxu0 %v812_v33  ;;  %v726_v37 = vsel %vm721_vm5, %v4390_v16, %v3903_v31  ;;  %v727_v40 = vsel %vm721_vm5, %v4441_v47, %v3904_v30 }
  0xc4   :  { %v646_v41 = vpop.permute.xlu1 %645  ;;  %v3912_v44 = vpop.permute.xlu0 %3911  ;;  %v755_v0 = vsel %vm750_vm6, %v726_v37, %v3908_v36  ;;  %v756_v56 = vsel %vm750_vm6, %v727_v40, %v3909_v43 }
  0xc5   :  { %3472 = vmatprep.mubr.msk.f32.mxu0 %vm885_vm4, %v646_v41  ;;  %v3914_v46 = vunpack.i.h.bf16 %v3912_v44  ;;  %v3913_v1 = vunpack.i.l.bf16 %v3912_v44 }
  0xc6   :  { %691 = vrot.lane.b32.xlu1 %v635_v11, %s4246_s29  ;;  %551 = vrot.lane.b32.xlu0 %v495_v55, %s4244_s18 }
  0xc7   :  { %v784_v54 = vsel %vm779_vm7, %v755_v0, %v3913_v1  ;;  %v785_v57 = vsel %vm779_vm7, %v756_v56, %v3914_v46 }
  0xc8   :  { %v3917_v53 = vpop.permute.xlu1 %3916  ;;  %v648_v16 = vpop.permute.xlu0 %647  ;;  %v813_v45 = vsel %vm808_vm8, %v784_v54, %v646_v41 }
  0xc9   :  { %1037 = vmatmul.mubr.f32.gmra.mxu0 %v813_v45  ;;  %v3919_v47 = vunpack.i.h.bf16 %v3917_v53  ;;  %v3918_v62 = vunpack.i.l.bf16 %v3917_v53  ;;  %v814_v14 = vsel %vm808_vm8, %v785_v57, %v648_v16 }
  0xca   :  { %3473 = vmatprep.mubr.msk.f32.mxu0 %vm885_vm4, %v648_v16 }
  0xcb   :  { %v729_v17 = vsel %vm721_vm5, %v4494_v12, %v3919_v47  ;;  %v728_v19 = vsel %vm721_vm5, %v4446_v48, %v3918_v62 }
  0xcc   :  { %v3927_v3 = vpop.permute.xlu1 %3926  ;;  %v3922_v55 = vpop.permute.xlu0 %3921 }
  0xcd   :  { %v3928_v5 = vunpack.i.l.bf16 %v3927_v3  ;;  %v3924_v6 = vunpack.i.h.bf16 %v3922_v55  ;;  %v3923_v15 = vunpack.i.l.bf16 %v3922_v55  ;;  %1043 = vmatmul.mubr.f32.gmra.mxu0 %v814_v14  ;;  %v3929_v20 = vunpack.i.h.bf16 %v3927_v3 }
  0xcf   :  { %v757_v22 = vsel %vm750_vm6, %v728_v19, %v3923_v15  ;;  %v758_v24 = vsel %vm750_vm6, %v729_v17, %v3924_v6 }
  0xd0   :  { %v652_v7 = vpop.permute.xlu1 %651  ;;  %v650_v21 = vpop.permute.xlu0 %649  ;;  %v786_v11 = vsel %vm779_vm7, %v757_v22, %v3928_v5  ;;  %v787_v2 = vsel %vm779_vm7, %v758_v24, %v3929_v20 }
  0xd1   :  { %3474 = vmatprep.mubr.msk.f32.mxu0 %vm885_vm4, %v650_v21  ;;  %v815_v25 = vsel %vm808_vm8, %v786_v11, %v650_v21  ;;  %v816_v42 = vsel %vm808_vm8, %v787_v2, %v652_v7 }
  0xd2   :  { %1049 = vmatmul.mubr.f32.gmra.mxu0 %v815_v25 }
  0xd3   :  { %3475 = vmatprep.mubr.msk.f32.mxu0 %vm885_vm4, %v652_v7 }
  0xd4   :  { %v3937_v12 = vpop.permute.xlu1 %3936  ;;  %v3932_v48 = vpop.permute.xlu0 %3931 }
  0xd5   :  { %v3934_v23 = vunpack.i.h.bf16 %v3932_v48  ;;  %v3933_v59 = vunpack.i.l.bf16 %v3932_v48  ;;  %v3938_v26 = vunpack.i.l.bf16 %v3937_v12  ;;  %v3939_v30 = vunpack.i.h.bf16 %v3937_v12 }
  0xd6   :  { %1055 = vmatmul.mubr.f32.gmra.mxu0 %v816_v42 }
  0xd7   :  { %v730_v27 = vsel %vm721_vm5, %v4499_v13, %v3933_v59  ;;  %v731_v33 = vsel %vm721_vm5, %v4566_v49, %v3934_v23 }
  0xd8   :  { %v654_v28 = vpop.permute.xlu1 %653  ;;  %v3942_v31 = vpop.permute.xlu0 %3941  ;;  %v759_v41 = vsel %vm750_vm6, %v730_v27, %v3938_v26  ;;  %v760_v13 = vsel %vm750_vm6, %v731_v33, %v3939_v30 }
  0xd9   :  { %3476 = vmatprep.mubr.msk.f32.mxu0 %vm885_vm4, %v654_v28  ;;  %v3944_v36 = vunpack.i.h.bf16 %v3942_v31  ;;  %v3943_v37 = vunpack.i.l.bf16 %v3942_v31 }
  0xdb   :  { %v788_v44 = vsel %vm779_vm7, %v759_v41, %v3943_v37  ;;  %v789_v1 = vsel %vm779_vm7, %v760_v13, %v3944_v36 }
  0xdc   :  { %v3947_v43 = vpop.permute.xlu1 %3946  ;;  %v656_v40 = vpop.permute.xlu0 %655  ;;  %v817_v46 = vsel %vm808_vm8, %v788_v44, %v654_v28 }
  0xdd   :  { %1061 = vmatmul.mubr.f32.gmra.mxu0 %v817_v46  ;;  %v3949_v0 = vunpack.i.h.bf16 %v3947_v43  ;;  %v3948_v53 = vunpack.i.l.bf16 %v3947_v43  ;;  %v818_v45 = vsel %vm808_vm8, %v789_v1, %v656_v40 }
  0xde   :  { %3477 = vmatprep.mubr.msk.f32.mxu0 %vm885_vm4, %v656_v40 }
  0xdf   :  { %v733_v47 = vsel %vm721_vm5, %v4613_v9, %v3949_v0  ;;  %v732_v62 = vsel %vm721_vm5, %v4571_v50, %v3948_v53 }
  0xe0   :  { %v3957_v49 = vpop.permute.xlu1 %3956  ;;  %v3952_v16 = vpop.permute.xlu0 %3951 }
  0xe1   :  { %v3958_v54 = vunpack.i.l.bf16 %v3957_v49  ;;  %v3954_v56 = vunpack.i.h.bf16 %v3952_v16  ;;  %v3953_v57 = vunpack.i.l.bf16 %v3952_v16  ;;  %1067 = vmatmul.mubr.f32.gmra.mxu0 %v818_v45  ;;  %v3959_v3 = vunpack.i.h.bf16 %v3957_v49 }
  0xe3   :  { %v761_v55 = vsel %vm750_vm6, %v732_v62, %v3953_v57  ;;  %v762_v14 = vsel %vm750_vm6, %v733_v47, %v3954_v56 }
  0xe4   :  { %v660_v5 = vpop.permute.xlu1 %659  ;;  %v658_v6 = vpop.permute.xlu0 %657  ;;  %v790_v15 = vsel %vm779_vm7, %v761_v55, %v3958_v54  ;;  %v791_v19 = vsel %vm779_vm7, %v762_v14, %v3959_v3 }
  0xe5   :  { %3478 = vmatprep.mubr.msk.f32.mxu0 %vm885_vm4, %v658_v6  ;;  %v819_v17 = vsel %vm808_vm8, %v790_v15, %v658_v6  ;;  %v820_v22 = vsel %vm808_vm8, %v791_v19, %v660_v5 }
  0xe6   :  { %1073 = vmatmul.mubr.f32.gmra.mxu0 %v819_v17 }
  0xe7   :  { %3479 = vmatprep.mubr.msk.f32.mxu0 %vm885_vm4, %v660_v5 }
  0xe8   :  { %v3967_v9 = vpop.permute.xlu1 %3966  ;;  %v3962_v50 = vpop.permute.xlu0 %3961 }
  0xe9   :  { %v3964_v20 = vunpack.i.h.bf16 %v3962_v50  ;;  %v3963_v7 = vunpack.i.l.bf16 %v3962_v50  ;;  %v3968_v24 = vunpack.i.l.bf16 %v3967_v9  ;;  %v3969_v25 = vunpack.i.h.bf16 %v3967_v9 }
  0xea   :  { %1079 = vmatmul.mubr.f32.gmra.mxu0 %v820_v22 }
  0xeb   :  { %v734_v21 = vsel %vm721_vm5, %v4624_v18, %v3963_v7  ;;  %v735_v12 = vsel %vm721_vm5, %v4677_v51, %v3964_v20 }
  0xec   :  { %v662_v11 = vpop.permute.xlu1 %661  ;;  %v3972_v2 = vpop.permute.xlu0 %3971  ;;  %v763_v59 = vsel %vm750_vm6, %v734_v21, %v3968_v24  ;;  %v764_v18 = vsel %vm750_vm6, %v735_v12, %v3969_v25 }
  0xed   :  { %3480 = vmatprep.mubr.msk.f32.mxu0 %vm885_vm4, %v662_v11  ;;  %v3974_v48 = vunpack.i.h.bf16 %v3972_v2  ;;  %v3973_v23 = vunpack.i.l.bf16 %v3972_v2 }
  0xef   :  { %v792_v26 = vsel %vm779_vm7, %v763_v59, %v3973_v23  ;;  %v793_v30 = vsel %vm779_vm7, %v764_v18, %v3974_v48 }
  0xf0   :  { %v3977_v42 = vpop.permute.xlu1 %3976  ;;  %v664_v27 = vpop.permute.xlu0 %663  ;;  %v821_v28 = vsel %vm808_vm8, %v792_v26, %v662_v11 }
  0xf1   :  { %1085 = vmatmul.mubr.f32.gmra.mxu0 %v821_v28  ;;  %v3979_v31 = vunpack.i.h.bf16 %v3977_v42  ;;  %v3978_v33 = vunpack.i.l.bf16 %v3977_v42  ;;  %v822_v41 = vsel %vm808_vm8, %v793_v30, %v664_v27 }
  0xf2   :  { %3481 = vmatprep.mubr.msk.f32.mxu0 %vm885_vm4, %v664_v27 }
  0xf3   :  { %v737_v40 = vsel %vm721_vm5, %v4705_v8, %v3979_v31  ;;  %v736_v46 = vsel %vm721_vm5, %v4682_v52, %v3978_v33 }
  0xf4   :  { %v3987_v51 = vpop.permute.xlu1 %3986  ;;  %v3982_v37 = vpop.permute.xlu0 %3981 }
  0xf5   :  { %v3988_v36 = vunpack.i.l.bf16 %v3987_v51  ;;  %v3984_v43 = vunpack.i.h.bf16 %v3982_v37  ;;  %v3983_v44 = vunpack.i.l.bf16 %v3982_v37  ;;  %1091 = vmatmul.mubr.f32.gmra.mxu0 %v822_v41  ;;  %v3989_v13 = vunpack.i.h.bf16 %v3987_v51 }
  0xf7   :  { %v765_v0 = vsel %vm750_vm6, %v736_v46, %v3983_v44  ;;  %v766_v53 = vsel %vm750_vm6, %v737_v40, %v3984_v43 }
  0xf8   :  { %v668_v1 = vpop.permute.xlu1 %667  ;;  %v666_v49 = vpop.permute.xlu0 %665  ;;  %v794_v54 = vsel %vm779_vm7, %v765_v0, %v3988_v36  ;;  %v795_v45 = vsel %vm779_vm7, %v766_v53, %v3989_v13 }
  0xf9   :  { %3482 = vmatprep.mubr.msk.f32.mxu0 %vm885_vm4, %v666_v49  ;;  %v823_v16 = vsel %vm808_vm8, %v794_v54, %v666_v49  ;;  %v824_v47 = vsel %vm808_vm8, %v795_v45, %v668_v1 }
  0xfa   :  { %1097 = vmatmul.mubr.f32.gmra.mxu0 %v823_v16 }
  0xfb   :  { %3483 = vmatprep.mubr.msk.f32.mxu0 %vm885_vm4, %v668_v1 }
  0xfc   :  { %v3997_v8 = vpop.permute.xlu1 %3996  ;;  %v3992_v52 = vpop.permute.xlu0 %3991 }
  0xfd   :  { %v3994_v56 = vunpack.i.h.bf16 %v3992_v52  ;;  %v3993_v57 = vunpack.i.l.bf16 %v3992_v52  ;;  %v3998_v62 = vunpack.i.l.bf16 %v3997_v8  ;;  %v3999_v55 = vunpack.i.h.bf16 %v3997_v8 }
  0xfe   :  { %1103 = vmatmul.mubr.f32.gmra.mxu0 %v824_v47 }
  0xff   :  { %v738_v3 = vsel %vm721_vm5, %v4710_v10, %v3993_v57  ;;  %v739_v6 = vsel %vm721_vm5, %v4739_v38, %v3994_v56 }
 0x100   :  { %v670_v5 = vpop.permute.xlu1 %669  ;;  %v4002_v14 = vpop.permute.xlu0 %4001  ;;  %v767_v19 = vsel %vm750_vm6, %v738_v3, %v3998_v62  ;;  %v768_v10 = vsel %vm750_vm6, %v739_v6, %v3999_v55 }
 0x101   :  { %3484 = vmatprep.mubr.msk.f32.mxu0 %vm885_vm4, %v670_v5  ;;  %v4004_v15 = vunpack.i.h.bf16 %v4002_v14  ;;  %v4003_v17 = vunpack.i.l.bf16 %v4002_v14 }
 0x103   :  { %v796_v50 = vsel %vm779_vm7, %v767_v19, %v4003_v17  ;;  %v797_v22 = vsel %vm779_vm7, %v768_v10, %v4004_v15 }
 0x104   :  { %v4007_v9 = vpop.permute.xlu1 %4006  ;;  %v672_v20 = vpop.permute.xlu0 %671  ;;  %v825_v7 = vsel %vm808_vm8, %v796_v50, %v670_v5 }
 0x105   :  { %1109 = vmatmul.mubr.f32.gmra.mxu0 %v825_v7  ;;  %v4009_v24 = vunpack.i.h.bf16 %v4007_v9  ;;  %v4008_v21 = vunpack.i.l.bf16 %v4007_v9  ;;  %v826_v2 = vsel %vm808_vm8, %v797_v22, %v672_v20 }
 0x106   :  { %3485 = vmatprep.mubr.msk.f32.mxu0 %vm885_vm4, %v672_v20 }
 0x107   :  { %v741_v23 = vsel %vm721_vm5, %v4763_v58, %v4009_v24  ;;  %v740_v59 = vsel %vm721_vm5, %v4744_v39, %v4008_v21 }
 0x108   :  { %v4017_v38 = vpop.permute.xlu1 %4016  ;;  %v4012_v25 = vpop.permute.xlu0 %4011 }
 0x109   :  { %v4018_v11 = vunpack.i.l.bf16 %v4017_v38  ;;  %v4014_v12 = vunpack.i.h.bf16 %v4012_v25  ;;  %v4013_v48 = vunpack.i.l.bf16 %v4012_v25  ;;  %1115 = vmatmul.mubr.f32.gmra.mxu0 %v826_v2  ;;  %v4019_v42 = vunpack.i.h.bf16 %v4017_v38 }
 0x10b   :  { %v769_v27 = vsel %vm750_vm6, %v740_v59, %v4013_v48  ;;  %v770_v28 = vsel %vm750_vm6, %v741_v23, %v4014_v12 }
 0x10c   :  { %v676_v26 = vpop.permute.xlu1 %675  ;;  %v674_v18 = vpop.permute.xlu0 %673  ;;  %v798_v30 = vsel %vm779_vm7, %v769_v27, %v4018_v11  ;;  %v799_v33 = vsel %vm779_vm7, %v770_v28, %v4019_v42 }
 0x10d   :  { %3486 = vmatprep.mubr.msk.f32.mxu0 %vm885_vm4, %v674_v18  ;;  %v827_v31 = vsel %vm808_vm8, %v798_v30, %v674_v18  ;;  %v828_v37 = vsel %vm808_vm8, %v799_v33, %v676_v26 }
 0x10e   :  { %1121 = vmatmul.mubr.f32.gmra.mxu0 %v827_v31 }
 0x10f   :  { %3487 = vmatprep.mubr.msk.f32.mxu0 %vm885_vm4, %v676_v26 }
 0x110   :  { %v4027_v58 = vpop.permute.xlu1 %4026  ;;  %v4022_v39 = vpop.permute.xlu0 %4021 }
 0x111   :  { %v4024_v51 = vunpack.i.h.bf16 %v4022_v39  ;;  %v4023_v36 = vunpack.i.l.bf16 %v4022_v39  ;;  %v4028_v41 = vunpack.i.l.bf16 %v4027_v58  ;;  %v4029_v40 = vunpack.i.h.bf16 %v4027_v58 }
 0x112   :  { %1127 = vmatmul.mubr.f32.gmra.mxu0 %v828_v37 }
 0x113   :  { %v742_v43 = vsel %vm721_vm5, %v4772_v63, %v4023_v36  ;;  %v743_v13 = vsel %vm721_vm5, %v4801_v34, %v4024_v51 }
 0x114   :  { %v678_v44 = vpop.permute.xlu1 %677  ;;  %v4032_v46 = vpop.permute.xlu0 %4031  ;;  %v771_v53 = vsel %vm750_vm6, %v742_v43, %v4028_v41  ;;  %v772_v63 = vsel %vm750_vm6, %v743_v13, %v4029_v40 }
 0x115   :  { %3488 = vmatprep.mubr.msk.f32.mxu0 %vm885_vm4, %v678_v44  ;;  %v4034_v1 = vunpack.i.h.bf16 %v4032_v46  ;;  %v4033_v0 = vunpack.i.l.bf16 %v4032_v46 }
 0x117   :  { %v800_v54 = vsel %vm779_vm7, %v771_v53, %v4033_v0  ;;  %v801_v8 = vsel %vm779_vm7, %v772_v63, %v4034_v1  ;;  %v875_v0 = vlaneseq }
 0x118   :  { %v4037_v49 = vpop.permute.xlu1 %4036  ;;  %v680_v16 = vpop.permute.xlu0 %679  ;;  %v829_v45 = vsel %vm808_vm8, %v800_v54, %v678_v44  ;;  %v873_v54 = vld [vmem:[%s6451_s2] sm:$0x3]  ;;  %s4248_s2 = smov 120  }
 0x119   :  { %1133 = vmatmul.mubr.f32.gmra.mxu0 %v829_v45  ;;  %v4039_v52 = vunpack.i.h.bf16 %v4037_v49  ;;  %v4038_v56 = vunpack.i.l.bf16 %v4037_v49  ;;  %v830_v62 = vsel %vm808_vm8, %v801_v8, %v680_v16  ;;  %v876_v53 = vshrl.u32 %v875_v0, 7 }
 0x11a   :  { %3489 = vmatprep.mubr.msk.f32.mxu0 %vm885_vm4, %v680_v16 }
 0x11b   :  { %v745_v55 = vsel %vm721_vm5, %v4829_v60, %v4039_v52  ;;  %v744_v14 = vsel %vm721_vm5, %v4806_v32, %v4038_v56  ;;  %v877_v49 = vsub.s32 0, %v876_v53  ;;  %v881_v16 = vsub.s32 1, %v876_v53 }
 0x11c   :  { %v4047_v34 = vpop.permute.xlu1 %4046  ;;  %v4042_v47 = vpop.permute.xlu0 %4041 }
 0x11d   :  { %v4048_v57 = vunpack.i.l.bf16 %v4047_v34  ;;  %v4044_v3 = vunpack.i.h.bf16 %v4042_v47  ;;  %v4043_v5 = vunpack.i.l.bf16 %v4042_v47  ;;  %1139 = vmatmul.mubr.f32.gmra.mxu0 %v830_v62  ;;  %v4049_v6 = vunpack.i.h.bf16 %v4047_v34 }
 0x11e   :  { %v5102_v45 = vrot.slane %v873_v54, %v881_v16 }
 0x11f   :  { %v773_v17 = vsel %vm750_vm6, %v744_v14, %v4043_v5  ;;  %v774_v19 = vsel %vm750_vm6, %v745_v55, %v4044_v3 }
 0x120   :  { %v684_v15 = vpop.permute.xlu1 %683  ;;  %v682_v9 = vpop.permute.xlu0 %681  ;;  %v802_v50 = vsel %vm779_vm7, %v773_v17, %v4048_v57  ;;  %v803_v7 = vsel %vm779_vm7, %v774_v19, %v4049_v6 }
 0x121   :  { %3490 = vmatprep.mubr.msk.f32.mxu0 %vm885_vm4, %v682_v9  ;;  %v831_v20 = vsel %vm808_vm8, %v802_v50, %v682_v9  ;;  %v832_v24 = vsel %vm808_vm8, %v803_v7, %v684_v15 }
 0x122   :  { %1145 = vmatmul.mubr.f32.gmra.mxu0 %v831_v20 }
 0x123   :  { %3491 = vmatprep.mubr.msk.f32.mxu0 %vm885_vm4, %v684_v15 }
 0x124   :  { %v4057_v60 = vpop.permute.xlu1 %4056  ;;  %v4052_v32 = vpop.permute.xlu0 %4051 }
 0x125   :  { %v4054_v10 = vunpack.i.h.bf16 %v4052_v32  ;;  %v4053_v22 = vunpack.i.l.bf16 %v4052_v32  ;;  %v4058_v21 = vunpack.i.l.bf16 %v4057_v60  ;;  %v4059_v25 = vunpack.i.h.bf16 %v4057_v60 }
 0x126   :  { %1151 = vmatmul.mubr.f32.gmra.mxu0 %v832_v24 }
 0x127   :  { %v746_v38 = vsel %vm721_vm5, %v4834_v61, %v4053_v22  ;;  %v747_v12 = vsel %vm721_vm5, %v4860_v29, %v4054_v10 }
 0x128   :  { %v686_v11 = vpop.permute.xlu1 %685  ;;  %v4062_v2 = vpop.permute.xlu0 %4061  ;;  %v775_v59 = vsel %vm750_vm6, %v746_v38, %v4058_v21  ;;  %v776_v61 = vsel %vm750_vm6, %v747_v12, %v4059_v25 }
 0x129   :  { %3492 = vmatprep.mubr.msk.f32.mxu0 %vm885_vm4, %v686_v11  ;;  %v4064_v48 = vunpack.i.h.bf16 %v4062_v2  ;;  %v4063_v23 = vunpack.i.l.bf16 %v4062_v2 }
 0x12b   :  { %v804_v26 = vsel %vm779_vm7, %v775_v59, %v4063_v23  ;;  %v805_v30 = vsel %vm779_vm7, %v776_v61, %v4064_v48 }
 0x12c   :  { %v4067_v42 = vpop.permute.xlu1 %4066  ;;  %v688_v28 = vpop.permute.xlu0 %687  ;;  %v833_v18 = vsel %vm808_vm8, %v804_v26, %v686_v11 }
 0x12d   :  { %v4068_v27 = vunpack.i.l.bf16 %v4067_v42  ;;  %1157 = vmatmul.mubr.f32.gmra.mxu0 %v833_v18  ;;  %v834_v58 = vsel %vm808_vm8, %v805_v30, %v688_v28  ;;  %v4069_v51 = vunpack.i.h.bf16 %v4067_v42 }
 0x12e   :  { %3493 = vmatprep.mubr.msk.f32.mxu0 %vm885_vm4, %v688_v28 }
 0x12f   :  { %v748_v29 = vsel %vm721_vm5, %v4868_v35, %v4068_v27  ;;  %v749_v35 = vsel %vm721_vm5, %v4893_v4, %v4069_v51  ;;  %v5100_v4 = vrot.slane %v873_v54, %v877_v49 }
 0x130   :  { %v550_v31 = vpop.permute.xlu1 %549  ;;  %v410_v33 = vpop.permute.xlu0 %409 }
 0x131   :  { %v777_v39 = vsel %vm750_vm6, %v748_v29, %v410_v33  ;;  %1163 = vmatmul.mubr.f32.gmra.mxu0 %v834_v58 }
 0x132   :  { %v806_v41 = vsel %vm779_vm7, %v777_v39, %v550_v31 }
 0x134   :  { %v412_v36 = vpop.permute.xlu1 %411  ;;  %v690_v37 = vpop.permute.xlu0 %689 }
 0x135   :  { %3494 = vmatprep.mubr.msk.f32.mxu0 %vm885_vm4, %v690_v37  ;;  %v835_v43 = vsel %vm808_vm8, %v806_v41, %v690_v37  ;;  %v778_v40 = vsel %vm750_vm6, %v749_v35, %v412_v36 }
 0x136   :  { %1169 = vmatmul.mubr.f32.gmra.mxu0 %v835_v43 }
 0x138   :  { %v692_v44 = vpop.permute.xlu1 %691  ;;  %v552_v46 = vpop.permute.xlu0 %551 }
 0x139   :  { %3495 = vmatprep.mubr.msk.f32.mxu0 %vm885_vm4, %v692_v44  ;;  %v807_v13 = vsel %vm779_vm7, %v778_v40, %v552_v46 }
 0x13a   :  { %v836_v1 = vsel %vm808_vm8, %v807_v13, %v692_v44 }
 0x13b   :  { %1175 = vmatmul.mubr.f32.gmra.mxu0 %v836_v1 }
 0x177   :  { %v1014_v63 = vpop.f32.mrf.mxu0 }
 0x178   :  { %v1015_v8 = vadd.f32 %v1014_v63, %v5100_v4 }
 0x179   :  { %v1016_v52 = vpop.f32.mrf.mxu0 }
 0x17a   :  { %v1017_v56 = vadd.f32 %v1016_v52, %v5102_v45  ;;  %v1181_v57 = vmax.f32 %v1015_v8, 0.0 }
 0x17b   :  { %v1020_v34 = vpop.f32.mrf.mxu0 }
 0x17c   :  { %v1021_v47 = vadd.f32 %v1020_v34, %v5100_v4  ;;  %v1182_v62 = vmax.f32 %v1017_v56, 0.0  ;;  %v1293_v6 = vrot.slane %v1181_v57, 1 }
 0x17d   :  { %v1022_v3 = vpop.f32.mrf.mxu0 }
 0x17e   :  { %v1183_v5 = vmax.f32 %v1021_v47, 0.0  ;;  %v1023_v55 = vadd.f32 %v1022_v3, %v5102_v45  ;;  %v1296_v9 = vrot.slane %v1182_v62, 1 }
 0x17f   :  { %v1026_v14 = vpop.f32.mrf.mxu0 }
 0x180   :  { %v1294_v15 = vrot.slane %v1183_v5, 1  ;;  %v1184_v17 = vmax.f32 %v1023_v55, 0.0  ;;  %v1027_v19 = vadd.f32 %v1026_v14, %v5100_v4 }
 0x181   :  { %v1028_v50 = vpop.f32.mrf.mxu0 }
 0x182   :  { %v1295_v20 = vsel %vm161_vm1, %v1293_v6, %v1294_v15  ;;  %v1297_v7 = vrot.slane %v1184_v17, 1  ;;  %v1185_v60 = vmax.f32 %v1027_v19, 0.0  ;;  %v1029_v32 = vadd.f32 %v1028_v50, %v5102_v45 }
 0x183   :  { %v1032_v10 = vpop.f32.mrf.mxu0  ;;  %v5111_v22 = vmax.f32 %v1181_v57, %v1295_v20 }
 0x184   :  { %v1298_v24 = vsel %vm161_vm1, %v1296_v9, %v1297_v7  ;;  %v1299_v21 = vrot.slane %v1185_v60, 1  ;;  %v1186_v38 = vmax.f32 %v1029_v32, 0.0  ;;  %v1033_v11 = vadd.f32 %v1032_v10, %v5100_v4 }
 0x185   :  { %6496 = vst [vmem:[#allocation12_spill] sm:$0xff] %v5111_v22  ;;  %v1034_v25 = vpop.f32.mrf.mxu0  ;;  %v5115_v2 = vmax.f32 %v1182_v62, %v1298_v24 }
 0x186   :  { %v1300_v12 = vsel %vm161_vm1, %v1294_v15, %v1299_v21  ;;  %v1301_v48 = vrot.slane %v1186_v38, 1  ;;  %v1187_v23 = vmax.f32 %v1033_v11, 0.0  ;;  %v1035_v59 = vadd.f32 %v1034_v25, %v5102_v45 }
 0x187   :  { %6497 = vst [vmem:[#allocation13_spill] sm:$0xff] %v5115_v2  ;;  %v5119_v42 = vmax.f32 %v1183_v5, %v1300_v12 }
 0x188   :  { %v1302_v26 = vsel %vm161_vm1, %v1297_v7, %v1301_v48  ;;  %v1303_v27 = vrot.slane %v1187_v23, 1  ;;  %v1188_v28 = vmax.f32 %v1035_v59, 0.0 }
 0x189   :  { %6498 = vst [vmem:[#allocation14_spill] sm:$0xff] %v5119_v42  ;;  %v5122_v18 = vmax.f32 %v1184_v17, %v1302_v26  ;;  %v1038_v30 = vpop.f32.mrf.mxu0 }
 0x18a   :  { %v1305_v61 = vrot.slane %v1188_v28, 1  ;;  %v1304_v29 = vsel %vm161_vm1, %v1299_v21, %v1303_v27  ;;  %v1039_v31 = vadd.f32 %v1038_v30, %v5100_v4 }
 0x18b   :  { %6499 = vst [vmem:[#allocation15_spill] sm:$0xff] %v5122_v18  ;;  %v5126_v33 = vmax.f32 %v1185_v60, %v1304_v29  ;;  %v1040_v58 = vpop.f32.mrf.mxu0 }
 0x18c   :  { %v1306_v39 = vsel %vm161_vm1, %v1301_v48, %v1305_v61  ;;  %v1189_v51 = vmax.f32 %v1039_v31, 0.0  ;;  %v1041_v36 = vadd.f32 %v1040_v58, %v5102_v45 }
 0x18d   :  { %6500 = vst [vmem:[#allocation16_spill] sm:$0xff] %v5126_v33  ;;  %1579 = vrot.lane.b32.xlu0 %v5126_v33, %s4248_s2  ;;  %v5132_v37 = vmax.f32 %v1186_v38, %v1306_v39  ;;  %v1044_v41 = vpop.f32.mrf.mxu0 }
 0x18e   :  { %v1307_v43 = vrot.slane %v1189_v51, 1  ;;  %v1190_v35 = vmax.f32 %v1041_v36, 0.0  ;;  %v1045_v44 = vadd.f32 %v1044_v41, %v5100_v4 }
 0x18f   :  { %6501 = vst [vmem:[#allocation17_spill] sm:$0xff] %v5132_v37  ;;  %1581 = vrot.lane.b32.xlu1 %v5132_v37, %s4248_s2  ;;  %v1046_v40 = vpop.f32.mrf.mxu0 }
 0x190   :  { %v1309_v46 = vrot.slane %v1190_v35, 1  ;;  %v1191_v13 = vmax.f32 %v1045_v44, 0.0  ;;  %v1047_v1 = vadd.f32 %v1046_v40, %v5102_v45  ;;  %v1308_v0 = vsel %vm161_vm1, %v1303_v27, %v1307_v43 }
 0x191   :  { %v5139_v53 = vmax.f32 %v1187_v23, %v1308_v0 }
 0x192   :  { %v1311_v49 = vrot.slane %v1191_v13, 1  ;;  %v1192_v54 = vmax.f32 %v1047_v1, 0.0  ;;  %v1050_v16 = vpop.f32.mrf.mxu0  ;;  %v1310_v63 = vsel %vm161_vm1, %v1305_v61, %v1309_v46 }
 0x193   :  { %v1051_v8 = vadd.f32 %v1050_v16, %v5100_v4  ;;  %1583 = vrot.lane.b32.xlu0 %v5139_v53, %s4248_s2  ;;  %v5145_v52 = vmax.f32 %v1188_v28, %v1310_v63 }
 0x194   :  { %v1313_v56 = vrot.slane %v1192_v54, 1  ;;  %v1052_v34 = vpop.f32.mrf.mxu0  ;;  %v1312_v57 = vsel %vm161_vm1, %v1307_v43, %v1311_v49 }
 0x195   :  { %v1193_v47 = vmax.f32 %v1051_v8, 0.0  ;;  %v1053_v62 = vadd.f32 %v1052_v34, %v5102_v45  ;;  %1585 = vrot.lane.b32.xlu1 %v5145_v52, %s4248_s2  ;;  %v5151_v3 = vmax.f32 %v1189_v51, %v1312_v57 }
 0x196   :  { %v1056_v5 = vpop.f32.mrf.mxu0  ;;  %v1314_v55 = vsel %vm161_vm1, %v1309_v46, %v1313_v56 }
 0x197   :  { %v1315_v14 = vrot.slane %v1193_v47, 1  ;;  %v1194_v6 = vmax.f32 %v1053_v62, 0.0  ;;  %v1057_v15 = vadd.f32 %v1056_v5, %v5100_v4  ;;  %1587 = vrot.lane.b32.xlu0 %v5151_v3, %s4248_s2  ;;  %v5157_v17 = vmax.f32 %v1190_v35, %v1314_v55 }
 0x198   :  { %v1058_v19 = vpop.f32.mrf.mxu0 }
 0x199   :  { %v1317_v9 = vrot.slane %v1194_v6, 1  ;;  %v1195_v50 = vmax.f32 %v1057_v15, 0.0  ;;  %v1059_v20 = vadd.f32 %v1058_v19, %v5102_v45  ;;  %1589 = vrot.lane.b32.xlu1 %v5157_v17, %s4248_s2  ;;  %v1316_v7 = vsel %vm161_vm1, %v1311_v49, %v1315_v14 }
 0x19a   :  { %v5163_v60 = vmax.f32 %v1191_v13, %v1316_v7 }
 0x19b   :  { %v1319_v32 = vrot.slane %v1195_v50, 1  ;;  %v1196_v10 = vmax.f32 %v1059_v20, 0.0  ;;  %v1318_v24 = vsel %vm161_vm1, %v1313_v56, %v1317_v9 }
 0x19c   :  { %1591 = vrot.lane.b32.xlu0 %v5163_v60, %s4248_s2  ;;  %v5168_v21 = vmax.f32 %v1192_v54, %v1318_v24 }
 0x19d   :  { %v1321_v38 = vrot.slane %v1196_v10, 1  ;;  %v1062_v11 = vpop.f32.mrf.mxu0  ;;  %v1320_v25 = vsel %vm161_vm1, %v1315_v14, %v1319_v32 }
 0x19e   :  { %v1063_v12 = vadd.f32 %v1062_v11, %v5100_v4  ;;  %1593 = vrot.lane.b32.xlu1 %v5168_v21, %s4248_s2  ;;  %v5174_v48 = vmax.f32 %v1193_v47, %v1320_v25 }
 0x19f   :  { %v1064_v23 = vpop.f32.mrf.mxu0  ;;  %v1322_v59 = vsel %vm161_vm1, %v1317_v9, %v1321_v38 }
 0x1a0   :  { %v1197_v26 = vmax.f32 %v1063_v12, 0.0  ;;  %v1065_v27 = vadd.f32 %v1064_v23, %v5102_v45  ;;  %1595 = vrot.lane.b32.xlu0 %v5174_v48, %s4248_s2  ;;  %v5180_v28 = vmax.f32 %v1194_v6, %v1322_v59 }
 0x1a1   :  { %v1068_v61 = vpop.f32.mrf.mxu0 }
 0x1a2   :  { %v1323_v30 = vrot.slane %v1197_v26, 1  ;;  %v1198_v29 = vmax.f32 %v1065_v27, 0.0  ;;  %v1069_v31 = vadd.f32 %v1068_v61, %v5100_v4  ;;  %1597 = vrot.lane.b32.xlu1 %v5180_v28, %s4248_s2 }
 0x1a3   :  { %v1070_v58 = vpop.f32.mrf.mxu0 }
 0x1a4   :  { %v1325_v39 = vrot.slane %v1198_v29, 1  ;;  %v1199_v51 = vmax.f32 %v1069_v31, 0.0  ;;  %v1071_v36 = vadd.f32 %v1070_v58, %v5102_v45  ;;  %v1324_v41 = vsel %vm161_vm1, %v1319_v32, %v1323_v30 }
 0x1a5   :  { %v5187_v43 = vmax.f32 %v1195_v50, %v1324_v41 }
 0x1a6   :  { %v1327_v35 = vrot.slane %v1199_v51, 1  ;;  %v1200_v44 = vmax.f32 %v1071_v36, 0.0  ;;  %v1074_v40 = vpop.f32.mrf.mxu0  ;;  %v1326_v46 = vsel %vm161_vm1, %v1321_v38, %v1325_v39 }
 0x1a7   :  { %v1075_v13 = vadd.f32 %v1074_v40, %v5100_v4  ;;  %1599 = vrot.lane.b32.xlu0 %v5187_v43, %s4248_s2  ;;  %v5193_v1 = vmax.f32 %v1196_v10, %v1326_v46 }
 0x1a8   :  { %v1329_v0 = vrot.slane %v1200_v44, 1  ;;  %v1076_v49 = vpop.f32.mrf.mxu0  ;;  %v1328_v54 = vsel %vm161_vm1, %v1323_v30, %v1327_v35 }
 0x1a9   :  { %v1201_v16 = vmax.f32 %v1075_v13, 0.0  ;;  %v1077_v63 = vadd.f32 %v1076_v49, %v5102_v45  ;;  %1601 = vrot.lane.b32.xlu1 %v5193_v1, %s4248_s2  ;;  %v5199_v8 = vmax.f32 %v1197_v26, %v1328_v54 }
 0x1aa   :  { %v1080_v56 = vpop.f32.mrf.mxu0  ;;  %v1330_v34 = vsel %vm161_vm1, %v1325_v39, %v1329_v0 }
 0x1ab   :  { %v1331_v57 = vrot.slane %v1201_v16, 1  ;;  %v1202_v47 = vmax.f32 %v1077_v63, 0.0  ;;  %v1081_v62 = vadd.f32 %v1080_v56, %v5100_v4  ;;  %1603 = vrot.lane.b32.xlu0 %v5199_v8, %s4248_s2  ;;  %v5205_v5 = vmax.f32 %v1198_v29, %v1330_v34 }
 0x1ac   :  { %v1082_v55 = vpop.f32.mrf.mxu0 }
 0x1ad   :  { %v1333_v14 = vrot.slane %v1202_v47, 1  ;;  %v1203_v6 = vmax.f32 %v1081_v62, 0.0  ;;  %v1083_v15 = vadd.f32 %v1082_v55, %v5102_v45  ;;  %1605 = vrot.lane.b32.xlu1 %v5205_v5, %s4248_s2  ;;  %v1332_v19 = vsel %vm161_vm1, %v1327_v35, %v1331_v57 }
 0x1ae   :  { %v5211_v9 = vmax.f32 %v1199_v51, %v1332_v19 }
 0x1af   :  { %v1335_v50 = vrot.slane %v1203_v6, 1  ;;  %v1204_v20 = vmax.f32 %v1083_v15, 0.0  ;;  %v1334_v7 = vsel %vm161_vm1, %v1329_v0, %v1333_v14 }
 0x1b0   :  { %1607 = vrot.lane.b32.xlu0 %v5211_v9, %s4248_s2  ;;  %v5216_v32 = vmax.f32 %v1200_v44, %v1334_v7 }
 0x1b1   :  { %v1337_v10 = vrot.slane %v1204_v20, 1  ;;  %v1086_v24 = vpop.f32.mrf.mxu0  ;;  %v1336_v38 = vsel %vm161_vm1, %v1331_v57, %v1335_v50 }
 0x1b2   :  { %v1087_v11 = vadd.f32 %v1086_v24, %v5100_v4  ;;  %1609 = vrot.lane.b32.xlu1 %v5216_v32, %s4248_s2  ;;  %v5222_v25 = vmax.f32 %v1201_v16, %v1336_v38 }
 0x1b3   :  { %v1088_v12 = vpop.f32.mrf.mxu0  ;;  %v1338_v23 = vsel %vm161_vm1, %v1333_v14, %v1337_v10 }
 0x1b4   :  { %v1205_v59 = vmax.f32 %v1087_v11, 0.0  ;;  %v1089_v26 = vadd.f32 %v1088_v12, %v5102_v45  ;;  %1611 = vrot.lane.b32.xlu0 %v5222_v25, %s4248_s2  ;;  %v5228_v27 = vmax.f32 %v1202_v47, %v1338_v23 }
 0x1b5   :  { %v1092_v61 = vpop.f32.mrf.mxu0 }
 0x1b6   :  { %v1339_v30 = vrot.slane %v1205_v59, 1  ;;  %v1206_v29 = vmax.f32 %v1089_v26, 0.0  ;;  %v1093_v31 = vadd.f32 %v1092_v61, %v5100_v4  ;;  %1613 = vrot.lane.b32.xlu1 %v5228_v27, %s4248_s2 }
 0x1b7   :  { %v1094_v58 = vpop.f32.mrf.mxu0 }
 0x1b8   :  { %v1341_v39 = vrot.slane %v1206_v29, 1  ;;  %v1207_v51 = vmax.f32 %v1093_v31, 0.0  ;;  %v1095_v36 = vadd.f32 %v1094_v58, %v5102_v45  ;;  %v1340_v41 = vsel %vm161_vm1, %v1335_v50, %v1339_v30 }
 0x1b9   :  { %v5235_v35 = vmax.f32 %v1203_v6, %v1340_v41 }
 0x1ba   :  { %v1343_v44 = vrot.slane %v1207_v51, 1  ;;  %v1208_v40 = vmax.f32 %v1095_v36, 0.0  ;;  %v1098_v46 = vpop.f32.mrf.mxu0  ;;  %v1342_v13 = vsel %vm161_vm1, %v1337_v10, %v1341_v39 }
 0x1bb   :  { %v1099_v0 = vadd.f32 %v1098_v46, %v5100_v4  ;;  %1615 = vrot.lane.b32.xlu0 %v5235_v35, %s4248_s2  ;;  %v5241_v49 = vmax.f32 %v1204_v20, %v1342_v13 }
 0x1bc   :  { %v1345_v54 = vrot.slane %v1208_v40, 1  ;;  %v1100_v16 = vpop.f32.mrf.mxu0  ;;  %v1344_v63 = vsel %vm161_vm1, %v1339_v30, %v1343_v44 }
 0x1bd   :  { %v1209_v56 = vmax.f32 %v1099_v0, 0.0  ;;  %v1101_v34 = vadd.f32 %v1100_v16, %v5102_v45  ;;  %1617 = vrot.lane.b32.xlu1 %v5241_v49, %s4248_s2  ;;  %v5247_v57 = vmax.f32 %v1205_v59, %v1344_v63 }
 0x1be   :  { %v1104_v47 = vpop.f32.mrf.mxu0  ;;  %v1346_v62 = vsel %vm161_vm1, %v1341_v39, %v1345_v54 }
 0x1bf   :  { %v1347_v55 = vrot.slane %v1209_v56, 1  ;;  %v1210_v14 = vmax.f32 %v1101_v34, 0.0  ;;  %v1105_v6 = vadd.f32 %v1104_v47, %v5100_v4  ;;  %1619 = vrot.lane.b32.xlu0 %v5247_v57, %s4248_s2  ;;  %v5253_v15 = vmax.f32 %v1206_v29, %v1346_v62 }
 0x1c0   :  { %v1106_v19 = vpop.f32.mrf.mxu0 }
 0x1c1   :  { %v1349_v50 = vrot.slane %v1210_v14, 1  ;;  %v1211_v20 = vmax.f32 %v1105_v6, 0.0  ;;  %v1107_v7 = vadd.f32 %v1106_v19, %v5102_v45  ;;  %1621 = vrot.lane.b32.xlu1 %v5253_v15, %s4248_s2  ;;  %v1348_v10 = vsel %vm161_vm1, %v1343_v44, %v1347_v55 }
 0x1c2   :  { %v5259_v24 = vmax.f32 %v1207_v51, %v1348_v10 }
 0x1c3   :  { %v1351_v38 = vrot.slane %v1211_v20, 1  ;;  %v1212_v11 = vmax.f32 %v1107_v7, 0.0  ;;  %v1350_v12 = vsel %vm161_vm1, %v1345_v54, %v1349_v50 }
 0x1c4   :  { %1623 = vrot.lane.b32.xlu0 %v5259_v24, %s4248_s2  ;;  %v5264_v23 = vmax.f32 %v1208_v40, %v1350_v12 }
 0x1c5   :  { %v1353_v59 = vrot.slane %v1212_v11, 1  ;;  %v1110_v26 = vpop.f32.mrf.mxu0  ;;  %v1352_v61 = vsel %vm161_vm1, %v1347_v55, %v1351_v38 }
 0x1c6   :  { %v1111_v30 = vadd.f32 %v1110_v26, %v5100_v4  ;;  %1625 = vrot.lane.b32.xlu1 %v5264_v23, %s4248_s2  ;;  %v5270_v29 = vmax.f32 %v1209_v56, %v1352_v61 }
 0x1c7   :  { %v1112_v31 = vpop.f32.mrf.mxu0  ;;  %v1354_v58 = vsel %vm161_vm1, %v1349_v50, %v1353_v59 }
 0x1c8   :  { %v1213_v39 = vmax.f32 %v1111_v30, 0.0  ;;  %v1113_v51 = vadd.f32 %v1112_v31, %v5102_v45  ;;  %1627 = vrot.lane.b32.xlu0 %v5270_v29, %s4248_s2  ;;  %v5276_v36 = vmax.f32 %v1210_v14, %v1354_v58 }
 0x1c9   :  { %v1116_v41 = vpop.f32.mrf.mxu0 }
 0x1ca   :  { %v1355_v44 = vrot.slane %v1213_v39, 1  ;;  %v1214_v40 = vmax.f32 %v1113_v51, 0.0  ;;  %v5279_v46 = vadd.f32 %v1116_v41, %v5100_v4  ;;  %1629 = vrot.lane.b32.xlu1 %v5276_v36, %s4248_s2 }
 0x1cb   :  { %v1118_v13 = vpop.f32.mrf.mxu0 }
 0x1cc   :  { %v1356_v0 = vsel %vm161_vm1, %v1351_v38, %v1355_v44  ;;  %v1357_v54 = vrot.slane %v1214_v40, 1  ;;  %v6466_v16 = vmax.f32 %v5279_v46, 0.0  ;;  %v5286_v63 = vadd.f32 %v1118_v13, %v5102_v45 }
 0x1cd   :  { %v5288_v56 = vmax.f32 %v1211_v20, %v1356_v0 }
 0x1ce   :  { %v1358_v34 = vsel %vm161_vm1, %v1353_v59, %v1357_v54  ;;  %v5293_v47 = vrot.slane %v6466_v16, 1  ;;  %v6465_v62 = vmax.f32 %v5286_v63, 0.0  ;;  %v5296_v55 = vpop.f32.mrf.mxu0 }
 0x1cf   :  { %1631 = vrot.lane.b32.xlu0 %v5288_v56, %s4248_s2  ;;  %v5300_v14 = vmax.f32 %v1212_v11, %v1358_v34 }
 0x1d0   :  { %v1360_v6 = vsel %vm161_vm1, %v1355_v44, %v5293_v47  ;;  %v5306_v19 = vrot.slane %v6465_v62, 1  ;;  %v5308_v50 = vpop.f32.mrf.mxu0 }
 0x1d1   :  { %1633 = vrot.lane.b32.xlu1 %v5300_v14, %s4248_s2  ;;  %v5312_v20 = vmax.f32 %v1213_v39, %v1360_v6 }
 0x1d2   :  { %v1362_v7 = vsel %vm161_vm1, %v1357_v54, %v5306_v19  ;;  %v5316_v10 = vpop.f32.mrf.mxu0 }
 0x1d3   :  { %6502 = vst [vmem:[#allocation18_spill] sm:$0xff] %v5312_v20  ;;  %1575 = vrot.lane.b32.xlu0 %v5119_v42, %s4248_s2  ;;  %v5320_v38 = vmax.f32 %v1214_v40, %v1362_v7 }
 0x1d4   :  { %v5324_v11 = vpop.f32.mrf.mxu0 }
 0x1d5   :  { %6503 = vst [vmem:[#allocation19_spill] sm:$0xff] %v5320_v38  ;;  %1577 = vrot.lane.b32.xlu1 %v5122_v18, %s4248_s2 }
 0x1d7   :  { %1571 = vrot.lane.b32.xlu0 %v5111_v22, %s4248_s2 }
 0x1d9   :  { %v5328_v12 = vpop.f32.mrf.mxu0  ;;  %1573 = vrot.lane.b32.xlu1 %v5115_v2, %s4248_s2 }
 0x1db   :  { %v5332_v59 = vpop.f32.mrf.mxu0 }
 0x1dd   :  { %v1140_v26 = vpop.f32.mrf.mxu0 }
 0x1de   :  { %v1141_v61 = vadd.f32 %v1140_v26, %v5100_v4 }
 0x1df   :  { %v1142_v30 = vpop.f32.mrf.mxu0 }
 0x1e0   :  { %v1143_v31 = vadd.f32 %v1142_v30, %v5102_v45  ;;  %v1223_v39 = vmax.f32 %v1141_v61, 0.0 }
 0x1e2   :  { %v1146_v58 = vpop.f32.mrf.mxu0  ;;  %v1224_v41 = vmax.f32 %v1143_v31, 0.0  ;;  %v5338_v54 = vrot.slane %v1223_v39, 1 }
 0x1e3   :  { %v1147_v51 = vadd.f32 %v1146_v58, %v5100_v4 }
 0x1e4   :  { %v1148_v44 = vpop.f32.mrf.mxu0  ;;  %v5341_v26 = vrot.slane %v1224_v41, 1 }
 0x1e5   :  { %v1225_v40 = vmax.f32 %v1147_v51, 0.0  ;;  %v1149_v13 = vadd.f32 %v1148_v44, %v5102_v45 }
 0x1e6   :  { %v1152_v0 = vpop.f32.mrf.mxu0 }
 0x1e7   :  { %v1379_v34 = vrot.slane %v1225_v40, 1  ;;  %v1226_v6 = vmax.f32 %v1149_v13, 0.0  ;;  %v1153_v7 = vadd.f32 %v1152_v0, %v5100_v4 }
 0x1e8   :  { %v1154_v62 = vpop.f32.mrf.mxu0 }
 0x1e9   :  { %v1380_v61 = vsel %vm161_vm1, %v5338_v54, %v1379_v34  ;;  %v1381_v30 = vrot.slane %v1226_v6, 1  ;;  %v1227_v58 = vmax.f32 %v1153_v7, 0.0  ;;  %v1155_v31 = vadd.f32 %v1154_v62, %v5102_v45 }
 0x1ea   :  { %v5346_v51 = vmax.f32 %v1223_v39, %v1380_v61 }
 0x1eb   :  { %v1382_v44 = vsel %vm161_vm1, %v5341_v26, %v1381_v30  ;;  %v1383_v16 = vrot.slane %v1227_v58, 1  ;;  %v1228_v22 = vmax.f32 %v1155_v31, 0.0 }
 0x1ec   :  { %6504 = vst [vmem:[#allocation20_spill] sm:$0xff] %v5346_v51  ;;  %1655 = vrot.lane.b32.xlu0 %v5346_v51, %s4248_s2  ;;  %v5352_v13 = vmax.f32 %v1224_v41, %v1382_v44 }
 0x1ed   :  { %v1384_v0 = vsel %vm161_vm1, %v1379_v34, %v1383_v16  ;;  %v1385_v2 = vrot.slane %v1228_v22, 1  ;;  %v1158_v42 = vpop.f32.mrf.mxu0 }
 0x1ee   :  { %6505 = vst [vmem:[#allocation21_spill] sm:$0xff] %v5352_v13  ;;  %v1159_v7 = vadd.f32 %v1158_v42, %v5100_v4  ;;  %1657 = vrot.lane.b32.xlu1 %v5352_v13, %s4248_s2  ;;  %v5358_v62 = vmax.f32 %v1225_v40, %v1384_v0 }
 0x1ef   :  { %v1386_v39 = vsel %vm161_vm1, %v1381_v30, %v1385_v2  ;;  %v1160_v61 = vpop.f32.mrf.mxu0 }
 0x1f0   :  { %6506 = vst [vmem:[#allocation22_spill] sm:$0xff] %v5358_v62  ;;  %v1229_v31 = vmax.f32 %v1159_v7, 0.0  ;;  %v1161_v18 = vadd.f32 %v1160_v61, %v5102_v45  ;;  %1659 = vrot.lane.b32.xlu0 %v5358_v62, %s4248_s2  ;;  %v5364_v41 = vmax.f32 %v1226_v6, %v1386_v39 }
 0x1f1   :  { %v1164_v34 = vpop.f32.mrf.mxu0 }
 0x1f2   :  { %6507 = vst [vmem:[#allocation23_spill] sm:$0xff] %v5364_v41  ;;  %v1387_v44 = vrot.slane %v1229_v31, 1  ;;  %v1230_v51 = vmax.f32 %v1161_v18, 0.0  ;;  %v1165_v42 = vadd.f32 %v1164_v34, %v5100_v4  ;;  %1661 = vrot.lane.b32.xlu1 %v5364_v41, %s4248_s2 }
 0x1f3   :  { %v1166_v40 = vpop.f32.mrf.mxu0 }
 0x1f4   :  { %v1388_v30 = vsel %vm161_vm1, %v1383_v16, %v1387_v44  ;;  %v1389_v0 = vrot.slane %v1230_v51, 1  ;;  %v1231_v7 = vmax.f32 %v1165_v42, 0.0  ;;  %v1167_v61 = vadd.f32 %v1166_v40, %v5102_v45 }
 0x1f5   :  { %v5371_v13 = vmax.f32 %v1227_v58, %v1388_v30 }
 0x1f6   :  { %v1390_v6 = vsel %vm161_vm1, %v1385_v2, %v1389_v0  ;;  %v1391_v39 = vrot.slane %v1231_v7, 1  ;;  %v1232_v62 = vmax.f32 %v1167_v61, 0.0  ;;  %v1170_v33 = vpop.f32.mrf.mxu0 }
 0x1f7   :  { %6508 = vst [vmem:[#allocation24_spill] sm:$0xff] %v5371_v13  ;;  %v1171_v18 = vadd.f32 %v1170_v33, %v5100_v4  ;;  %1663 = vrot.lane.b32.xlu0 %v5371_v13, %s4248_s2  ;;  %v5377_v34 = vmax.f32 %v1228_v22, %v1390_v6  ;;  %v1135_v6 = vadd.f32 %v5328_v12, %v5100_v4 }
 0x1f8   :  { %v1392_v16 = vsel %vm161_vm1, %v1387_v44, %v1391_v39  ;;  %v1393_v41 = vrot.slane %v1232_v62, 1  ;;  %v1172_v42 = vpop.f32.mrf.mxu0 }
 0x1f9   :  { %6509 = vst [vmem:[#allocation25_spill] sm:$0xff] %v5377_v34  ;;  %v1233_v37 = vmax.f32 %v1171_v18, 0.0  ;;  %v1173_v58 = vadd.f32 %v1172_v42, %v5102_v45  ;;  %1665 = vrot.lane.b32.xlu1 %v5377_v34, %s4248_s2  ;;  %v5383_v2 = vmax.f32 %v1229_v31, %v1392_v16 }
 0x1fa   :  { %v1394_v40 = vsel %vm161_vm1, %v1389_v0, %v1393_v41 }
 0x1fb   :  { %6510 = vst [vmem:[#allocation26_spill] sm:$0xff] %v5383_v2  ;;  %v1395_v33 = vrot.slane %v1233_v37, 1  ;;  %v1234_v30 = vmax.f32 %v1173_v58, 0.0  ;;  %v1176_v61 = vpop.f32.mrf.mxu0  ;;  %1667 = vrot.lane.b32.xlu0 %v5383_v2, %s4248_s2  ;;  %v5388_v22 = vmax.f32 %v1230_v51, %v1394_v40  ;;  %v1137_v51 = vadd.f32 %v5332_v59, %v5102_v45 }
 0x1fc   :  { %v1177_v44 = vadd.f32 %v1176_v61, %v5100_v4 }
 0x1fd   :  { %6511 = vst [vmem:[#allocation27_spill] sm:$0xff] %v5388_v22  ;;  %v1396_v18 = vsel %vm161_vm1, %v1391_v39, %v1395_v33  ;;  %v1397_v42 = vrot.slane %v1234_v30, 1  ;;  %v1178_v31 = vpop.f32.mrf.mxu0  ;;  %1669 = vrot.lane.b32.xlu1 %v5388_v22, %s4248_s2 }
 0x1fe   :  { %v1235_v0 = vmax.f32 %v1177_v44, 0.0  ;;  %v1179_v16 = vadd.f32 %v1178_v31, %v5102_v45  ;;  %v5397_v58 = vmax.f32 %v1231_v7, %v1396_v18  ;;  %v1129_v44 = vadd.f32 %v5316_v10, %v5100_v4 }
 0x1ff   :  { %v1398_v40 = vsel %vm161_vm1, %v1393_v41, %v1397_v42  ;;  %v1580_v13 = vpop.permute.xlu0 %1579  ;;  %v1221_v7 = vmax.f32 %v1135_v6, 0.0  ;;  %v1131_v31 = vadd.f32 %v5324_v11, %v5102_v45  ;;  %v1123_v10 = vadd.f32 %v5296_v55, %v5100_v4 }
 0x200   :  { %6512 = vst [vmem:[#allocation28_spill] sm:$0xff] %v5397_v58  ;;  %v1399_v61 = vrot.slane %v1235_v0, 1  ;;  %v1236_v12 = vmax.f32 %v1179_v16, 0.0  ;;  %1671 = vrot.lane.b32.xlu0 %v5397_v58, %s4248_s2  ;;  %v5406_v34 = vmax.f32 %v1232_v62, %v1398_v40  ;;  %v1222_v16 = vmax.f32 %v1137_v51, 0.0 }
 0x201   :  { %v5402_v39 = vpop.permute.xlu1 %1581  ;;  %v1371_v6 = vrot.slane %v1221_v7, 1  ;;  %v1220_v51 = vmax.f32 %v1131_v31, 0.0 }
 0x202   :  { %6513 = vst [vmem:[#allocation29_spill] sm:$0xff] %v5406_v34  ;;  %v5412_v18 = vsel %vm1683_vm9, %v1580_v13, %v5402_v39  ;;  %v5414_v59 = vmax.f32 %v1235_v0, %v1399_v61  ;;  %v1401_v41 = vrot.slane %v1236_v12, 1  ;;  %1673 = vrot.lane.b32.xlu1 %v5406_v34, %s4248_s2  ;;  %v1400_v62 = vsel %vm161_vm1, %v1395_v33, %v1399_v61 }
 0x203   :  { %v1219_v13 = vmax.f32 %v1129_v44, 0.0  ;;  %v5430_v11 = vmax.f32 %v1233_v37, %v1400_v62  ;;  %v1125_v33 = vadd.f32 %v5308_v50, %v5102_v45  ;;  %v1373_v61 = vrot.slane %v1222_v16, 1 }
 0x204   :  { %6514 = vst [vmem:[#allocation30_spill] sm:$0xff] %v5414_v59  ;;  %v5421_v40 = vmax.f32 %v1236_v12, %v1401_v41  ;;  %1679 = vrot.lane.b32.xlu0 %v5414_v59, %s4248_s2  ;;  %v1402_v0 = vsel %vm161_vm1, %v1397_v42, %v1401_v41  ;;  %v1376_v12 = vsel %vm161_vm1, %v1371_v6, %v5338_v54  ;;  %v1217_v37 = vmax.f32 %v1123_v10, 0.0 }
 0x205   :  { %v1584_v2 = vpop.permute.xlu0 %1583  ;;  %6515 = vst [vmem:[#allocation31_spill] sm:$0xff] %v5430_v11  ;;  %v5444_v55 = vmax.f32 %v1234_v30, %v1402_v0  ;;  %v1367_v42 = vrot.slane %v1219_v13, 1  ;;  %v1378_v45 = vsel %vm161_vm1, %v1373_v61, %v5341_v26  ;;  %v5450_v54 = vmax.f32 %v1221_v7, %v1376_v12 }
 0x206   :  { %1681 = vrot.lane.b32.xlu1 %v5421_v40, %s4248_s2  ;;  %v1218_v44 = vmax.f32 %v1125_v33, 0.0  ;;  %v1369_v41 = vrot.slane %v1220_v51, 1  ;;  %v5461_v26 = vmax.f32 %v1222_v16, %v1378_v45  ;;  %v1363_v62 = vrot.slane %v1217_v37, 1 }
 0x207   :  { %v5436_v22 = vpop.permute.xlu1 %1585  ;;  %6516 = vst [vmem:[#allocation32_spill] sm:$0xff] %v5444_v55  ;;  %6517 = vst [vmem:[#allocation33_spill] sm:$0xff] %v5450_v54 }
 0x208   :  { %v5440_v4 = vsel %vm1683_vm9, %v1584_v2, %v5436_v22  ;;  %1675 = vrot.lane.b32.xlu0 %v5430_v11, %s4248_s2  ;;  %v1372_v2 = vsel %vm161_vm1, %v1367_v42, %v1371_v6  ;;  %6518 = vst [vmem:[#allocation34_spill] sm:$0xff] %v5461_v26  ;;  %v1374_v10 = vsel %vm161_vm1, %v1369_v41, %v1373_v61  ;;  %v1365_v6 = vrot.slane %v1218_v44, 1 }
 0x209   :  { %v1588_v50 = vpop.permute.xlu0 %1587  ;;  %v5466_v7 = vmax.f32 %v1219_v13, %v1372_v2  ;;  %v1368_v0 = vsel %vm161_vm1, %v1363_v62, %v1367_v42  ;;  %v5473_v12 = vmax.f32 %v1220_v51, %v1374_v10  ;;  %v1364_v13 = vsel %vm161_vm1, %v5293_v47, %v1363_v62  ;;  %v1825_v42 = vld [vmem:[#allocation2 + $0x8] sm:$0xff] }
 0x20a   :  { %1677 = vrot.lane.b32.xlu1 %v5444_v55, %s4248_s2  ;;  %v1370_v16 = vsel %vm161_vm1, %v1365_v6, %v1369_v41  ;;  %v5480_v61 = vmax.f32 %v1217_v37, %v1368_v0  ;;  %3498 = vmatprep.mubr.msk.f32.mxu1 %vm1848_vm10, %v1825_v42  ;;  %v1366_v51 = vsel %vm161_vm1, %v5306_v19, %v1365_v6  ;;  %v6523_v37 = vmax.f32 %v5279_v46, 0.0 }
 0x20b   :  { %v5453_v31 = vpop.permute.xlu1 %1589  ;;  %6519 = vst [vmem:[#allocation35_spill] sm:$0xff] %v5466_v7  ;;  %6520 = vst [vmem:[#allocation36_spill] sm:$0xff] %v5473_v12 }
 0x20c   :  { %v5457_v30 = vsel %vm1683_vm9, %v1588_v50, %v5453_v31  ;;  %1651 = vrot.lane.b32.xlu0 %v5450_v54, %s4248_s2  ;;  %6521 = vst [vmem:[#allocation37_spill] sm:$0xff] %v5480_v61  ;;  %v5486_v50 = vmax.f32 %v1218_v44, %v1370_v16  ;;  %v5497_v47 = vmax.f32 %v6523_v37, %v1364_v13  ;;  %v6525_v44 = vmax.f32 %v5286_v63, 0.0 }
 0x20e   :  { %1653 = vrot.lane.b32.xlu1 %v5461_v26, %s4248_s2  ;;  %v5469_v33 = vpop.permute.xlu0 %1591  ;;  %6522 = vst [vmem:[#allocation38_spill] sm:$0xff] %v5486_v50  ;;  %6524 = vst [vmem:[#allocation39_spill] sm:$0xff] %v5497_v47  ;;  %v5505_v62 = vmax.f32 %v6525_v44, %v1366_v51 }
 0x210   :  { %1647 = vrot.lane.b32.xlu0 %v5466_v7, %s4248_s2  ;;  %v5476_v45 = vpop.permute.xlu1 %1593  ;;  %6526 = vst [vmem:[#allocation40_spill] sm:$0xff] %v5505_v62 }
 0x212   :  { %1649 = vrot.lane.b32.xlu1 %v5473_v12, %s4248_s2  ;;  %v5491_v41 = vpop.permute.xlu0 %1595 }
 0x214   :  { %1643 = vrot.lane.b32.xlu0 %v5480_v61, %s4248_s2  ;;  %v5499_v2 = vpop.permute.xlu1 %1597 }
 0x216   :  { %1645 = vrot.lane.b32.xlu1 %v5486_v50, %s4248_s2 }
 0x218   :  { %1639 = vrot.lane.b32.xlu0 %v5497_v47, %s4248_s2 }
 0x219   :  { %v1600_v10 = vpop.permute.xlu0 %1599 }
 0x21a   :  { %1641 = vrot.lane.b32.xlu1 %v5505_v62, %s4248_s2 }
 0x21b   :  { %v5509_v19 = vpop.permute.xlu1 %1601 }
 0x21c   :  { %1635 = vrot.lane.b32.xlu0 %v5312_v20, %s4248_s2 }
 0x21d   :  { %v1604_v46 = vpop.permute.xlu0 %1603 }
 0x21e   :  { %1637 = vrot.lane.b32.xlu1 %v5320_v38, %s4248_s2 }
 0x21f   :  { %v1606_v6 = vpop.permute.xlu1 %1605 }
 0x222   :  { %v1608_v0 = vpop.permute.xlu0 %1607 }
 0x224   :  { %v1610_v16 = vpop.permute.xlu1 %1609 }
 0x226   :  { %v1612_v13 = vpop.permute.xlu0 %1611 }
 0x228   :  { %v1614_v63 = vpop.permute.xlu1 %1613 }
 0x22d   :  { %v1616_v42 = vpop.permute.xlu0 %1615 }
 0x22f   :  { %v1618_v51 = vpop.permute.xlu1 %1617 }
 0x231   :  { %v1620_v37 = vpop.permute.xlu0 %1619 }
 0x233   :  { %v1622_v44 = vpop.permute.xlu1 %1621 }
 0x234   :  { %v1696_v55 = vsel %vm1683_vm9, %v1620_v37, %v1622_v44 }
 0x236   :  { %v1624_v47 = vpop.permute.xlu0 %1623 }
 0x238   :  { %v1626_v62 = vpop.permute.xlu1 %1625 }
 0x239   :  { %v1697_v58 = vsel %vm1683_vm9, %v1624_v47, %v1626_v62  ;;  %v1795_v59 = vmax.f32 %v5264_v23, %v1626_v62  ;;  %v1693_v23 = vsel %vm1683_vm9, %v1608_v0, %v1610_v16 }
 0x23a   :  { %v1628_v61 = vpop.permute.xlu0 %1627 }
 0x23c   :  { %v1630_v50 = vpop.permute.xlu1 %1629 }
 0x23d   :  { %v1698_v20 = vsel %vm1683_vm9, %v1628_v61, %v1630_v50  ;;  %v1797_v34 = vmax.f32 %v5276_v36, %v1630_v50  ;;  %v1794_v61 = vmax.f32 %v5259_v24, %v1697_v58  ;;  %v1694_v36 = vsel %vm1683_vm9, %v1612_v13, %v1614_v63  ;;  %v6531_v50 = vld [vmem:[#allocation13_spill] sm:$0xff] }
 0x23e   :  { %v1796_v11 = vmax.f32 %v5270_v29, %v1698_v20  ;;  %v1791_v29 = vmax.f32 %v5241_v49, %v1618_v51  ;;  %v1789_v24 = vmax.f32 %v5228_v27, %v1614_v63  ;;  %v1785_v49 = vmax.f32 %v5205_v5, %v1606_v6 }
 0x23f   :  { %v1689_v5 = vsel %vm1683_vm9, %v5469_v33, %v5476_v45 }
 0x241   :  { %v1632_v7 = vpop.permute.xlu0 %1631 }
 0x243   :  { %v1634_v12 = vpop.permute.xlu1 %1633 }
 0x244   :  { %v1699_v54 = vsel %vm1683_vm9, %v1632_v7, %v1634_v12  ;;  %v1799_v38 = vmax.f32 %v5300_v14, %v1634_v12  ;;  %v1695_v14 = vsel %vm1683_vm9, %v1616_v42, %v1618_v51  ;;  %v6529_v12 = vld [vmem:[#allocation15_spill] sm:$0xff]  ;;  %v6533_v51 = vld [vmem:[#allocation30_spill] sm:$0xff] }
 0x245   :  { %v1798_v26 = vmax.f32 %v5288_v56, %v1699_v54  ;;  %v1793_v56 = vmax.f32 %v5253_v15, %v1622_v44  ;;  %v1792_v54 = vmax.f32 %v5247_v57, %v1696_v55  ;;  %v1790_v20 = vmax.f32 %v5235_v35, %v1695_v14  ;;  %v1576_v58 = vpop.permute.xlu0 %1575 }
 0x246   :  { %1892 = vmatprep.subr.mxu1 %v1799_v38  ;;  %v1788_v38 = vmax.f32 %v5222_v25, %v1694_v36  ;;  %v1692_v15 = vsel %vm1683_vm9, %v1604_v46, %v1606_v6  ;;  %v1787_v57 = vmax.f32 %v5216_v32, %v1610_v16  ;;  %v1691_v35 = vsel %vm1683_vm9, %v1600_v10, %v5509_v19 }
 0x247   :  { %1893 = vmatpush1.msra.mxu1 %v1798_v26  ;;  %v1784_v27 = vmax.f32 %v5199_v8, %v1692_v15  ;;  %v1690_v25 = vsel %vm1683_vm9, %v5491_v41, %v5499_v2  ;;  %v1783_v32 = vmax.f32 %v5193_v1, %v5509_v19  ;;  %v1781_v8 = vmax.f32 %v5180_v28, %v5499_v2  ;;  %v6532_v41 = vld [vmem:[#allocation12_spill] sm:$0xff] }
 0x248   :  { %1894 = vmatprep.subr.mxu1 %v1797_v34  ;;  %v1786_v34 = vmax.f32 %v5211_v9, %v1693_v23  ;;  %v1782_v9 = vmax.f32 %v5187_v43, %v1691_v35  ;;  %v1779_v1 = vmax.f32 %v5168_v21, %v5476_v45  ;;  %v1778_v43 = vmax.f32 %v5163_v60, %v1689_v5  ;;  %v6527_v60 = vld [vmem:[#allocation17_spill] sm:$0xff]  ;;  %v6537_v15 = vld [vmem:[#allocation28_spill] sm:$0xff] }
 0x249   :  { %1895 = vmatpush1.msra.mxu1 %v1796_v11  ;;  %v1578_v11 = vpop.permute.xlu1 %1577  ;;  %v1777_v55 = vmax.f32 %v5157_v17, %v5453_v31  ;;  %v1776_v26 = vmax.f32 %v5151_v3, %v5457_v30  ;;  %v1572_v28 = vpop.permute.xlu0 %1571  ;;  %v1774_v21 = vmax.f32 %v5139_v53, %v5440_v4  ;;  %v1773_v33 = vmax.f32 %v6527_v60, %v5402_v39  ;;  %v6528_v31 = vld [vmem:[#allocation16_spill] sm:$0xff]  ;;  %v6540_v5 = vld [vmem:[#allocation25_spill] sm:$0xff] }
 0x24a   :  { %1896 = vmatprep.subr.mxu1 %v1795_v59  ;;  %v1780_v59 = vmax.f32 %v5174_v48, %v1690_v25  ;;  %v1775_v48 = vmax.f32 %v5145_v52, %v5436_v22  ;;  %v1685_v17 = vsel %vm1683_vm9, %v1576_v58, %v1578_v11  ;;  %v1772_v3 = vmax.f32 %v6528_v31, %v5412_v18  ;;  %v6530_v22 = vld [vmem:[#allocation14_spill] sm:$0xff] }
 0x24b   :  { %1897 = vmatpush1.msra.mxu1 %v1794_v61  ;;  %v1771_v45 = vmax.f32 %v6529_v12, %v1578_v11  ;;  %v1770_v53 = vmax.f32 %v6530_v22, %v1685_v17  ;;  %v6539_v25 = vld [vmem:[#allocation26_spill] sm:$0xff]  ;;  %v6545_v17 = vld [vmem:[#allocation20_spill] sm:$0xff] }
 0x24c   :  { %1898 = vmatprep.subr.mxu1 %v1793_v56  ;;  %v6546_v12 = vld [vmem:[#allocation34_spill] sm:$0xff] }
 0x24d   :  { %1899 = vmatpush1.msra.mxu1 %v1792_v54  ;;  %v1574_v7 = vpop.permute.xlu1 %1573  ;;  %v6534_v54 = vld [vmem:[#allocation32_spill] sm:$0xff] }
 0x24e   :  { %1900 = vmatprep.subr.mxu1 %v1791_v29  ;;  %v1684_v52 = vsel %vm1683_vm9, %v1572_v28, %v1574_v7  ;;  %v1769_v39 = vmax.f32 %v6531_v50, %v1574_v7  ;;  %v6535_v29 = vld [vmem:[#allocation31_spill] sm:$0xff]  ;;  %v6543_v28 = vld [vmem:[#allocation22_spill] sm:$0xff]  ;;  %v6544_v7 = vld [vmem:[#allocation21_spill] sm:$0xff] }
 0x24f   :  { %1901 = vmatpush1.msra.mxu1 %v1790_v20  ;;  %v1768_v47 = vmax.f32 %v6532_v41, %v1684_v52  ;;  %v6547_v52 = vld [vmem:[#allocation33_spill] sm:$0xff]  ;;  %v6548_v50 = vld [vmem:[#allocation36_spill] sm:$0xff]  ;;  %v6549_v41 = vld [vmem:[#allocation35_spill] sm:$0xff] }
 0x250   :  { %1902 = vmatprep.subr.mxu1 %v1789_v24 }
 0x251   :  { %1903 = vmatpush1.msra.mxu1 %v1788_v38 }
 0x252   :  { %1904 = vmatprep.subr.mxu1 %v1787_v57 }
 0x253   :  { %1905 = vmatpush1.msra.mxu1 %v1786_v34 }
 0x254   :  { %1906 = vmatprep.subr.mxu1 %v1785_v49  ;;  %v6538_v49 = vld [vmem:[#allocation27_spill] sm:$0xff] }
 0x255   :  { %1907 = vmatpush1.msra.mxu1 %v1784_v27 }
 0x256   :  { %1908 = vmatprep.subr.mxu1 %v1783_v32 }
 0x257   :  { %1909 = vmatpush1.msra.mxu1 %v1782_v9 }
 0x258   :  { %1910 = vmatprep.subr.mxu1 %v1781_v8 }
 0x259   :  { %1911 = vmatpush1.msra.mxu1 %v1780_v59  ;;  %v6541_v59 = vld [vmem:[#allocation24_spill] sm:$0xff] }
 0x25a   :  { %1912 = vmatprep.subr.mxu1 %v1779_v1 }
 0x25b   :  { %1913 = vmatpush1.msra.mxu1 %v1778_v43 }
 0x25c   :  { %1914 = vmatprep.subr.mxu1 %v1777_v55  ;;  %v6542_v55 = vld [vmem:[#allocation23_spill] sm:$0xff] }
 0x25d   :  { %1915 = vmatpush1.msra.mxu1 %v1776_v26 }
 0x25e   :  { %1916 = vmatprep.subr.mxu1 %v1775_v48  ;;  %v1656_v30 = vpop.permute.xlu0 %1655 }
 0x25f   :  { %1917 = vmatpush1.msra.mxu1 %v1774_v21 }
 0x260   :  { %1918 = vmatprep.subr.mxu1 %v1773_v33  ;;  %v5572_v4 = vpop.permute.xlu1 %1657 }
 0x261   :  { %1919 = vmatpush1.msra.mxu1 %v1772_v3  ;;  %v1705_v43 = vsel %vm1683_vm9, %v1656_v30, %v5572_v4  ;;  %v1811_v60 = vmax.f32 %v6544_v7, %v5572_v4  ;;  %v1841_v7 = vld [vmem:[#allocation2 + $0x88] sm:$0xff] }
 0x262   :  { %1920 = vmatprep.subr.mxu1 %v1771_v45  ;;  %v1660_v18 = vpop.permute.xlu0 %1659  ;;  %v1810_v31 = vmax.f32 %v6545_v17, %v1705_v43  ;;  %v2033_v43 = vld [vmem:[%s6453_s4 + $0x20] sm:$0xff] }
 0x263   :  { %1921 = vmatpush1.msra.mxu1 %v1770_v53  ;;  %v1840_v17 = vld [vmem:[#allocation2 + $0x80] sm:$0xff] }
 0x264   :  { %1922 = vmatprep.subr.mxu1 %v1769_v39  ;;  %v1662_v2 = vpop.permute.xlu1 %1661 }
 0x265   :  { %1923 = vmatpush1.msra.mxu1 %v1768_v47  ;;  %v1706_v58 = vsel %vm1683_vm9, %v1660_v18, %v1662_v2  ;;  %v1813_v26 = vmax.f32 %v6542_v55, %v1662_v2  ;;  %v6550_v2 = vld [vmem:[#allocation38_spill] sm:$0xff]  ;;  %v1836_v55 = vld [vmem:[#allocation2 + $0x60] sm:$0xff] }
 0x266   :  { %v1812_v48 = vmax.f32 %v6543_v28, %v1706_v58  ;;  %v1835_v58 = vld [vmem:[#allocation2 + $0x58] sm:$0xff] }
 0x267   :  { %v2032_v28 = vld [vmem:[%s6453_s4 + $0x18] sm:$0xff] }
 0x269   :  { %v1664_v62 = vpop.permute.xlu0 %1663 }
 0x26b   :  { %v1666_v10 = vpop.permute.xlu1 %1665 }
 0x26c   :  { %v1707_v35 = vsel %vm1683_vm9, %v1664_v62, %v1666_v10  ;;  %v1815_v8 = vmax.f32 %v6540_v5, %v1666_v10  ;;  %v2036_v5 = vld [vmem:[%s6453_s4 + $0x38] sm:$0xff] }
 0x26d   :  { %v1668_v19 = vpop.permute.xlu0 %1667  ;;  %v1814_v11 = vmax.f32 %v6541_v59, %v1707_v35  ;;  %v2039_v35 = vld [vmem:[%s6453_s4 + $0x50] sm:$0xff] }
 0x26e   :  { %v1834_v59 = vld [vmem:[#allocation2 + $0x50] sm:$0xff] }
 0x26f   :  { %v1670_v46 = vpop.permute.xlu1 %1669 }
 0x270   :  { %v1708_v24 = vsel %vm1683_vm9, %v1668_v19, %v1670_v46  ;;  %v1817_v27 = vmax.f32 %v6538_v49, %v1670_v46  ;;  %v6551_v19 = vld [vmem:[#allocation37_spill] sm:$0xff]  ;;  %v1830_v49 = vld [vmem:[#allocation2 + $0x30] sm:$0xff] }
 0x271   :  { %v1816_v32 = vmax.f32 %v6539_v25, %v1708_v24  ;;  %v1829_v24 = vld [vmem:[#allocation2 + $0x28] sm:$0xff] }
 0x272   :  { %v1672_v6 = vpop.permute.xlu0 %1671  ;;  %v2038_v25 = vld [vmem:[%s6453_s4 + $0x48] sm:$0xff] }
 0x274   :  { %v1674_v0 = vpop.permute.xlu1 %1673 }
 0x275   :  { %v1709_v14 = vsel %vm1683_vm9, %v1672_v6, %v1674_v0  ;;  %v6552_v6 = vld [vmem:[#allocation40_spill] sm:$0xff] }
 0x276   :  { %v1680_v16 = vpop.permute.xlu0 %1679  ;;  %v1818_v57 = vmax.f32 %v6537_v15, %v1709_v14  ;;  %v1828_v15 = vld [vmem:[#allocation2 + $0x20] sm:$0xff] }
 0x278   :  { %v1682_v13 = vpop.permute.xlu1 %1681 }
 0x279   :  { %v1711_v63 = vsel %vm1683_vm9, %v1680_v16, %v1682_v13  ;;  %v1823_v42 = vmax.f32 %v5421_v40, %v1682_v13  ;;  %v6536_v40 = vld [vmem:[#allocation29_spill] sm:$0xff]  ;;  %v6553_v16 = vld [vmem:[#allocation39_spill] sm:$0xff] }
 0x27a   :  { %v1822_v37 = vmax.f32 %v6533_v51, %v1711_v63  ;;  %v1676_v44 = vpop.permute.xlu0 %1675  ;;  %v1819_v38 = vmax.f32 %v6536_v40, %v1674_v0  ;;  %v2042_v40 = vld [vmem:[%s6453_s4 + $0x68] sm:$0xff] }
 0x27b   :  { %3496 = vmatprep.subr.msk.mxu1 %vm1885_vm11, %v1823_v42 }
 0x27c   :  { %v1678_v61 = vpop.permute.xlu1 %1677  ;;  %3497 = vmatpush2.msk.msra.mxu1 %vm1885_vm11, %v1822_v37  ;;  %v6554_v37 = vld [vmem:[#allocation19_spill] sm:$0xff] }
 0x27d   :  { %v1710_v56 = vsel %vm1683_vm9, %v1676_v44, %v1678_v61  ;;  %v1821_v36 = vmax.f32 %v6534_v54, %v1678_v61  ;;  %v6555_v61 = vld [vmem:[#allocation18_spill] sm:$0xff]  ;;  %v1827_v54 = vld [vmem:[#allocation2 + $0x18] sm:$0xff] }
 0x27e   :  { %v1820_v20 = vmax.f32 %v6535_v29, %v1710_v56  ;;  %v1652_v23 = vpop.permute.xlu0 %1651  ;;  %v1824_v56 = vld [vmem:[#allocation2] sm:$0xff]  ;;  %v4249_v29 = vmov 0.0  }
 0x27f   :  { %1934 = vmatprep.subr.mxu1 %v1821_v36  ;;  %v2044_v36 = vld [vmem:[%s6453_s4 + $0x78] sm:$0xff] }
 0x280   :  { %v1654_v34 = vpop.permute.xlu1 %1653  ;;  %1935 = vmatpush2.msra.mxu1 %v1820_v20  ;;  %v2043_v20 = vld [vmem:[%s6453_s4 + $0x70] sm:$0xff] }
 0x281   :  { %1936 = vmatprep.subr.mxu1 %v1819_v38  ;;  %v1704_v33 = vsel %vm1683_vm9, %v1652_v23, %v1654_v34  ;;  %v1809_v45 = vmax.f32 %v6546_v12, %v1654_v34  ;;  %v1826_v23 = vld [vmem:[#allocation2 + $0x10] sm:$0xff]  ;;  %v2041_v38 = vld [vmem:[%s6453_s4 + $0x60] sm:$0xff]  ;;  %v2040_v34 = vld [vmem:[%s6453_s4 + $0x58] sm:$0xff] }
 0x282   :  { %1937 = vmatpush2.msra.mxu1 %v1818_v57  ;;  %v1648_v9 = vpop.permute.xlu0 %1647  ;;  %v1808_v22 = vmax.f32 %v6547_v52, %v1704_v33  ;;  %v1831_v57 = vld [vmem:[#allocation2 + $0x38] sm:$0xff]  ;;  %v2029_v33 = vld [vmem:[%s6453_s4] sm:$0xff]  ;;  %v2050_v12 = vld [vmem:[%s6453_s4 + $0xa8] sm:$0xff] }
 0x283   :  { %1938 = vmatprep.subr.mxu1 %v1817_v27  ;;  %v1833_v27 = vld [vmem:[#allocation2 + $0x48] sm:$0xff]  ;;  %v2049_v52 = vld [vmem:[%s6453_s4 + $0xa0] sm:$0xff] }
 0x284   :  { %v1650_v1 = vpop.permute.xlu1 %1649  ;;  %1939 = vmatpush2.msra.mxu1 %v1816_v32  ;;  %v2037_v32 = vld [vmem:[%s6453_s4 + $0x40] sm:$0xff] }
 0x285   :  { %1940 = vmatprep.subr.mxu1 %v1815_v8  ;;  %v1703_v30 = vsel %vm1683_vm9, %v1648_v9, %v1650_v1  ;;  %v1807_v39 = vmax.f32 %v6548_v50, %v1650_v1  ;;  %v1832_v9 = vld [vmem:[#allocation2 + $0x40] sm:$0xff]  ;;  %v2035_v8 = vld [vmem:[%s6453_s4 + $0x30] sm:$0xff]  ;;  %v2034_v1 = vld [vmem:[%s6453_s4 + $0x28] sm:$0xff] }
 0x286   :  { %1941 = vmatpush2.msra.mxu1 %v1814_v11  ;;  %v1644_v21 = vpop.permute.xlu0 %1643  ;;  %v1806_v47 = vmax.f32 %v6549_v41, %v1703_v30  ;;  %v1837_v11 = vld [vmem:[#allocation2 + $0x68] sm:$0xff]  ;;  %v1847_v50 = vld [vmem:[#allocation2 + $0xb8] sm:$0xff] }
 0x287   :  { %1942 = vmatprep.subr.mxu1 %v1813_v26  ;;  %v1839_v26 = vld [vmem:[#allocation2 + $0x78] sm:$0xff]  ;;  %v1845_v30 = vld [vmem:[#allocation2 + $0xa8] sm:$0xff] }
 0x288   :  { %v1646_v3 = vpop.permute.xlu1 %1645  ;;  %1943 = vmatpush2.msra.mxu1 %v1812_v48  ;;  %v2031_v48 = vld [vmem:[%s6453_s4 + $0x10] sm:$0xff]  ;;  %v2046_v41 = vld [vmem:[%s6453_s4 + $0x88] sm:$0xff] }
 0x289   :  { %1944 = vmatprep.subr.mxu1 %v1811_v60  ;;  %v1702_v4 = vsel %vm1683_vm9, %v1644_v21, %v1646_v3  ;;  %v1805_v62 = vmax.f32 %v6550_v2, %v1646_v3  ;;  %v1838_v21 = vld [vmem:[#allocation2 + $0x70] sm:$0xff]  ;;  %v2030_v60 = vld [vmem:[%s6453_s4 + $0x8] sm:$0xff] }
 0x28a   :  { %1945 = vmatpush2.msra.mxu1 %v1810_v31  ;;  %v1640_v53 = vpop.permute.xlu0 %1639  ;;  %v1804_v46 = vmax.f32 %v6551_v19, %v1702_v4  ;;  %v1843_v31 = vld [vmem:[#allocation2 + $0x98] sm:$0xff]  ;;  %v2051_v3 = vld [vmem:[%s6453_s4 + $0xb0] sm:$0xff] }
 0x28b   :  { %1946 = vmatprep.subr.mxu1 %v1809_v45  ;;  %v1842_v45 = vld [vmem:[#allocation2 + $0x90] sm:$0xff] }
 0x28c   :  { %v1642_v18 = vpop.permute.xlu1 %1641  ;;  %1947 = vmatpush2.msra.mxu1 %v1808_v22  ;;  %v2048_v22 = vld [vmem:[%s6453_s4 + $0x98] sm:$0xff]  ;;  %v1846_v4 = vld [vmem:[#allocation2 + $0xb0] sm:$0xff] }
 0x28d   :  { %v1701_v10 = vsel %vm1683_vm9, %v1640_v53, %v1642_v18  ;;  %1948 = vmatprep.subr.mxu1 %v1807_v39  ;;  %v1803_v0 = vmax.f32 %v6552_v6, %v1642_v18  ;;  %v1844_v53 = vld [vmem:[#allocation2 + $0xa0] sm:$0xff]  ;;  %v2047_v39 = vld [vmem:[%s6453_s4 + $0x90] sm:$0xff] }
 0x28e   :  { %1949 = vmatpush2.msra.mxu1 %v1806_v47  ;;  %v1802_v13 = vmax.f32 %v6553_v16, %v1701_v10  ;;  %v1636_v63 = vpop.permute.xlu0 %1635  ;;  %v2045_v47 = vld [vmem:[%s6453_s4 + $0x80] sm:$0xff] }
 0x28f   :  { %1950 = vmatprep.subr.mxu1 %v1805_v62 }
 0x290   :  { %v1638_v42 = vpop.permute.xlu1 %1637  ;;  %1951 = vmatpush2.msra.mxu1 %v1804_v46 }
 0x291   :  { %v1700_v51 = vsel %vm1683_vm9, %v1636_v63, %v1638_v42  ;;  %v1801_v44 = vmax.f32 %v6554_v37, %v1638_v42  ;;  %1952 = vmatprep.subr.mxu1 %v1803_v0 }
 0x292   :  { %v1800_v14 = vmax.f32 %v6555_v61, %v1700_v51  ;;  %1953 = vmatpush2.msra.mxu1 %v1802_v13 }
 0x293   :  { %1954 = vmatprep.subr.mxu1 %v1801_v44 }
 0x294   :  { %1955 = vmatpush2.msra.mxu1 %v1800_v14 }
 0x295   :  { %1957 = vmatmul.mubr.f32.vlgmr.msra.gmra.mxu1 %v1824_v56  ;;  %2088 = vmatprep.subr.mxu1 %v4249_v29 }
 0x296   :  { %3499 = vmatprep.mubr.msk.f32.mxu1 %vm1848_vm10, %v1827_v54  ;;  %2089 = vmatpush1.msra.mxu1 %v2044_v36 }
 0x297   :  { %2090 = vmatprep.subr.mxu1 %v4249_v29 }
 0x298   :  { %2091 = vmatpush1.msra.mxu1 %v2043_v20 }
 0x299   :  { %1963 = vmatmul.mubr.f32.gmra.mxu1 %v1826_v23  ;;  %2092 = vmatprep.subr.mxu1 %v4249_v29 }
 0x29a   :  { %3500 = vmatprep.mubr.msk.f32.mxu1 %vm1848_vm10, %v1829_v24  ;;  %2093 = vmatpush1.msra.mxu1 %v2042_v40 }
 0x29b   :  { %2094 = vmatprep.subr.mxu1 %v4249_v29 }
 0x29c   :  { %2095 = vmatpush1.msra.mxu1 %v2041_v38  ;;  %v2495_v38 = vld [vmem:[%s6454_s5 + $0xf8] sm:$0xff] }
 0x29d   :  { %1969 = vmatmul.mubr.f32.gmra.mxu1 %v1828_v15  ;;  %2096 = vmatprep.subr.mxu1 %v4249_v29  ;;  %v2479_v15 = vld [vmem:[%s6454_s5 + $0x78] sm:$0xff] }
 0x29e   :  { %3501 = vmatprep.mubr.msk.f32.mxu1 %vm1848_vm10, %v1831_v57  ;;  %2097 = vmatpush1.msra.mxu1 %v2040_v34  ;;  %v2494_v57 = vld [vmem:[%s6454_s5 + $0xf0] sm:$0xff] }
 0x29f   :  { %2098 = vmatprep.subr.mxu1 %v4249_v29  ;;  %3547 = vmatprep.subr.mxu0 %v2495_v38  ;;  %v2478_v34 = vld [vmem:[%s6454_s5 + $0x70] sm:$0xff] }
 0x2a0   :  { %2099 = vmatpush1.msra.mxu1 %v2039_v35  ;;  %3548 = vmatpush3.msra.mxu0 %v2479_v15  ;;  %v2493_v35 = vld [vmem:[%s6454_s5 + $0xe8] sm:$0xff] }
 0x2a1   :  { %1975 = vmatmul.mubr.f32.gmra.mxu1 %v1830_v49  ;;  %2100 = vmatprep.subr.mxu1 %v4249_v29  ;;  %v2477_v49 = vld [vmem:[%s6454_s5 + $0x68] sm:$0xff] }
 0x2a2   :  { %3502 = vmatprep.mubr.msk.f32.mxu1 %vm1848_vm10, %v1833_v27  ;;  %2101 = vmatpush1.msra.mxu1 %v2038_v25  ;;  %v2492_v27 = vld [vmem:[%s6454_s5 + $0xe0] sm:$0xff] }
 0x2a3   :  { %2102 = vmatprep.subr.mxu1 %v4249_v29  ;;  %3549 = vmatprep.subr.mxu0 %v2494_v57  ;;  %v2476_v25 = vld [vmem:[%s6454_s5 + $0x60] sm:$0xff] }
 0x2a4   :  { %2103 = vmatpush1.msra.mxu1 %v2037_v32  ;;  %3550 = vmatpush3.msra.mxu0 %v2478_v34  ;;  %v2491_v32 = vld [vmem:[%s6454_s5 + $0xd8] sm:$0xff]  ;;  %v2512_v57 = vld [vmem:[%s6454_s5 + $0x180] sm:$0xff] }
 0x2a5   :  { %1981 = vmatmul.mubr.f32.gmra.mxu1 %v1832_v9  ;;  %2104 = vmatprep.subr.mxu1 %v4249_v29  ;;  %v2475_v9 = vld [vmem:[%s6454_s5 + $0x58] sm:$0xff] }
 0x2a6   :  { %3503 = vmatprep.mubr.msk.f32.mxu1 %vm1848_vm10, %v1835_v58  ;;  %2105 = vmatpush1.msra.mxu1 %v2036_v5  ;;  %v2490_v58 = vld [vmem:[%s6454_s5 + $0xd0] sm:$0xff]  ;;  %v2511_v5 = vld [vmem:[%s6454_s5 + $0x178] sm:$0xff] }
 0x2a7   :  { %2106 = vmatprep.subr.mxu1 %v4249_v29  ;;  %3551 = vmatprep.subr.mxu0 %v2493_v35 }
 0x2a8   :  { %2107 = vmatpush1.msra.mxu1 %v2035_v8  ;;  %3552 = vmatpush3.msra.mxu0 %v2477_v49  ;;  %v2510_v8 = vld [vmem:[%s6454_s5 + $0x170] sm:$0xff] }
 0x2a9   :  { %1987 = vmatmul.mubr.f32.gmra.mxu1 %v1834_v59  ;;  %2108 = vmatprep.subr.mxu1 %v4249_v29  ;;  %v2474_v59 = vld [vmem:[%s6454_s5 + $0x50] sm:$0xff] }
 0x2aa   :  { %3504 = vmatprep.mubr.msk.f32.mxu1 %vm1848_vm10, %v1837_v11  ;;  %2109 = vmatpush1.msra.mxu1 %v2034_v1  ;;  %v2509_v11 = vld [vmem:[%s6454_s5 + $0x168] sm:$0xff] }
 0x2ab   :  { %2110 = vmatprep.subr.mxu1 %v4249_v29  ;;  %3553 = vmatprep.subr.mxu0 %v2492_v27  ;;  %v2489_v1 = vld [vmem:[%s6454_s5 + $0xc8] sm:$0xff] }
 0x2ac   :  { %2111 = vmatpush1.msra.mxu1 %v2033_v43  ;;  %3554 = vmatpush3.msra.mxu0 %v2476_v25  ;;  %v2473_v43 = vld [vmem:[%s6454_s5 + $0x48] sm:$0xff] }
 0x2ad   :  { %1993 = vmatmul.mubr.f32.gmra.mxu1 %v1836_v55  ;;  %2112 = vmatprep.subr.mxu1 %v4249_v29  ;;  %v2508_v55 = vld [vmem:[%s6454_s5 + $0x160] sm:$0xff] }
 0x2ae   :  { %3505 = vmatprep.mubr.msk.f32.mxu1 %vm1848_vm10, %v1839_v26  ;;  %2113 = vmatpush1.msra.mxu1 %v2032_v28  ;;  %v2488_v26 = vld [vmem:[%s6454_s5 + $0xc0] sm:$0xff] }
 0x2af   :  { %2114 = vmatprep.subr.mxu1 %v4249_v29  ;;  %3555 = vmatprep.subr.mxu0 %v2491_v32  ;;  %v2472_v28 = vld [vmem:[%s6454_s5 + $0x40] sm:$0xff] }
 0x2b0   :  { %2115 = vmatpush1.msra.mxu1 %v2031_v48  ;;  %3556 = vmatpush3.msra.mxu0 %v2475_v9  ;;  %v2507_v48 = vld [vmem:[%s6454_s5 + $0x158] sm:$0xff] }
 0x2b1   :  { %1999 = vmatmul.mubr.f32.gmra.mxu1 %v1838_v21  ;;  %2116 = vmatprep.subr.mxu1 %v4249_v29  ;;  %v2487_v21 = vld [vmem:[%s6454_s5 + $0xb8] sm:$0xff] }
 0x2b2   :  { %3506 = vmatprep.mubr.msk.f32.mxu1 %vm1848_vm10, %v1841_v7  ;;  %2117 = vmatpush1.msra.mxu1 %v2030_v60  ;;  %v2471_v7 = vld [vmem:[%s6454_s5 + $0x38] sm:$0xff]  ;;  %v2506_v60 = vld [vmem:[%s6454_s5 + $0x150] sm:$0xff] }
 0x2b3   :  { %2118 = vmatprep.subr.mxu1 %v4249_v29  ;;  %3557 = vmatprep.subr.mxu0 %v2490_v58 }
 0x2b4   :  { %2119 = vmatpush1.msra.mxu1 %v2029_v33  ;;  %3558 = vmatpush3.msra.mxu0 %v2474_v59  ;;  %v2486_v33 = vld [vmem:[%s6454_s5 + $0xb0] sm:$0xff] }
 0x2b5   :  { %2005 = vmatmul.mubr.f32.gmra.mxu1 %v1840_v17  ;;  %2138 = vmatprep.subr.mxu1 %v4249_v29  ;;  %v2470_v17 = vld [vmem:[%s6454_s5 + $0x30] sm:$0xff] }
 0x2b6   :  { %3507 = vmatprep.mubr.msk.f32.mxu1 %vm1848_vm10, %v1843_v31  ;;  %2139 = vmatpush2.msra.mxu1 %v2051_v3  ;;  %v2505_v31 = vld [vmem:[%s6454_s5 + $0x148] sm:$0xff] }
 0x2b7   :  { %2140 = vmatprep.subr.mxu1 %v4249_v29  ;;  %3559 = vmatprep.subr.mxu0 %v2489_v1  ;;  %v2485_v3 = vld [vmem:[%s6454_s5 + $0xa8] sm:$0xff] }
 0x2b8   :  { %2141 = vmatpush2.msra.mxu1 %v2050_v12  ;;  %3560 = vmatpush3.msra.mxu0 %v2473_v43  ;;  %v2469_v12 = vld [vmem:[%s6454_s5 + $0x28] sm:$0xff] }
 0x2b9   :  { %2011 = vmatmul.mubr.f32.gmra.mxu1 %v1842_v45  ;;  %2142 = vmatprep.subr.mxu1 %v4249_v29  ;;  %v2504_v45 = vld [vmem:[%s6454_s5 + $0x140] sm:$0xff] }
 0x2ba   :  { %3508 = vmatprep.mubr.msk.f32.mxu1 %vm1848_vm10, %v1845_v30  ;;  %2143 = vmatpush2.msra.mxu1 %v2049_v52  ;;  %v2484_v30 = vld [vmem:[%s6454_s5 + $0xa0] sm:$0xff] }
 0x2bb   :  { %2144 = vmatprep.subr.mxu1 %v4249_v29  ;;  %3561 = vmatprep.subr.mxu0 %v2488_v26  ;;  %v2468_v52 = vld [vmem:[%s6454_s5 + $0x20] sm:$0xff] }
 0x2bc   :  { %2145 = vmatpush2.msra.mxu1 %v2048_v22  ;;  %3562 = vmatpush3.msra.mxu0 %v2472_v28  ;;  %v2503_v22 = vld [vmem:[%s6454_s5 + $0x138] sm:$0xff] }
 0x2bd   :  { %2017 = vmatmul.mubr.f32.gmra.mxu1 %v1844_v53  ;;  %2146 = vmatprep.subr.mxu1 %v4249_v29  ;;  %v2483_v53 = vld [vmem:[%s6454_s5 + $0x98] sm:$0xff] }
 0x2be   :  { %3509 = vmatprep.mubr.msk.f32.mxu1 %vm1848_vm10, %v1847_v50  ;;  %2147 = vmatpush2.msra.mxu1 %v2047_v39  ;;  %v2467_v50 = vld [vmem:[%s6454_s5 + $0x18] sm:$0xff]  ;;  %v2502_v39 = vld [vmem:[%s6454_s5 + $0x130] sm:$0xff] }
 0x2bf   :  { %2148 = vmatprep.subr.mxu1 %v4249_v29  ;;  %3563 = vmatprep.subr.mxu0 %v2487_v21 }
 0x2c0   :  { %2149 = vmatpush2.msra.mxu1 %v2046_v41  ;;  %3564 = vmatpush3.msra.mxu0 %v2471_v7  ;;  %v2466_v41 = vld [vmem:[%s6454_s5 + $0x10] sm:$0xff] }
 0x2c1   :  { %2023 = vmatmul.mubr.f32.gmra.mxu1 %v1846_v4  ;;  %2150 = vmatprep.subr.mxu1 %v4249_v29  ;;  %v2482_v4 = vld [vmem:[%s6454_s5 + $0x90] sm:$0xff] }
 0x2c2   :  { %2151 = vmatpush2.msra.mxu1 %v2045_v47  ;;  %3565 = vmatprep.subr.mxu0 %v2486_v33  ;;  %v2501_v47 = vld [vmem:[%s6454_s5 + $0x128] sm:$0xff] }
 0x2c3   :  { %2680 = vmatprep.subr.mxu1 %v4249_v29  ;;  %3566 = vmatpush3.msra.mxu0 %v2470_v17 }
 0x2c4   :  { %3567 = vmatprep.subr.mxu0 %v2485_v3 }
 0x2c5   :  { %3568 = vmatpush3.msra.mxu0 %v2469_v12 }
 0x2c6   :  { %3569 = vmatprep.subr.mxu0 %v2484_v30 }
 0x2c7   :  { %3570 = vmatpush3.msra.mxu0 %v2468_v52 }
 0x2c8   :  { %3571 = vmatprep.subr.mxu0 %v2483_v53 }
 0x2c9   :  { %3572 = vmatpush3.msra.mxu0 %v2467_v50 }
 0x2ca   :  { %3573 = vmatprep.subr.mxu0 %v2482_v4 }
 0x2cb   :  { %3574 = vmatpush3.msra.mxu0 %v2466_v41 }
 0x355   :  { %v1958_v18 = vpop.f32.mrf.mxu1 }
 0x357   :  { %v1960_v2 = vpop.f32.mrf.mxu1 }
 0x358   :  { %3510 = vmatprep.mubr.msk.f32.mxu1 %vm750_vm6, %v1960_v2  ;;  %v2499_v2 = vld [vmem:[%s6454_s5 + $0x118] sm:$0xff] }
 0x359   :  { %v1964_v62 = vpop.f32.mrf.mxu1  ;;  %2153 = vmatmul.mubr.f32.vlgmr.msra.gmra.mxu1 %v1958_v18  ;;  %v2500_v18 = vld [vmem:[%s6454_s5 + $0x120] sm:$0xff] }
 0x35a   :  { %2681 = vmatpush1.msra.mxu1 %v2511_v5 }
 0x35b   :  { %v1966_v10 = vpop.f32.mrf.mxu1  ;;  %2682 = vmatprep.subr.mxu1 %v4249_v29 }
 0x35c   :  { %3511 = vmatprep.mubr.msk.f32.mxu1 %vm750_vm6, %v1966_v10  ;;  %2683 = vmatpush1.msra.mxu1 %v2510_v8  ;;  %v2497_v10 = vld [vmem:[%s6454_s5 + $0x108] sm:$0xff] }
 0x35d   :  { %v1970_v19 = vpop.f32.mrf.mxu1  ;;  %2158 = vmatmul.mubr.f32.gmra.mxu1 %v1964_v62  ;;  %2684 = vmatprep.subr.mxu1 %v4249_v29  ;;  %v2498_v62 = vld [vmem:[%s6454_s5 + $0x110] sm:$0xff] }
 0x35e   :  { %2685 = vmatpush1.msra.mxu1 %v2509_v11 }
 0x35f   :  { %v1972_v46 = vpop.f32.mrf.mxu1  ;;  %2686 = vmatprep.subr.mxu1 %v4249_v29 }
 0x360   :  { %3512 = vmatprep.mubr.msk.f32.mxu1 %vm750_vm6, %v1972_v46  ;;  %2687 = vmatpush1.msra.mxu1 %v2508_v55  ;;  %v2523_v46 = vld [vmem:[%s6454_s5 + $0x1d8] sm:$0xff] }
 0x361   :  { %v1976_v6 = vpop.f32.mrf.mxu1  ;;  %2163 = vmatmul.mubr.f32.gmra.mxu1 %v1970_v19  ;;  %2688 = vmatprep.subr.mxu1 %v4249_v29  ;;  %v2496_v19 = vld [vmem:[%s6454_s5 + $0x100] sm:$0xff] }
 0x362   :  { %2689 = vmatpush1.msra.mxu1 %v2507_v48 }
 0x363   :  { %v1978_v0 = vpop.f32.mrf.mxu1  ;;  %2690 = vmatprep.subr.mxu1 %v4249_v29 }
 0x364   :  { %3513 = vmatprep.mubr.msk.f32.mxu1 %vm750_vm6, %v1978_v0  ;;  %2691 = vmatpush1.msra.mxu1 %v2506_v60  ;;  %v2521_v0 = vld [vmem:[%s6454_s5 + $0x1c8] sm:$0xff] }
 0x365   :  { %v1982_v16 = vpop.f32.mrf.mxu1  ;;  %2168 = vmatmul.mubr.f32.gmra.mxu1 %v1976_v6  ;;  %2692 = vmatprep.subr.mxu1 %v4249_v29  ;;  %v2522_v6 = vld [vmem:[%s6454_s5 + $0x1d0] sm:$0xff] }
 0x366   :  { %2693 = vmatpush1.msra.mxu1 %v2505_v31 }
 0x367   :  { %v1984_v13 = vpop.f32.mrf.mxu1  ;;  %2694 = vmatprep.subr.mxu1 %v4249_v29 }
 0x368   :  { %3514 = vmatprep.mubr.msk.f32.mxu1 %vm750_vm6, %v1984_v13  ;;  %2695 = vmatpush1.msra.mxu1 %v2504_v45  ;;  %v2519_v13 = vld [vmem:[%s6454_s5 + $0x1b8] sm:$0xff] }
 0x369   :  { %v1988_v63 = vpop.f32.mrf.mxu1  ;;  %2173 = vmatmul.mubr.f32.gmra.mxu1 %v1982_v16  ;;  %2696 = vmatprep.subr.mxu1 %v4249_v29  ;;  %v2520_v16 = vld [vmem:[%s6454_s5 + $0x1c0] sm:$0xff] }
 0x36a   :  { %2697 = vmatpush1.msra.mxu1 %v2503_v22 }
 0x36b   :  { %v1990_v42 = vpop.f32.mrf.mxu1  ;;  %2698 = vmatprep.subr.mxu1 %v4249_v29 }
 0x36c   :  { %3515 = vmatprep.mubr.msk.f32.mxu1 %vm750_vm6, %v1990_v42  ;;  %2699 = vmatpush1.msra.mxu1 %v2502_v39  ;;  %v2517_v42 = vld [vmem:[%s6454_s5 + $0x1a8] sm:$0xff] }
 0x36d   :  { %v1994_v51 = vpop.f32.mrf.mxu1  ;;  %2178 = vmatmul.mubr.f32.gmra.mxu1 %v1988_v63  ;;  %2700 = vmatprep.subr.mxu1 %v4249_v29  ;;  %v2518_v63 = vld [vmem:[%s6454_s5 + $0x1b0] sm:$0xff] }
 0x36e   :  { %2701 = vmatpush1.msra.mxu1 %v2501_v47 }
 0x36f   :  { %v1996_v37 = vpop.f32.mrf.mxu1  ;;  %2702 = vmatprep.subr.mxu1 %v4249_v29 }
 0x370   :  { %3516 = vmatprep.mubr.msk.f32.mxu1 %vm750_vm6, %v1996_v37  ;;  %2703 = vmatpush1.msra.mxu1 %v2500_v18 }
 0x371   :  { %v2000_v44 = vpop.f32.mrf.mxu1  ;;  %2183 = vmatmul.mubr.f32.gmra.mxu1 %v1994_v51  ;;  %2704 = vmatprep.subr.mxu1 %v4249_v29  ;;  %v2516_v51 = vld [vmem:[%s6454_s5 + $0x1a0] sm:$0xff] }
 0x372   :  { %2705 = vmatpush1.msra.mxu1 %v2499_v2 }
 0x373   :  { %v2002_v61 = vpop.f32.mrf.mxu1  ;;  %2706 = vmatprep.subr.mxu1 %v4249_v29 }
 0x374   :  { %3517 = vmatprep.mubr.msk.f32.mxu1 %vm750_vm6, %v2002_v61  ;;  %2707 = vmatpush1.msra.mxu1 %v2498_v62  ;;  %v2515_v61 = vld [vmem:[%s6454_s5 + $0x198] sm:$0xff] }
 0x375   :  { %v2006_v14 = vpop.f32.mrf.mxu1  ;;  %2188 = vmatmul.mubr.f32.gmra.mxu1 %v2000_v44  ;;  %2708 = vmatprep.subr.mxu1 %v4249_v29  ;;  %v2481_v44 = vld [vmem:[%s6454_s5 + $0x88] sm:$0xff] }
 0x376   :  { %2709 = vmatpush1.msra.mxu1 %v2497_v10  ;;  %3575 = vmatprep.subr.mxu0 %v2481_v44 }
 0x377   :  { %v2008_v56 = vpop.f32.mrf.mxu1  ;;  %2710 = vmatprep.subr.mxu1 %v4249_v29 }
 0x378   :  { %3518 = vmatprep.mubr.msk.f32.mxu1 %vm750_vm6, %v2008_v56  ;;  %2711 = vmatpush1.msra.mxu1 %v2496_v19  ;;  %v2480_v56 = vld [vmem:[%s6454_s5 + $0x80] sm:$0xff] }
 0x379   :  { %v2012_v54 = vpop.f32.mrf.mxu1  ;;  %2193 = vmatmul.mubr.f32.gmra.mxu1 %v2006_v14  ;;  %2720 = vmatprep.subr.mxu1 %v4249_v29  ;;  %v2465_v14 = vld [vmem:[%s6454_s5 + $0x8] sm:$0xff] }
 0x37a   :  { %2721 = vmatpush2.msra.mxu1 %v2523_v46  ;;  %3576 = vmatpush3.msra.mxu0 %v2465_v14 }
 0x37b   :  { %v2014_v36 = vpop.f32.mrf.mxu1  ;;  %2722 = vmatprep.subr.mxu1 %v4249_v29  ;;  %3577 = vmatprep.subr.mxu0 %v2480_v56 }
 0x37c   :  { %3519 = vmatprep.mubr.msk.f32.mxu1 %vm750_vm6, %v2014_v36  ;;  %2723 = vmatpush2.msra.mxu1 %v2522_v6  ;;  %v2514_v36 = vld [vmem:[%s6454_s5 + $0x190] sm:$0xff] }
 0x37d   :  { %v2018_v20 = vpop.f32.mrf.mxu1  ;;  %2198 = vmatmul.mubr.f32.gmra.mxu1 %v2012_v54  ;;  %2724 = vmatprep.subr.mxu1 %v4249_v29 }
 0x37e   :  { %2725 = vmatpush2.msra.mxu1 %v2521_v0 }
 0x37f   :  { %v2020_v23 = vpop.f32.mrf.mxu1  ;;  %2726 = vmatprep.subr.mxu1 %v4249_v29 }
 0x380   :  { %3520 = vmatprep.mubr.msk.f32.mxu1 %vm750_vm6, %v2020_v23  ;;  %2727 = vmatpush2.msra.mxu1 %v2520_v16 }
 0x381   :  { %v2024_v24 = vpop.f32.mrf.mxu1  ;;  %2203 = vmatmul.mubr.f32.gmra.mxu1 %v2018_v20  ;;  %2728 = vmatprep.subr.mxu1 %v4249_v29  ;;  %v2464_v20 = vld [vmem:[%s6454_s5] sm:$0xff] }
 0x382   :  { %2729 = vmatpush2.msra.mxu1 %v2519_v13  ;;  %3578 = vmatpush3.msra.mxu0 %v2464_v20 }
 0x383   :  { %v2026_v40 = vpop.f32.mrf.mxu1  ;;  %2730 = vmatprep.subr.mxu1 %v4249_v29 }
 0x384   :  { %3521 = vmatprep.mubr.msk.f32.mxu1 %vm750_vm6, %v2026_v40  ;;  %2731 = vmatpush2.msra.mxu1 %v2518_v63 }
 0x385   :  { %2208 = vmatmul.mubr.f32.gmra.mxu1 %v2024_v24  ;;  %2732 = vmatprep.subr.mxu1 %v4249_v29  ;;  %v2513_v24 = vld [vmem:[%s6454_s5 + $0x188] sm:$0xff]  ;;  %s4250_s5 = smov 64  }
 0x386   :  { %2733 = vmatpush2.msra.mxu1 %v2517_v42 }
 0x387   :  { %2734 = vmatprep.subr.mxu1 %v4249_v29 }
 0x388   :  { %2735 = vmatpush2.msra.mxu1 %v2516_v51 }
 0x389   :  { %2736 = vmatprep.subr.mxu1 %v4249_v29 }
 0x38a   :  { %2737 = vmatpush2.msra.mxu1 %v2515_v61 }
 0x38b   :  { %2738 = vmatprep.subr.mxu1 %v4249_v29 }
 0x38c   :  { %2739 = vmatpush2.msra.mxu1 %v2514_v36 }
 0x38d   :  { %2740 = vmatprep.subr.mxu1 %v4249_v29 }
 0x38e   :  { %2741 = vmatpush2.msra.mxu1 %v2513_v24 }
 0x38f   :  { %2742 = vmatprep.subr.mxu1 %v4249_v29 }
 0x390   :  { %2743 = vmatpush2.msra.mxu1 %v2512_v57 }
 0x419   :  { %v5912_v37 = vpop.f32.mrf.mxu1 }
 0x41a   :  { %v2402_v40 = vrot.slane %v5912_v37, 4  ;;  %v2225_v27 = vrot.slane %v5912_v37, 1  ;;  %v2284_v32 = vrot.slane %v5912_v37, 2  ;;  %v2343_v21 = vrot.slane %v5912_v37, 3 }
 0x41b   :  { %v2156_v54 = vpop.f32.mrf.mxu1 }
 0x41d   :  { %v5933_v23 = vpop.f32.mrf.mxu1 }
 0x41e   :  { %v2403_v38 = vrot.slane %v5933_v23, 4  ;;  %v2226_v34 = vrot.slane %v5933_v23, 1  ;;  %v2285_v35 = vrot.slane %v5933_v23, 2  ;;  %v2344_v8 = vrot.slane %v5933_v23, 3 }
 0x41f   :  { %v2161_v15 = vpop.f32.mrf.mxu1 }
 0x420   :  { %v2404_v49 = vsel %vm581_vm2, %v2402_v40, %v2403_v38  ;;  %v2286_v11 = vsel %vm301_vm3, %v2284_v32, %v2285_v35  ;;  %v2227_v43 = vsel %vm161_vm1, %v2225_v27, %v2226_v34  ;;  %v2345_v31 = vsel %vm441_vm0, %v2343_v21, %v2344_v8 }
 0x421   :  { %v5951_v25 = vpop.f32.mrf.mxu1  ;;  %3523 = vmatprep.mubr.msk.f32.mxu1 %vm2425_vm12, %v2404_v49 }
 0x422   :  { %v2228_v9 = vrot.slane %v5951_v25, 1  ;;  %v2287_v58 = vrot.slane %v5951_v25, 2  ;;  %v2346_v5 = vrot.slane %v5951_v25, 3 }
 0x423   :  { %v2166_v59 = vpop.f32.mrf.mxu1 }
 0x424   :  { %v2288_v1 = vsel %vm301_vm3, %v2285_v35, %v2287_v58  ;;  %v2229_v55 = vsel %vm161_vm1, %v2226_v34, %v2228_v9  ;;  %v2347_v7 = vsel %vm441_vm0, %v2344_v8, %v2346_v5 }
 0x425   :  { %v5963_v26 = vpop.f32.mrf.mxu1  ;;  %v4075_v28 = vpack.i.bf16 %v2288_v1, %v2286_v11  ;;  %v4070_v48 = vpack.i.bf16 %v2229_v55, %v2227_v43  ;;  %v4080_v12 = vpack.i.bf16 %v2347_v7, %v2345_v31 }
 0x426   :  { %v2230_v33 = vrot.slane %v5963_v26, 1  ;;  %v2289_v17 = vrot.slane %v5963_v26, 2  ;;  %v2348_v22 = vrot.slane %v5963_v26, 3 }
 0x427   :  { %4076 = vrot.lane.b32.xlu1 %v4075_v28, %s4250_s5  ;;  %4071 = vrot.lane.b32.xlu0 %v4070_v48, %s4251_s26  ;;  %v2171_v60 = vpop.f32.mrf.mxu1 }
 0x428   :  { %v2290_v50 = vsel %vm301_vm3, %v2287_v58, %v2289_v17  ;;  %v2231_v4 = vsel %vm161_vm1, %v2228_v9, %v2230_v33  ;;  %v2349_v6 = vsel %vm441_vm0, %v2346_v5, %v2348_v22 }
 0x429   :  { %v5972_v3 = vpop.f32.mrf.mxu1 }
 0x42a   :  { %v2232_v45 = vrot.slane %v5972_v3, 1  ;;  %v2291_v30 = vrot.slane %v5972_v3, 2  ;;  %v2350_v52 = vrot.slane %v5972_v3, 3 }
 0x42b   :  { %4081 = vrot.lane.b32.xlu0 %v4080_v12, %s4252_s11  ;;  %v2176_v53 = vpop.f32.mrf.mxu1 }
 0x42c   :  { %v2292_v39 = vsel %vm301_vm3, %v2289_v17, %v2291_v30  ;;  %v2233_v41 = vsel %vm161_vm1, %v2230_v33, %v2232_v45  ;;  %v2351_v62 = vsel %vm441_vm0, %v2348_v22, %v2350_v52 }
 0x42d   :  { %v5983_v47 = vpop.f32.mrf.mxu1  ;;  %v4090_v18 = vpack.i.bf16 %v2292_v39, %v2290_v50  ;;  %v4085_v2 = vpack.i.bf16 %v2233_v41, %v2231_v4  ;;  %v4095_v16 = vpack.i.bf16 %v2351_v62, %v2349_v6 }
 0x42e   :  { %v2234_v19 = vrot.slane %v5983_v47, 1  ;;  %v2293_v46 = vrot.slane %v5983_v47, 2  ;;  %v2352_v51 = vrot.slane %v5983_v47, 3 }
 0x42f   :  { %4091 = vrot.lane.b32.xlu0 %v4090_v18, %s4250_s5  ;;  %4086 = vrot.lane.b32.xlu1 %v4085_v2, %s4251_s26  ;;  %v2181_v10 = vpop.f32.mrf.mxu1 }
 0x430   :  { %v2294_v61 = vsel %vm301_vm3, %v2291_v30, %v2293_v46  ;;  %v2235_v56 = vsel %vm161_vm1, %v2232_v45, %v2234_v19  ;;  %v2353_v35 = vsel %vm441_vm0, %v2350_v52, %v2352_v51 }
 0x431   :  { %v5991_v0 = vpop.f32.mrf.mxu1 }
 0x432   :  { %v2236_v13 = vrot.slane %v5991_v0, 1  ;;  %v2295_v63 = vrot.slane %v5991_v0, 2  ;;  %v2354_v42 = vrot.slane %v5991_v0, 3 }
 0x433   :  { %4096 = vrot.lane.b32.xlu1 %v4095_v16, %s4252_s11  ;;  %v2186_v44 = vpop.f32.mrf.mxu1 }
 0x434   :  { %v2296_v14 = vsel %vm301_vm3, %v2293_v46, %v2295_v63  ;;  %v2237_v54 = vsel %vm161_vm1, %v2234_v19, %v2236_v13  ;;  %v2355_v40 = vsel %vm441_vm0, %v2352_v51, %v2354_v42 }
 0x435   :  { %v6002_v36 = vpop.f32.mrf.mxu1  ;;  %v4105_v20 = vpack.i.bf16 %v2296_v14, %v2294_v61  ;;  %v4100_v24 = vpack.i.bf16 %v2237_v54, %v2235_v56  ;;  %v4110_v27 = vpack.i.bf16 %v2355_v40, %v2353_v35 }
 0x436   :  { %v2238_v57 = vrot.slane %v6002_v36, 1  ;;  %v2297_v34 = vrot.slane %v6002_v36, 2  ;;  %v2356_v5 = vrot.slane %v6002_v36, 3 }
 0x437   :  { %4106 = vrot.lane.b32.xlu1 %v4105_v20, %s4250_s5  ;;  %4101 = vrot.lane.b32.xlu0 %v4100_v24, %s4251_s26  ;;  %v2191_v15 = vpop.f32.mrf.mxu1 }
 0x438   :  { %v2298_v59 = vsel %vm301_vm3, %v2295_v63, %v2297_v34  ;;  %v2239_v1 = vsel %vm161_vm1, %v2236_v13, %v2238_v57  ;;  %v2357_v17 = vsel %vm441_vm0, %v2354_v42, %v2356_v5 }
 0x439   :  { %v6010_v49 = vpop.f32.mrf.mxu1 }
 0x43a   :  { %v2240_v32 = vrot.slane %v6010_v49, 1  ;;  %v2299_v9 = vrot.slane %v6010_v49, 2  ;;  %v2358_v58 = vrot.slane %v6010_v49, 3 }
 0x43b   :  { %4111 = vrot.lane.b32.xlu0 %v4110_v27, %s4252_s11  ;;  %v2196_v8 = vpop.f32.mrf.mxu1 }
 0x43c   :  { %v2300_v11 = vsel %vm301_vm3, %v2297_v34, %v2299_v9  ;;  %v2241_v43 = vsel %vm161_vm1, %v2238_v57, %v2240_v32  ;;  %v2359_v21 = vsel %vm441_vm0, %v2356_v5, %v2358_v58  ;;  %v2405_v34 = vrot.slane %v5951_v25, 4 }
 0x43d   :  { %v6021_v55 = vpop.f32.mrf.mxu1  ;;  %v4120_v28 = vpack.i.bf16 %v2300_v11, %v2298_v59  ;;  %v4115_v48 = vpack.i.bf16 %v2241_v43, %v2239_v1  ;;  %v4125_v12 = vpack.i.bf16 %v2359_v21, %v2357_v17  ;;  %v2407_v59 = vrot.slane %v5963_v26, 4 }
 0x43e   :  { %v2242_v60 = vrot.slane %v6021_v55, 1  ;;  %v2301_v33 = vrot.slane %v6021_v55, 2  ;;  %v2360_v22 = vrot.slane %v6021_v55, 3 }
 0x43f   :  { %4121 = vrot.lane.b32.xlu0 %v4120_v28, %s4250_s5  ;;  %4116 = vrot.lane.b32.xlu1 %v4115_v48, %s4251_s26  ;;  %v2201_v7 = vpop.f32.mrf.mxu1 }
 0x440   :  { %v2302_v50 = vsel %vm301_vm3, %v2299_v9, %v2301_v33  ;;  %v2243_v4 = vsel %vm161_vm1, %v2240_v32, %v2242_v60  ;;  %v2361_v6 = vsel %vm441_vm0, %v2358_v58, %v2360_v22 }
 0x441   :  { %v6029_v31 = vpop.f32.mrf.mxu1 }
 0x442   :  { %v2244_v45 = vrot.slane %v6029_v31, 1  ;;  %v2303_v30 = vrot.slane %v6029_v31, 2  ;;  %v2362_v52 = vrot.slane %v6029_v31, 3 }
 0x443   :  { %4126 = vrot.lane.b32.xlu1 %v4125_v12, %s4252_s11  ;;  %v2206_v53 = vpop.f32.mrf.mxu1 }
 0x444   :  { %v2304_v39 = vsel %vm301_vm3, %v2301_v33, %v2303_v30  ;;  %v2245_v41 = vsel %vm161_vm1, %v2242_v60, %v2244_v45  ;;  %v2363_v10 = vsel %vm441_vm0, %v2360_v22, %v2362_v52  ;;  %v2409_v60 = vrot.slane %v5972_v3, 4 }
 0x445   :  { %v6040_v18 = vpop.f32.mrf.mxu1  ;;  %v4135_v2 = vpack.i.bf16 %v2304_v39, %v2302_v50  ;;  %v4130_v62 = vpack.i.bf16 %v2245_v41, %v2243_v4  ;;  %v4140_v16 = vpack.i.bf16 %v2363_v10, %v2361_v6  ;;  %v2411_v53 = vrot.slane %v5983_v47, 4 }
 0x446   :  { %v2246_v19 = vrot.slane %v6040_v18, 1  ;;  %v2305_v63 = vrot.slane %v6040_v18, 2  ;;  %v2364_v51 = vrot.slane %v6040_v18, 3  ;;  %v2410_v22 = vsel %vm581_vm2, %v2407_v59, %v2409_v60 }
 0x447   :  { %4136 = vrot.lane.b32.xlu1 %v4135_v2, %s4250_s5  ;;  %4131 = vrot.lane.b32.xlu0 %v4130_v62, %s4251_s26  ;;  %v2211_v46 = vpop.f32.mrf.mxu1 }
 0x448   :  { %v2247_v13 = vsel %vm161_vm1, %v2244_v45, %v2246_v19  ;;  %v2306_v42 = vsel %vm301_vm3, %v2303_v30, %v2305_v63  ;;  %v2365_v44 = vsel %vm441_vm0, %v2362_v52, %v2364_v51  ;;  %v2413_v46 = vrot.slane %v5991_v0, 4 }
 0x44b   :  { %4141 = vrot.lane.b32.xlu0 %v4140_v16, %s4252_s11  ;;  %2268 = vrot.lane.b32.xlu1 %v2247_v13, %s4251_s26 }
 0x44f   :  { %2327 = vrot.lane.b32.xlu0 %v2306_v42, %s4250_s5  ;;  %2270 = vrot.lane.b32.xlu1 %v2246_v19, %s4251_s26  ;;  %v2412_v19 = vsel %vm581_vm2, %v2409_v60, %v2411_v53 }
 0x453   :  { %2329 = vrot.lane.b32.xlu0 %v2305_v63, %s4250_s5  ;;  %2386 = vrot.lane.b32.xlu1 %v2365_v44, %s4252_s11  ;;  %v2414_v44 = vsel %vm581_vm2, %v2411_v53, %v2413_v46 }
 0x457   :  { %2388 = vrot.lane.b32.xlu0 %v2364_v51, %s4252_s11 }
 0x499   :  { %v4077_v61 = vpop.permute.xlu1 %4076  ;;  %v4072_v14 = vpop.permute.xlu0 %4071 }
 0x49a   :  { %v4079_v56 = vunpack.i.h.bf16 %v4077_v61  ;;  %v4078_v54 = vunpack.i.l.bf16 %v4077_v61  ;;  %v4074_v20 = vunpack.i.h.bf16 %v4072_v14  ;;  %v4073_v24 = vunpack.i.l.bf16 %v4072_v14 }
 0x49b   :  { %v2415_v61 = vrot.slane %v6002_v36, 4 }
 0x49c   :  { %v2439_v40 = vsel %vm2438_vm13, %v4073_v24, %v4078_v54  ;;  %v2426_v15 = vsel %vm2425_vm12, %v5912_v37, %v4073_v24  ;;  %v2440_v27 = vsel %vm2438_vm13, %v4074_v20, %v4079_v56  ;;  %v2427_v8 = vsel %vm2425_vm12, %v5933_v23, %v4074_v20 }
 0x49d   :  { %v4082_v57 = vpop.permute.xlu0 %4081  ;;  %2619 = vmatprep.mubr.f32.mxu0 %v2439_v40  ;;  %v2406_v37 = vsel %vm581_vm2, %v2403_v38, %v2405_v34  ;;  %v2408_v38 = vsel %vm581_vm2, %v2405_v34, %v2407_v59  ;;  %v2417_v34 = vrot.slane %v6010_v49, 4 }
 0x49e   :  { %v4083_v35 = vunpack.i.l.bf16 %v4082_v57  ;;  %2620 = vmatmul.mubr.f32.vlgmr.msra.gmra.mxu0 %v2426_v15  ;;  %v4084_v32 = vunpack.i.h.bf16 %v4082_v57  ;;  %v2416_v57 = vsel %vm581_vm2, %v2413_v46, %v2415_v61  ;;  %v6143_v46 = vld [vmem:[%s6455_s6] ss:$0 sm:$0xff] }
 0x49f   :  { %2624 = vmatprep.mubr.f32.mxu0 %v2440_v27 }
 0x4a0   :  { %v2452_v9 = vsel %vm2451_vm14, %v4078_v54, %v4083_v35  ;;  %v2453_v48 = vsel %vm2451_vm14, %v4079_v56, %v4084_v32 }
 0x4a1   :  { %2745 = vmatmul.mubr.f32.vlgmr.msra.gmra.mxu1 %v2452_v9  ;;  %v4092_v58 = vpop.permute.xlu0 %4091  ;;  %v4087_v5 = vpop.permute.xlu1 %4086 }
 0x4a2   :  { %v4094_v11 = vunpack.i.h.bf16 %v4092_v58  ;;  %v4093_v1 = vunpack.i.l.bf16 %v4092_v58  ;;  %v4089_v43 = vunpack.i.h.bf16 %v4087_v5  ;;  %v4088_v28 = vunpack.i.l.bf16 %v4087_v5  ;;  %2625 = vmatmul.mubr.f32.gmra.mxu0 %v2427_v8  ;;  %3524 = vmatprep.mubr.msk.f32.mxu1 %vm2425_vm12, %v2406_v37 }
 0x4a3   :  { %v2418_v8 = vsel %vm581_vm2, %v2415_v61, %v2417_v34  ;;  %v2419_v37 = vrot.slane %v6021_v55, 4 }
 0x4a4   :  { %v2441_v21 = vsel %vm2438_vm13, %v4088_v28, %v4093_v1  ;;  %v2428_v7 = vsel %vm2425_vm12, %v5951_v25, %v4088_v28  ;;  %v2442_v17 = vsel %vm2438_vm13, %v4089_v43, %v4094_v11  ;;  %v2429_v52 = vsel %vm2425_vm12, %v5963_v26, %v4089_v43 }
 0x4a5   :  { %2750 = vmatmul.mubr.f32.gmra.mxu1 %v2453_v48  ;;  %v4097_v23 = vpop.permute.xlu1 %4096  ;;  %2629 = vmatprep.mubr.f32.mxu0 %v2441_v21 }
 0x4a6   :  { %v4098_v33 = vunpack.i.l.bf16 %v4097_v23  ;;  %2630 = vmatmul.mubr.f32.gmra.mxu0 %v2428_v7  ;;  %3525 = vmatprep.mubr.msk.f32.mxu1 %vm2425_vm12, %v2408_v38  ;;  %v4099_v12 = vunpack.i.h.bf16 %v4097_v23  ;;  %v2420_v23 = vsel %vm581_vm2, %v2417_v34, %v2419_v37  ;;  %v2421_v38 = vrot.slane %v6029_v31, 4 }
 0x4a7   :  { %2634 = vmatprep.mubr.f32.mxu0 %v2442_v17 }
 0x4a8   :  { %v2454_v45 = vsel %vm2451_vm14, %v4093_v1, %v4098_v33  ;;  %v2455_v2 = vsel %vm2451_vm14, %v4094_v11, %v4099_v12 }
 0x4a9   :  { %2755 = vmatmul.mubr.f32.gmra.mxu1 %v2454_v45  ;;  %v4107_v30 = vpop.permute.xlu1 %4106  ;;  %v4102_v25 = vpop.permute.xlu0 %4101 }
 0x4aa   :  { %v4109_v50 = vunpack.i.h.bf16 %v4107_v30  ;;  %v4108_v39 = vunpack.i.l.bf16 %v4107_v30  ;;  %v4104_v4 = vunpack.i.h.bf16 %v4102_v25  ;;  %v4103_v41 = vunpack.i.l.bf16 %v4102_v25  ;;  %2635 = vmatmul.mubr.f32.gmra.mxu0 %v2429_v52  ;;  %3526 = vmatprep.mubr.msk.f32.mxu1 %vm2425_vm12, %v2410_v22 }
 0x4ab   :  { %v2422_v25 = vsel %vm581_vm2, %v2419_v37, %v2421_v38  ;;  %v2423_v52 = vrot.slane %v6040_v18, 4 }
 0x4ac   :  { %v2443_v62 = vsel %vm2438_vm13, %v4103_v41, %v4108_v39  ;;  %v2430_v10 = vsel %vm2425_vm12, %v5972_v3, %v4103_v41  ;;  %v2444_v16 = vsel %vm2438_vm13, %v4104_v4, %v4109_v50  ;;  %v2431_v51 = vsel %vm2425_vm12, %v5983_v47, %v4104_v4 }
 0x4ad   :  { %2760 = vmatmul.mubr.f32.gmra.mxu1 %v2455_v2  ;;  %v4112_v26 = vpop.permute.xlu0 %4111  ;;  %2639 = vmatprep.mubr.f32.mxu0 %v2443_v62 }
 0x4ae   :  { %v4113_v6 = vunpack.i.l.bf16 %v4112_v26  ;;  %2640 = vmatmul.mubr.f32.gmra.mxu0 %v2430_v10  ;;  %3527 = vmatprep.mubr.msk.f32.mxu1 %vm2425_vm12, %v2412_v19  ;;  %v4114_v13 = vunpack.i.h.bf16 %v4112_v26 }
 0x4af   :  { %2644 = vmatprep.mubr.f32.mxu0 %v2444_v16 }
 0x4b0   :  { %v2456_v63 = vsel %vm2451_vm14, %v4108_v39, %v4113_v6  ;;  %v2457_v24 = vsel %vm2451_vm14, %v4109_v50, %v4114_v13 }
 0x4b1   :  { %2765 = vmatmul.mubr.f32.gmra.mxu1 %v2456_v63  ;;  %v4122_v42 = vpop.permute.xlu0 %4121  ;;  %v4117_v3 = vpop.permute.xlu1 %4116 }
 0x4b2   :  { %v4124_v14 = vunpack.i.h.bf16 %v4122_v42  ;;  %v4123_v56 = vunpack.i.l.bf16 %v4122_v42  ;;  %v4119_v54 = vunpack.i.h.bf16 %v4117_v3  ;;  %v4118_v20 = vunpack.i.l.bf16 %v4117_v3  ;;  %2645 = vmatmul.mubr.f32.gmra.mxu0 %v2431_v51  ;;  %3528 = vmatprep.mubr.msk.f32.mxu1 %vm2425_vm12, %v2414_v44 }
 0x4b4   :  { %v2445_v40 = vsel %vm2438_vm13, %v4118_v20, %v4123_v56  ;;  %v2432_v15 = vsel %vm2425_vm12, %v5991_v0, %v4118_v20  ;;  %v2446_v27 = vsel %vm2438_vm13, %v4119_v54, %v4124_v14  ;;  %v2433_v5 = vsel %vm2425_vm12, %v6002_v36, %v4119_v54 }
 0x4b5   :  { %2770 = vmatmul.mubr.f32.gmra.mxu1 %v2457_v24  ;;  %v4127_v47 = vpop.permute.xlu1 %4126  ;;  %2649 = vmatprep.mubr.f32.mxu0 %v2445_v40 }
 0x4b6   :  { %v4128_v35 = vunpack.i.l.bf16 %v4127_v47  ;;  %2650 = vmatmul.mubr.f32.gmra.mxu0 %v2432_v15  ;;  %3529 = vmatprep.mubr.msk.f32.mxu1 %vm2425_vm12, %v2416_v57  ;;  %v4129_v32 = vunpack.i.h.bf16 %v4127_v47 }
 0x4b7   :  { %2654 = vmatprep.mubr.f32.mxu0 %v2446_v27 }
 0x4b8   :  { %v2458_v9 = vsel %vm2451_vm14, %v4123_v56, %v4128_v35  ;;  %v2459_v28 = vsel %vm2451_vm14, %v4124_v14, %v4129_v32 }
 0x4b9   :  { %2775 = vmatmul.mubr.f32.gmra.mxu1 %v2458_v9  ;;  %v4137_v58 = vpop.permute.xlu1 %4136  ;;  %v4132_v0 = vpop.permute.xlu0 %4131 }
 0x4ba   :  { %v4139_v59 = vunpack.i.h.bf16 %v4137_v58  ;;  %v4138_v11 = vunpack.i.l.bf16 %v4137_v58  ;;  %v4134_v1 = vunpack.i.h.bf16 %v4132_v0  ;;  %v4133_v43 = vunpack.i.l.bf16 %v4132_v0  ;;  %2655 = vmatmul.mubr.f32.gmra.mxu0 %v2433_v5  ;;  %3530 = vmatprep.mubr.msk.f32.mxu1 %vm2425_vm12, %v2418_v8 }
 0x4bc   :  { %v2447_v48 = vsel %vm2438_vm13, %v4133_v43, %v4138_v11  ;;  %v2434_v21 = vsel %vm2425_vm12, %v6010_v49, %v4133_v43  ;;  %v2448_v33 = vsel %vm2438_vm13, %v4134_v1, %v4139_v59  ;;  %v2435_v30 = vsel %vm2425_vm12, %v6021_v55, %v4134_v1 }
 0x4bd   :  { %2780 = vmatmul.mubr.f32.gmra.mxu1 %v2459_v28  ;;  %v4142_v36 = vpop.permute.xlu0 %4141  ;;  %2659 = vmatprep.mubr.f32.mxu0 %v2447_v48  ;;  %v2269_v7 = vpop.permute.xlu1 %2268  ;;  %v2424_v55 = vsel %vm581_vm2, %v2421_v38, %v2423_v52 }
 0x4be   :  { %v4143_v60 = vunpack.i.l.bf16 %v4142_v36  ;;  %2660 = vmatmul.mubr.f32.gmra.mxu0 %v2434_v21  ;;  %3531 = vmatprep.mubr.msk.f32.mxu1 %vm2425_vm12, %v2420_v23  ;;  %v4144_v17 = vunpack.i.h.bf16 %v4142_v36  ;;  %v2436_v4 = vsel %vm2425_vm12, %v6029_v31, %v2269_v7 }
 0x4bf   :  { %2664 = vmatprep.mubr.f32.mxu0 %v2448_v33 }
 0x4c0   :  { %v2460_v12 = vsel %vm2451_vm14, %v4138_v11, %v4143_v60  ;;  %v2461_v53 = vsel %vm2451_vm14, %v4139_v59, %v4144_v17 }
 0x4c1   :  { %2785 = vmatmul.mubr.f32.gmra.mxu1 %v2460_v12  ;;  %v2328_v49 = vpop.permute.xlu0 %2327  ;;  %v2271_v45 = vpop.permute.xlu1 %2270 }
 0x4c2   :  { %2665 = vmatmul.mubr.f32.gmra.mxu0 %v2435_v30  ;;  %3532 = vmatprep.mubr.msk.f32.mxu1 %vm2425_vm12, %v2422_v25  ;;  %v2449_v22 = vsel %vm2438_vm13, %v2269_v7, %v2328_v49  ;;  %v2437_v10 = vsel %vm2425_vm12, %v6040_v18, %v2271_v45 }
 0x4c3   :  { %2669 = vmatprep.mubr.f32.mxu0 %v2449_v22 }
 0x4c5   :  { %2790 = vmatmul.mubr.f32.gmra.mxu1 %v2461_v53  ;;  %v2330_v50 = vpop.permute.xlu0 %2329  ;;  %v2387_v39 = vpop.permute.xlu1 %2386 }
 0x4c6   :  { %2670 = vmatmul.mubr.f32.gmra.mxu0 %v2436_v4  ;;  %3533 = vmatprep.mubr.msk.f32.mxu1 %vm2425_vm12, %v2424_v55  ;;  %v2450_v41 = vsel %vm2438_vm13, %v2271_v45, %v2330_v50  ;;  %v2462_v2 = vsel %vm2451_vm14, %v2328_v49, %v2387_v39 }
 0x4c7   :  { %2674 = vmatprep.mubr.f32.mxu0 %v2450_v41 }
 0x4c9   :  { %v2389_v62 = vpop.permute.xlu0 %2388  ;;  %2795 = vmatmul.mubr.f32.gmra.mxu1 %v2462_v2 }
 0x4ca   :  { %2675 = vmatmul.mubr.f32.gmra.mxu0 %v2437_v10  ;;  %3534 = vmatprep.mubr.msk.f32.mxu1 %vm2425_vm12, %v2423_v52  ;;  %v2463_v31 = vsel %vm2451_vm14, %v2330_v50, %v2389_v62 }
 0x4cd   :  { %2800 = vmatmul.mubr.f32.gmra.mxu1 %v2463_v31 }
 0x55e   :  { %v3579_v26 = vpop.f32.mrf.mxu0 }
 0x560   :  { %v3580_v19 = vpop.f32.mrf.mxu0 }
 0x561   :  { %v3581_v6 = vadd.f32 %v3580_v19, %v3579_v26  ;;  %v2746_v16 = vpop.f32.mrf.mxu1 }
 0x562   :  { %v6145_v13 = vpop.f32.mrf.mxu0 }
 0x563   :  { %v2622_v63 = vadd.f32 %v3581_v6, %v6143_v46  ;;  %v2748_v18 = vpop.f32.mrf.mxu1 }
 0x564   :  { %v6148_v42 = vpop.f32.mrf.mxu0 }
 0x565   :  { %v6150_v3 = vadd.f32 %v2746_v16, %v2622_v63  ;;  %v6152_v51 = vpop.f32.mrf.mxu1 }
 0x566   :  { %v6154_v44 = vpop.f32.mrf.mxu0 }
 0x567   :  { %v2753_v61 = vpop.f32.mrf.mxu1 }
 0x568   :  { %v3586_v14 = vpop.f32.mrf.mxu0 }
 0x569   :  { %v6156_v56 = vpop.f32.mrf.mxu1 }
 0x56a   :  { %v3588_v54 = vpop.f32.mrf.mxu0 }
 0x56b   :  { %v2758_v20 = vpop.f32.mrf.mxu1 }
 0x56c   :  { %v3589_v24 = vpop.f32.mrf.mxu0 }
 0x56d   :  { %v6158_v40 = vpop.f32.mrf.mxu1  ;;  %v3590_v61 = vadd.f32 %v3589_v24, %v3588_v54 }
 0x56e   :  { %v3591_v15 = vpop.f32.mrf.mxu0 }
 0x56f   :  { %v2763_v47 = vpop.f32.mrf.mxu1 }
 0x570   :  { %v3592_v57 = vpop.f32.mrf.mxu0 }
 0x571   :  { %v6160_v34 = vpop.f32.mrf.mxu1  ;;  %v3593_v19 = vadd.f32 %v3592_v57, %v3591_v15  ;;  %v3584_v57 = vadd.f32 %v6148_v42, %v6145_v13 }
 0x572   :  { %v3594_v35 = vpop.f32.mrf.mxu0 }
 0x573   :  { %v2768_v27 = vpop.f32.mrf.mxu1 }
 0x574   :  { %v3595_v32 = vpop.f32.mrf.mxu0 }
 0x575   :  { %v2771_v9 = vpop.f32.mrf.mxu1  ;;  %v3596_v55 = vadd.f32 %v3595_v32, %v3594_v35 }
 0x576   :  { %v3597_v58 = vpop.f32.mrf.mxu0 }
 0x577   :  { %v2773_v0 = vpop.f32.mrf.mxu1  ;;  %v2647_v47 = vadd.f32 %v3596_v55, %v6143_v46 }
 0x578   :  { %v3598_v5 = vpop.f32.mrf.mxu0  ;;  %v2642_v0 = vadd.f32 %v3593_v19, %v6143_v46 }
 0x579   :  { %v2776_v8 = vpop.f32.mrf.mxu1  ;;  %v3599_v53 = vadd.f32 %v3598_v5, %v3597_v58  ;;  %v3587_v58 = vadd.f32 %v3586_v14, %v6154_v44  ;;  %v2772_v54 = vadd.f32 %v2771_v9, %v2647_v47 }
 0x57a   :  { %v3600_v37 = vpop.f32.mrf.mxu0 }
 0x57b   :  { %v2778_v59 = vpop.f32.mrf.mxu1  ;;  %v2652_v6 = vadd.f32 %v3599_v53, %v6143_v46 }
 0x57c   :  { %v3601_v11 = vpop.f32.mrf.mxu0  ;;  %v2637_v59 = vadd.f32 %v3590_v61, %v6143_v46  ;;  %v3052_v61 = vld [vmem:[%s6457_s8 + $0x60] sm:$0xff] }
 0x57d   :  { %v2781_v1 = vpop.f32.mrf.mxu1  ;;  %v3602_v45 = vadd.f32 %v3601_v11, %v3600_v37  ;;  %v2777_v5 = vadd.f32 %v2776_v8, %v2652_v6 }
 0x57e   :  { %v3603_v43 = vpop.f32.mrf.mxu0  ;;  %v2762_v9 = vadd.f32 %v6158_v40, %v2637_v59  ;;  %v3042_v59 = vld [vmem:[%s6457_s8 + $0x10] sm:$0xff] }
 0x57f   :  { %v2783_v28 = vpop.f32.mrf.mxu1  ;;  %v2657_v2 = vadd.f32 %v3602_v45, %v6143_v46  ;;  %v2811_v44 = vmax.f32 %v2777_v5, 0.0  ;;  %v3046_v5 = vld [vmem:[%s6457_s8 + $0x30] sm:$0xff] }
 0x580   :  { %v3604_v48 = vpop.f32.mrf.mxu0 }
 0x581   :  { %v2786_v21 = vpop.f32.mrf.mxu1  ;;  %v3605_v17 = vadd.f32 %v3604_v48, %v3603_v43  ;;  %v2782_v27 = vadd.f32 %v2781_v1, %v2657_v2  ;;  %v2632_v1 = vadd.f32 %v3587_v58, %v6143_v46  ;;  %v2767_v48 = vadd.f32 %v6160_v34, %v2642_v0  ;;  %v3048_v58 = vld [vmem:[%s6457_s8 + $0x40] sm:$0xff]  ;;  %v3047_v0 = vld [vmem:[%s6457_s8 + $0x38] sm:$0xff] }
 0x582   :  { %v3606_v36 = vpop.f32.mrf.mxu0 }
 0x583   :  { %v2788_v7 = vpop.f32.mrf.mxu1  ;;  %v2662_v50 = vadd.f32 %v3605_v17, %v6143_v46  ;;  %v2812_v24 = vmax.f32 %v2782_v27, 0.0  ;;  %v2757_v34 = vadd.f32 %v6156_v56, %v2632_v1  ;;  %v3051_v27 = vld [vmem:[%s6457_s8 + $0x58] sm:$0xff] }
 0x584   :  { %v3607_v23 = vpop.f32.mrf.mxu0  ;;  %v2810_v7 = vmax.f32 %v2772_v54, 0.0 }
 0x585   :  { %v3608_v38 = vadd.f32 %v3607_v23, %v3606_v36  ;;  %v2791_v60 = vpop.f32.mrf.mxu1  ;;  %v2787_v16 = vadd.f32 %v2786_v21, %v2662_v50  ;;  %v2627_v36 = vadd.f32 %v3584_v57, %v6143_v46  ;;  %v2842_v23 = vrot.slane %v2812_v24, 1  ;;  %v3043_v57 = vld [vmem:[%s6457_s8 + $0x18] sm:$0xff] }
 0x586   :  { %v3609_v33 = vpop.f32.mrf.mxu0  ;;  %v2838_v45 = vrot.slane %v2810_v7, 1  ;;  %v2807_v56 = vmax.f32 %v2757_v34, 0.0 }
 0x587   :  { %v2793_v12 = vpop.f32.mrf.mxu1  ;;  %v2667_v30 = vadd.f32 %v3608_v38, %v6143_v46  ;;  %v2813_v37 = vmax.f32 %v2787_v16, 0.0  ;;  %v2752_v40 = vadd.f32 %v6152_v51, %v2627_v36 }
 0x588   :  { %v3610_v49 = vpop.f32.mrf.mxu0  ;;  %v2832_v55 = vrot.slane %v2807_v56, 1 }
 0x589   :  { %v3611_v25 = vadd.f32 %v3610_v49, %v3609_v33  ;;  %v2796_v52 = vpop.f32.mrf.mxu1  ;;  %v2792_v62 = vadd.f32 %v2791_v60, %v2667_v30  ;;  %v2844_v14 = vrot.slane %v2813_v37, 1  ;;  %v2809_v60 = vmax.f32 %v2767_v48, 0.0 }
 0x58a   :  { %v3612_v22 = vpop.f32.mrf.mxu0  ;;  %v2808_v49 = vmax.f32 %v2762_v9, 0.0  ;;  %v2806_v50 = vmax.f32 %v2752_v40, 0.0  ;;  %v2937_v40 = vld [vmem:[#allocation4 + $0x8] sm:$0xff] }
 0x58b   :  { %v2672_v39 = vadd.f32 %v3611_v25, %v6143_v46  ;;  %v2798_v4 = vpop.f32.mrf.mxu1  ;;  %v2814_v35 = vmax.f32 %v2792_v62, 0.0  ;;  %v2845_v17 = vsel %vm161_vm1, %v2842_v23, %v2844_v14  ;;  %v2836_v25 = vrot.slane %v2809_v60, 1 }
 0x58c   :  { %v3613_v41 = vpop.f32.mrf.mxu0  ;;  %v2834_v51 = vrot.slane %v2808_v49, 1  ;;  %v2805_v4 = vmax.f32 %v6150_v3, 0.0 }
 0x58d   :  { %v2797_v10 = vadd.f32 %v2796_v52, %v2672_v39  ;;  %v3614_v31 = vadd.f32 %v3613_v41, %v3612_v22  ;;  %v2801_v26 = vpop.f32.mrf.mxu1  ;;  %v2846_v43 = vrot.slane %v2814_v35, 1  ;;  %v6201_v52 = vmax.f32 %v2812_v24, %v2845_v17 }
 0x58e   :  { %v2839_v39 = vsel %vm161_vm1, %v2836_v25, %v2838_v45  ;;  %v2837_v2 = vsel %vm161_vm1, %v2834_v51, %v2836_v25  ;;  %v2829_v3 = vrot.slane %v2805_v4, 1 }
 0x58f   :  { %v2677_v63 = vadd.f32 %v3614_v31, %v6143_v46  ;;  %v2803_v18 = vpop.f32.mrf.mxu1  ;;  %v2815_v20 = vmax.f32 %v2797_v10, 0.0  ;;  %v2847_v38 = vsel %vm161_vm1, %v2844_v14, %v2846_v43  ;;  %v2840_v46 = vrot.slane %v2811_v44, 1  ;;  %v2936_v10 = vld [vmem:[#allocation4] sm:$0xff] }
 0x590   :  { %v6193_v12 = vmax.f32 %v2813_v37, %v2847_v38  ;;  %v6215_v62 = vmax.f32 %v2809_v60, %v2839_v39  ;;  %v2830_v31 = vrot.slane %v2806_v50, 1  ;;  %3742 = vmatprep.mubr.msk.f32.mxu0 %vm1848_vm10, %v2936_v10  ;;  %v6223_v19 = vmax.f32 %v2808_v49, %v2837_v2  ;;  %v3053_v18 = vld [vmem:[%s6457_s8 + $0x68] sm:$0xff]  ;;  %v2938_v49 = vld [vmem:[#allocation4 + $0x10] sm:$0xff]  ;;  %v3189_v2 = vld [vmem:[%s6458_s9 + $0xe0] sm:$0xff] }
 0x591   :  { %v2802_v32 = vadd.f32 %v2801_v26, %v2677_v63  ;;  %v2848_v11 = vrot.slane %v2815_v20, 1  ;;  %v2843_v30 = vsel %vm161_vm1, %v2840_v46, %v2842_v23  ;;  %v2841_v22 = vsel %vm161_vm1, %v2838_v45, %v2840_v46  ;;  %3748 = vmatprep.subr.mxu1 %v3053_v18  ;;  %v3045_v37 = vld [vmem:[%s6457_s8 + $0x28] sm:$0xff]  ;;  %v2939_v45 = vld [vmem:[#allocation4 + $0x18] sm:$0xff]  ;;  %v3191_v39 = vld [vmem:[%s6458_s9 + $0xf0] sm:$0xff] }
 0x592   :  { %v6204_v53 = vmax.f32 %v2811_v44, %v2843_v30  ;;  %v6212_v41 = vmax.f32 %v2810_v7, %v2841_v22  ;;  %v2835_v26 = vsel %vm161_vm1, %v2832_v55, %v2834_v51  ;;  %v2833_v6 = vsel %vm161_vm1, %v2830_v31, %v2832_v55  ;;  %3749 = vmatpush3.msra.mxu1 %v3053_v18  ;;  %v3041_v30 = vld [vmem:[%s6457_s8 + $0x8] sm:$0xff]  ;;  %v3176_v51 = vld [vmem:[%s6458_s9 + $0x78] sm:$0xff] }
 0x593   :  { %v2816_v15 = vmax.f32 %v2802_v32, 0.0  ;;  %v2849_v13 = vsel %vm161_vm1, %v2846_v43, %v2848_v11  ;;  %v6226_v16 = vmax.f32 %v2807_v56, %v2835_v26  ;;  %v2831_v63 = vsel %vm161_vm1, %v2829_v3, %v2830_v31  ;;  %3750 = vmatprep.subr.mxu1 %v3052_v61  ;;  %v3049_v32 = vld [vmem:[%s6457_s8 + $0x48] sm:$0xff]  ;;  %v3040_v56 = vld [vmem:[%s6457_s8] sm:$0xff]  ;;  %v3188_v10 = vld [vmem:[%s6458_s9 + $0xd8] sm:$0xff] }
 0x594   :  { %v6190_v33 = vmax.f32 %v2814_v35, %v2849_v13  ;;  %v6241_v47 = vmax.f32 %v2805_v4, %v2831_v63  ;;  %3751 = vmatpush3.msra.mxu1 %v3052_v61  ;;  %v3050_v35 = vld [vmem:[%s6457_s8 + $0x50] sm:$0xff]  ;;  %v3190_v55 = vld [vmem:[%s6458_s9 + $0xe8] sm:$0xff]  ;;  %v3172_v31 = vld [vmem:[%s6458_s9 + $0x58] sm:$0xff] }
 0x595   :  { %v2850_v28 = vrot.slane %v2816_v15, 1  ;;  %3752 = vmatprep.subr.mxu1 %v3051_v27  ;;  %v3175_v4 = vld [vmem:[%s6458_s9 + $0x70] sm:$0xff]  ;;  %v3169_v63 = vld [vmem:[%s6458_s9 + $0x40] sm:$0xff]  ;;  %v3184_v18 = vld [vmem:[%s6458_s9 + $0xb8] sm:$0xff] }
 0x596   :  { %3753 = vmatpush3.msra.mxu1 %v3051_v27  ;;  %v3187_v26 = vld [vmem:[%s6458_s9 + $0xd0] sm:$0xff]  ;;  %v3168_v61 = vld [vmem:[%s6458_s9 + $0x38] sm:$0xff]  ;;  %v3182_v27 = vld [vmem:[%s6458_s9 + $0xa8] sm:$0xff] }
 0x597   :  { %v2851_v8 = vsel %vm161_vm1, %v2848_v11, %v2850_v28  ;;  %v6177_v21 = vmax.f32 %v2816_v15, %v2850_v28  ;;  %3754 = vmatprep.subr.mxu1 %v3050_v35  ;;  %v3044_v15 = vld [vmem:[%s6457_s8 + $0x20] sm:$0xff]  ;;  %v3171_v3 = vld [vmem:[%s6458_s9 + $0x50] sm:$0xff] }
 0x598   :  { %v6181_v42 = vmax.f32 %v2815_v20, %v2851_v8  ;;  %v6239_v20 = vmax.f32 %v2806_v50, %v2833_v6  ;;  %3755 = vmatpush3.msra.mxu1 %v3050_v35  ;;  %v3192_v50 = vld [vmem:[%s6458_s9 + $0xf8] sm:$0xff]  ;;  %v3170_v6 = vld [vmem:[%s6458_s9 + $0x48] sm:$0xff] }
 0x599   :  { %2910 = vrot.lane.b32.xlu1 %v6177_v21, %s4246_s29  ;;  %3756 = vmatprep.subr.mxu1 %v3049_v32  ;;  %v3166_v35 = vld [vmem:[%s6458_s9 + $0x28] sm:$0xff] }
 0x59a   :  { %2908 = vrot.lane.b32.xlu0 %v6181_v42, %s4246_s29  ;;  %3757 = vmatpush3.msra.mxu1 %v3049_v32  ;;  %v3181_v32 = vld [vmem:[%s6458_s9 + $0xa0] sm:$0xff] }
 0x59b   :  { %3758 = vmatprep.subr.mxu1 %v3048_v58 }
 0x59c   :  { %3759 = vmatpush3.msra.mxu1 %v3048_v58  ;;  %v3165_v58 = vld [vmem:[%s6458_s9 + $0x20] sm:$0xff] }
 0x59d   :  { %2906 = vrot.lane.b32.xlu1 %v6190_v33, %s4246_s29  ;;  %3760 = vmatprep.subr.mxu1 %v3047_v0 }
 0x59e   :  { %2904 = vrot.lane.b32.xlu0 %v6193_v12, %s4246_s29  ;;  %3761 = vmatpush3.msra.mxu1 %v3047_v0  ;;  %v3180_v0 = vld [vmem:[%s6458_s9 + $0x98] sm:$0xff] }
 0x59f   :  { %3762 = vmatprep.subr.mxu1 %v3046_v5 }
 0x5a0   :  { %3763 = vmatpush3.msra.mxu1 %v3046_v5  ;;  %v3164_v5 = vld [vmem:[%s6458_s9 + $0x18] sm:$0xff] }
 0x5a1   :  { %2902 = vrot.lane.b32.xlu1 %v6201_v52, %s4246_s29  ;;  %3764 = vmatprep.subr.mxu1 %v3045_v37 }
 0x5a2   :  { %2900 = vrot.lane.b32.xlu0 %v6204_v53, %s4246_s29  ;;  %3765 = vmatpush3.msra.mxu1 %v3045_v37  ;;  %v3179_v37 = vld [vmem:[%s6458_s9 + $0x90] sm:$0xff] }
 0x5a3   :  { %3766 = vmatprep.subr.mxu1 %v3044_v15 }
 0x5a4   :  { %3767 = vmatpush3.msra.mxu1 %v3044_v15  ;;  %v3163_v15 = vld [vmem:[%s6458_s9 + $0x10] sm:$0xff] }
 0x5a5   :  { %2898 = vrot.lane.b32.xlu1 %v6212_v41, %s4246_s29  ;;  %3768 = vmatprep.subr.mxu1 %v3043_v57 }
 0x5a6   :  { %2896 = vrot.lane.b32.xlu0 %v6215_v62, %s4246_s29  ;;  %3769 = vmatpush3.msra.mxu1 %v3043_v57  ;;  %v3178_v57 = vld [vmem:[%s6458_s9 + $0x88] sm:$0xff] }
 0x5a7   :  { %3770 = vmatprep.subr.mxu1 %v3042_v59 }
 0x5a8   :  { %3771 = vmatpush3.msra.mxu1 %v3042_v59  ;;  %v3162_v59 = vld [vmem:[%s6458_s9 + $0x8] sm:$0xff] }
 0x5a9   :  { %2894 = vrot.lane.b32.xlu1 %v6223_v19, %s4246_s29  ;;  %3772 = vmatprep.subr.mxu1 %v3041_v30 }
 0x5aa   :  { %2892 = vrot.lane.b32.xlu0 %v6226_v16, %s4246_s29  ;;  %3773 = vmatpush3.msra.mxu1 %v3041_v30  ;;  %v3271_v30 = vld [vmem:[#allocation6] sm:$0xff] }
 0x5ab   :  { %3774 = vmatprep.subr.mxu1 %v3040_v56 }
 0x5ac   :  { %3775 = vmatpush3.msra.mxu1 %v3040_v56  ;;  %v3380_v56 = vld [vmem:[#allocation7 + $0x78] sm:$0xff] }
 0x5ad   :  { %2890 = vrot.lane.b32.xlu1 %v6239_v20, %s4246_s29  ;;  %3782 = vmatprep.subr.mxu1 %v4249_v29 }
 0x5ae   :  { %2888 = vrot.lane.b32.xlu0 %v6241_v47, %s4246_s29 }
 0x60b   :  { %v2911_v11 = vpop.permute.xlu1 %2910 }
 0x60c   :  { %v2935_v54 = vmax.f32 %v6177_v21, %v2911_v11  ;;  %v2909_v24 = vpop.permute.xlu0 %2908  ;;  %v3177_v11 = vld [vmem:[%s6458_s9 + $0x80] sm:$0xff] }
 0x60d   :  { %v2934_v43 = vmax.f32 %v6181_v42, %v2909_v24  ;;  %v3286_v24 = vld [vmem:[#allocation6 + $0x78] sm:$0xff] }
 0x60e   :  { %3718 = vmatprep.subr.msk.mxu0 %vm1885_vm11, %v2935_v54 }
 0x60f   :  { %3719 = vmatpush3.msk.msra.mxu0 %vm1885_vm11, %v2935_v54  ;;  %v2907_v28 = vpop.permute.xlu1 %2906  ;;  %v3161_v54 = vld [vmem:[%s6458_s9] sm:$0xff] }
 0x610   :  { %v2933_v1 = vmax.f32 %v6190_v33, %v2907_v28  ;;  %3720 = vmatprep.subr.mxu0 %v2934_v43  ;;  %v2905_v48 = vpop.permute.xlu0 %2904 }
 0x611   :  { %v2932_v44 = vmax.f32 %v6193_v12, %v2905_v48  ;;  %3721 = vmatpush3.msra.mxu0 %v2934_v43  ;;  %v3285_v43 = vld [vmem:[#allocation6 + $0x70] sm:$0xff] }
 0x612   :  { %3722 = vmatprep.subr.mxu0 %v2933_v1 }
 0x613   :  { %3723 = vmatpush3.msra.mxu0 %v2933_v1  ;;  %v2903_v14 = vpop.permute.xlu1 %2902  ;;  %v3284_v1 = vld [vmem:[#allocation6 + $0x68] sm:$0xff] }
 0x614   :  { %v2931_v8 = vmax.f32 %v6201_v52, %v2903_v14  ;;  %3724 = vmatprep.subr.mxu0 %v2932_v44  ;;  %v2901_v21 = vpop.permute.xlu0 %2900 }
 0x615   :  { %v2930_v36 = vmax.f32 %v6204_v53, %v2901_v21  ;;  %3725 = vmatpush3.msra.mxu0 %v2932_v44  ;;  %v3283_v44 = vld [vmem:[#allocation6 + $0x60] sm:$0xff] }
 0x616   :  { %3726 = vmatprep.subr.mxu0 %v2931_v8 }
 0x617   :  { %3727 = vmatpush3.msra.mxu0 %v2931_v8  ;;  %v2899_v13 = vpop.permute.xlu1 %2898  ;;  %v3282_v8 = vld [vmem:[#allocation6 + $0x58] sm:$0xff] }
 0x618   :  { %v2929_v42 = vmax.f32 %v6212_v41, %v2899_v13  ;;  %3728 = vmatprep.subr.mxu0 %v2930_v36  ;;  %v2897_v9 = vpop.permute.xlu0 %2896  ;;  %v3174_v41 = vld [vmem:[%s6458_s9 + $0x68] sm:$0xff] }
 0x619   :  { %v2928_v7 = vmax.f32 %v6215_v62, %v2897_v9  ;;  %3729 = vmatpush3.msra.mxu0 %v2930_v36  ;;  %v3173_v62 = vld [vmem:[%s6458_s9 + $0x60] sm:$0xff]  ;;  %v3281_v36 = vld [vmem:[#allocation6 + $0x50] sm:$0xff]  ;;  %v3280_v13 = vld [vmem:[#allocation6 + $0x48] sm:$0xff] }
 0x61a   :  { %3730 = vmatprep.subr.mxu0 %v2929_v42  ;;  %v3278_v9 = vld [vmem:[#allocation6 + $0x38] sm:$0xff] }
 0x61b   :  { %3731 = vmatpush3.msra.mxu0 %v2929_v42  ;;  %v2895_v23 = vpop.permute.xlu1 %2894  ;;  %v3279_v42 = vld [vmem:[#allocation6 + $0x40] sm:$0xff] }
 0x61c   :  { %v2927_v38 = vmax.f32 %v6223_v19, %v2895_v23  ;;  %3732 = vmatprep.subr.mxu0 %v2928_v7  ;;  %v2893_v34 = vpop.permute.xlu0 %2892  ;;  %v3186_v19 = vld [vmem:[%s6458_s9 + $0xc8] sm:$0xff] }
 0x61d   :  { %v2926_v60 = vmax.f32 %v6226_v16, %v2893_v34  ;;  %3733 = vmatpush3.msra.mxu0 %v2928_v7  ;;  %v3185_v16 = vld [vmem:[%s6458_s9 + $0xc0] sm:$0xff]  ;;  %v3277_v7 = vld [vmem:[#allocation6 + $0x30] sm:$0xff]  ;;  %v3276_v23 = vld [vmem:[#allocation6 + $0x28] sm:$0xff] }
 0x61e   :  { %3734 = vmatprep.subr.mxu0 %v2927_v38 }
 0x61f   :  { %3735 = vmatpush3.msra.mxu0 %v2927_v38  ;;  %v2891_v46 = vpop.permute.xlu1 %2890 }
 0x620   :  { %v2925_v33 = vmax.f32 %v6239_v20, %v2891_v46  ;;  %3736 = vmatprep.subr.mxu0 %v2926_v60  ;;  %v2889_v17 = vpop.permute.xlu0 %2888  ;;  %v3183_v20 = vld [vmem:[%s6458_s9 + $0xb0] sm:$0xff] }
 0x621   :  { %v2924_v12 = vmax.f32 %v6241_v47, %v2889_v17  ;;  %3737 = vmatpush3.msra.mxu0 %v2926_v60  ;;  %v3167_v47 = vld [vmem:[%s6458_s9 + $0x30] sm:$0xff] }
 0x622   :  { %3738 = vmatprep.subr.mxu0 %v2925_v33 }
 0x623   :  { %3739 = vmatpush3.msra.mxu0 %v2925_v33 }
 0x624   :  { %3740 = vmatprep.subr.mxu0 %v2924_v12 }
 0x625   :  { %3741 = vmatpush3.msra.mxu0 %v2924_v12  ;;  %v3275_v12 = vld [vmem:[#allocation6 + $0x20] sm:$0xff] }
 0x626   :  { %3743 = vmatmul.mubr.msk.f32.vlgmr.msra.gmra.mxu0 %vm1848_vm10, %v2937_v40  ;;  %3649 = vmatprep.subr.mxu0 %v3192_v50  ;;  %v3274_v40 = vld [vmem:[#allocation6 + $0x18] sm:$0xff]  ;;  %v3375_v50 = vld [vmem:[#allocation7 + $0x50] sm:$0xff] }
 0x627   :  { %3745 = vmatprep.mubr.msk.f32.mxu0 %vm1848_vm10, %v2938_v49  ;;  %3650 = vmatpush3.msra.mxu0 %v3176_v51  ;;  %v3273_v49 = vld [vmem:[#allocation6 + $0x10] sm:$0xff]  ;;  %v3374_v51 = vld [vmem:[#allocation7 + $0x48] sm:$0xff] }
 0x628   :  { %3651 = vmatprep.subr.mxu0 %v3191_v39  ;;  %v3373_v39 = vld [vmem:[#allocation7 + $0x40] sm:$0xff] }
 0x629   :  { %3652 = vmatpush3.msra.mxu0 %v3175_v4  ;;  %v3372_v4 = vld [vmem:[#allocation7 + $0x38] sm:$0xff] }
 0x62a   :  { %3746 = vmatmul.mubr.msk.f32.gmra.mxu0 %vm1848_vm10, %v2939_v45  ;;  %3653 = vmatprep.subr.mxu0 %v3190_v55  ;;  %v3272_v45 = vld [vmem:[#allocation6 + $0x8] sm:$0xff]  ;;  %v3371_v55 = vld [vmem:[#allocation7 + $0x30] sm:$0xff] }
 0x62b   :  { %3654 = vmatpush3.msra.mxu0 %v3174_v41  ;;  %v3370_v41 = vld [vmem:[#allocation7 + $0x28] sm:$0xff] }
 0x62c   :  { %3655 = vmatprep.subr.mxu0 %v3189_v2  ;;  %v3369_v2 = vld [vmem:[#allocation7 + $0x20] sm:$0xff] }
 0x62d   :  { %3656 = vmatpush3.msra.mxu0 %v3173_v62  ;;  %v3368_v62 = vld [vmem:[#allocation7 + $0x18] sm:$0xff] }
 0x62e   :  { %3657 = vmatprep.subr.mxu0 %v3188_v10 }
 0x62f   :  { %3658 = vmatpush3.msra.mxu0 %v3172_v31  ;;  %v3544_v31 = vld [vmem:[%s6459_s10] ss:$0 sm:$0xff] }
 0x630   :  { %3659 = vmatprep.subr.mxu0 %v3187_v26 }
 0x631   :  { %3660 = vmatpush3.msra.mxu0 %v3171_v3 }
 0x632   :  { %3661 = vmatprep.subr.mxu0 %v3186_v19 }
 0x633   :  { %3662 = vmatpush3.msra.mxu0 %v3170_v6 }
 0x634   :  { %3663 = vmatprep.subr.mxu0 %v3185_v16  ;;  %v3367_v16 = vld [vmem:[#allocation7 + $0x10] sm:$0xff] }
 0x635   :  { %3664 = vmatpush3.msra.mxu0 %v3169_v63  ;;  %v3366_v63 = vld [vmem:[#allocation7 + $0x8] sm:$0xff] }
 0x636   :  { %3665 = vmatprep.subr.mxu0 %v3184_v18  ;;  %v3365_v18 = vld [vmem:[#allocation7] sm:$0xff] }
 0x637   :  { %3666 = vmatpush3.msra.mxu0 %v3168_v61  ;;  %v3545_v61 = vld [vmem:[%s6461_s12] ss:$0 sm:$0xff] }
 0x638   :  { %3667 = vmatprep.subr.mxu0 %v3183_v20 }
 0x639   :  { %3668 = vmatpush3.msra.mxu0 %v3167_v47 }
 0x63a   :  { %3669 = vmatprep.subr.mxu0 %v3182_v27 }
 0x63b   :  { %3670 = vmatpush3.msra.mxu0 %v3166_v35 }
 0x63c   :  { %3671 = vmatprep.subr.mxu0 %v3181_v32  ;;  %v3546_v32 = vld [vmem:[%s6463_s14] ss:$0 sm:$0xff] }
 0x63d   :  { %3672 = vmatpush3.msra.mxu0 %v3165_v58 }
 0x63e   :  { %3673 = vmatprep.subr.mxu0 %v3180_v0 }
 0x63f   :  { %3674 = vmatpush3.msra.mxu0 %v3164_v5 }
 0x640   :  { %3675 = vmatprep.subr.mxu0 %v3179_v37 }
 0x641   :  { %3676 = vmatpush3.msra.mxu0 %v3163_v15 }
 0x642   :  { %3677 = vmatprep.subr.mxu0 %v3178_v57 }
 0x643   :  { %3678 = vmatpush3.msra.mxu0 %v3162_v59 }
 0x644   :  { %3679 = vmatprep.subr.mxu0 %v3177_v11 }
 0x645   :  { %3680 = vmatpush3.msra.mxu0 %v3161_v54 }
 0x646   :  { %3817 = vmatprep.subr.mxu0 %v4249_v29 }
 0x6e6   :  { %v3744_v25 = vpop.f32.mrf.mxu0 }
 0x6e8   :  { %v3021_v52 = vpop.f32.mrf.mxu0 }
 0x6e9   :  { %3776 = vmatprep.mubr.msk.f32.mxu1 %vm808_vm8, %v3021_v52  ;;  %v3378_v52 = vld [vmem:[#allocation7 + $0x68] sm:$0xff] }
 0x6ea   :  { %v3747_v22 = vpop.f32.mrf.mxu0  ;;  %3777 = vmatmul.mubr.msk.f32.vlgmr.msra.gmra.mxu1 %vm808_vm8, %v3744_v25  ;;  %v3379_v25 = vld [vmem:[#allocation7 + $0x70] sm:$0xff] }
 0x6eb   :  { %3783 = vmatpush3.msra.mxu1 %v3286_v24 }
 0x6ec   :  { %v3031_v53 = vpop.f32.mrf.mxu0  ;;  %3784 = vmatprep.subr.mxu1 %v4249_v29 }
 0x6ed   :  { %3779 = vmatprep.mubr.msk.f32.mxu1 %vm808_vm8, %v3031_v53  ;;  %3785 = vmatpush3.msra.mxu1 %v3285_v43  ;;  %v3376_v53 = vld [vmem:[#allocation7 + $0x58] sm:$0xff] }
 0x6ee   :  { %3780 = vmatmul.mubr.msk.f32.gmra.mxu1 %vm808_vm8, %v3747_v22  ;;  %3786 = vmatprep.subr.mxu1 %v4249_v29  ;;  %v3377_v22 = vld [vmem:[#allocation7 + $0x60] sm:$0xff] }
 0x6ef   :  { %3787 = vmatpush3.msra.mxu1 %v3284_v1  ;;  %3814 = vmatprep.mubr.msk.f32.mxu1 %vm4253_vm15, %v4249_v29 }
 0x6f0   :  { %3788 = vmatprep.subr.mxu1 %v4249_v29 }
 0x6f1   :  { %3789 = vmatpush3.msra.mxu1 %v3283_v44 }
 0x6f2   :  { %3790 = vmatprep.subr.mxu1 %v4249_v29 }
 0x6f3   :  { %3791 = vmatpush3.msra.mxu1 %v3282_v8 }
 0x6f4   :  { %3792 = vmatprep.subr.mxu1 %v4249_v29 }
 0x6f5   :  { %3793 = vmatpush3.msra.mxu1 %v3281_v36 }
 0x6f6   :  { %3794 = vmatprep.subr.mxu1 %v4249_v29 }
 0x6f7   :  { %3795 = vmatpush3.msra.mxu1 %v3280_v13 }
 0x6f8   :  { %3796 = vmatprep.subr.mxu1 %v4249_v29 }
 0x6f9   :  { %3797 = vmatpush3.msra.mxu1 %v3279_v42 }
 0x6fa   :  { %3798 = vmatprep.subr.mxu1 %v4249_v29 }
 0x6fb   :  { %3799 = vmatpush3.msra.mxu1 %v3278_v9 }
 0x6fc   :  { %3800 = vmatprep.subr.mxu1 %v4249_v29 }
 0x6fd   :  { %3801 = vmatpush3.msra.mxu1 %v3277_v7 }
 0x6fe   :  { %3802 = vmatprep.subr.mxu1 %v4249_v29 }
 0x6ff   :  { %3803 = vmatpush3.msra.mxu1 %v3276_v23 }
 0x700   :  { %3804 = vmatprep.subr.mxu1 %v4249_v29 }
 0x701   :  { %3805 = vmatpush3.msra.mxu1 %v3275_v12 }
 0x702   :  { %3806 = vmatprep.subr.mxu1 %v4249_v29 }
 0x703   :  { %3807 = vmatpush3.msra.mxu1 %v3274_v40 }
 0x704   :  { %3808 = vmatprep.subr.mxu1 %v4249_v29 }
 0x705   :  { %3809 = vmatpush3.msra.mxu1 %v3273_v49 }
 0x706   :  { %3810 = vmatprep.subr.mxu1 %v4249_v29 }
 0x707   :  { %3811 = vmatpush3.msra.mxu1 %v3272_v45 }
 0x708   :  { %3812 = vmatprep.subr.mxu1 %v4249_v29 }
 0x709   :  { %3813 = vmatpush3.msra.mxu1 %v3271_v30 }
 0x7aa   :  { %v3778_v28 = vpop.f32.mrf.mxu1 }
 0x7ac   :  { %v3132_v48 = vpop.f32.mrf.mxu1 }
 0x7ae   :  { %v3781_v14 = vpop.f32.mrf.mxu1 }
 0x7af   :  { %v4145_v21 = vpack.i.bf16 %v3778_v28, %v3781_v14 }
 0x7b0   :  { %v3142_v46 = vpop.f32.mrf.mxu1 }
 0x7b1   :  { %4146 = vrot.lane.b32.xlu1 %v4145_v21, %s4250_s5 }
 0x823   :  { %v4147_v38 = vpop.permute.xlu1 %4146 }
 0x824   :  { %v4149_v34 = vunpack.i.h.bf16 %v4147_v38  ;;  %v4148_v60 = vunpack.i.l.bf16 %v4147_v38 }
 0x826   :  { %v3159_v33 = vsel %vm2438_vm13, %v3132_v48, %v4149_v34  ;;  %v3160_v17 = vsel %vm2438_vm13, %v3142_v46, %v4148_v60 }
 0x827   :  { %3264 = vmatprep.mubr.f32.mxu0 %v3160_v17 }
 0x828   :  { %3265 = vmatmul.mubr.f32.vlgmr.msra.gmra.mxu0 %v3159_v33 }
 0x829   :  { %3849 = vmatprep.mubr.msk.f32.mxu0 %vm4253_vm15, %v4249_v29  ;;  %3818 = vmatpush3.msra.mxu0 %v3380_v56 }
 0x82a   :  { %3819 = vmatprep.subr.mxu0 %v4249_v29 }
 0x82b   :  { %3820 = vmatpush3.msra.mxu0 %v3379_v25 }
 0x82c   :  { %3821 = vmatprep.subr.mxu0 %v4249_v29 }
 0x82d   :  { %3822 = vmatpush3.msra.mxu0 %v3378_v52 }
 0x82e   :  { %3823 = vmatprep.subr.mxu0 %v4249_v29 }
 0x82f   :  { %3824 = vmatpush3.msra.mxu0 %v3377_v22 }
 0x830   :  { %3825 = vmatprep.subr.mxu0 %v4249_v29 }
 0x831   :  { %3826 = vmatpush3.msra.mxu0 %v3376_v53 }
 0x832   :  { %3827 = vmatprep.subr.mxu0 %v4249_v29 }
 0x833   :  { %3828 = vmatpush3.msra.mxu0 %v3375_v50 }
 0x834   :  { %3829 = vmatprep.subr.mxu0 %v4249_v29 }
 0x835   :  { %3830 = vmatpush3.msra.mxu0 %v3374_v51 }
 0x836   :  { %3831 = vmatprep.subr.mxu0 %v4249_v29 }
 0x837   :  { %3832 = vmatpush3.msra.mxu0 %v3373_v39 }
 0x838   :  { %3833 = vmatprep.subr.mxu0 %v4249_v29 }
 0x839   :  { %3834 = vmatpush3.msra.mxu0 %v3372_v4 }
 0x83a   :  { %3835 = vmatprep.subr.mxu0 %v4249_v29 }
 0x83b   :  { %3836 = vmatpush3.msra.mxu0 %v3371_v55 }
 0x83c   :  { %3837 = vmatprep.subr.mxu0 %v4249_v29 }
 0x83d   :  { %3838 = vmatpush3.msra.mxu0 %v3370_v41 }
 0x83e   :  { %3839 = vmatprep.subr.mxu0 %v4249_v29 }
 0x83f   :  { %3840 = vmatpush3.msra.mxu0 %v3369_v2 }
 0x840   :  { %3841 = vmatprep.subr.mxu0 %v4249_v29 }
 0x841   :  { %3842 = vmatpush3.msra.mxu0 %v3368_v62 }
 0x842   :  { %3843 = vmatprep.subr.mxu0 %v4249_v29 }
 0x843   :  { %3844 = vmatpush3.msra.mxu0 %v3367_v16 }
 0x844   :  { %3845 = vmatprep.subr.mxu0 %v4249_v29 }
 0x845   :  { %3846 = vmatpush3.msra.mxu0 %v3366_v63 }
 0x846   :  { %3847 = vmatprep.subr.mxu0 %v4249_v29 }
 0x847   :  { %3848 = vmatpush3.msra.mxu0 %v3365_v18 }
 0x8e8   :  { %v3681_v10 = vpop.f32.mrf.mxu0 }
 0x8ea   :  { %v3682_v26 = vpop.f32.mrf.mxu0 }
 0x8eb   :  { %v3683_v3 = vadd.f32 %v3682_v26, %v3681_v10 }
 0x8ed   :  { %v3267_v19 = vadd.f32 %v3683_v3, %v3544_v31 }
 0x8ef   :  { %v3270_v6 = vmax.f32 %v3267_v19, 0.0 }
 0x8f1   :  { %3815 = vmatmul.mubr.f32.vlgmr.msra.gmra.mxu1 %v3270_v6 }
 0x9b1   :  { %v3360_v20 = vpop.f32.mrf.mxu1 }
 0x9b2   :  { %v3361_v47 = vadd.f32 %v3545_v61, %v3360_v20 }
 0x9b3   :  { %v3816_v27 = vpop.f32.mrf.mxu1 }
 0x9b4   :  { %v3364_v35 = vmax.f32 %v3361_v47, 0.0 }
 0x9b6   :  { %3850 = vmatmul.mubr.f32.vlgmr.msra.gmra.mxu0 %v3364_v35 }
 0xa76   :  { %v3454_v58 = vpop.f32.mrf.mxu0 }
 0xa77   :  { %v3455_v0 = vadd.f32 %v3546_v32, %v3454_v58 }
 0xa78   :  { %v3851_v5 = vpop.f32.mrf.mxu0 }
 0xa79   :  { %3458 = vst [vmem:[%s6464_s15] sm:$0xff] %v3455_v0 }
 0xa7a   :  { %3463 = vsyncpa [#allocation3], 1 }
 0xa7b   :  { %3464 = vsyncpa [#allocation5], 1 }
 0xa7c   :  { %3465 = vsyncpa [#allocation8], 1 }

</bundles_post_ra>
